<compile_context>
chip_gen: v7x
topology: tpu7x:2x2x1
jax: 0.10.0
libtpu: 0.0.40
codegen_flags: <defaults>
</compile_context>

<pallas_src>
import functools

import jax
import jax.numpy as jnp
from jax.experimental import pallas as pl
from jax.experimental.pallas import tpu as pltpu


def attentive_block_kernel(
    xq_ref, xkv_ref, posq_ref, posk_ref,
    gq_ref, bq_ref, gk_ref, bk_ref, gv_ref, bv_ref,
    wq_ref, wk_ref, wv_ref, wp_ref, bp_ref,
    out_ref,
    q_scr, k_scr, v_scr,
    *, num_heads, eps):
  """One grid step: one batch element x one query tile vs. the full key set."""
  nq = xq_ref.shape[1]
  d = xq_ref.shape[2]
  hd = d // num_heads
  out_p = out_ref.shape[2]
  cdt = wq_ref.dtype            # MXU-input dtype (bf16 or f32); accumulation f32
  f32 = jnp.float32

  def layer_norm(x, g_ref, b_ref):
    mu = jnp.mean(x, axis=-1, keepdims=True)
    var = jnp.mean(jnp.square(x - mu), axis=-1, keepdims=True)
    return ((x - mu) * jax.lax.rsqrt(var + eps) * g_ref[...].astype(f32)
            + b_ref[...].astype(f32))

  # ---- K/V path: LayerNorm + projection only once per batch element ----
  # Hoisted out of the query-tile axis; results persist in VMEM scratch and are
  # reused by every query tile of this batch element (q axis is "arbitrary").
  @pl.when(pl.program_id(1) == 0)
  def _():
    xk = xkv_ref[0].astype(f32) + posk_ref[0].astype(f32)       # (Nk, D)
    xv = xkv_ref[0].astype(f32)
    k_in = layer_norm(xk, gk_ref, bk_ref).astype(cdt)
    v_in = layer_norm(xv, gv_ref, bv_ref).astype(cdt)
    k_scr[...] = jnp.dot(k_in, wk_ref[...], preferred_element_type=f32).astype(cdt)
    v_scr[...] = jnp.dot(v_in, wv_ref[...], preferred_element_type=f32).astype(cdt)

  # ---- Q path ----
  # The attention scale is pre-folded into (gq, bq) by the wrapper (exact,
  # since the q projection has no bias), so no per-step (nq, D) scale multiply.
  xq = xq_ref[0].astype(f32) + posq_ref[0].astype(f32)          # (nq, D)
  q_in = layer_norm(xq, gq_ref, bq_ref).astype(cdt)
  q_scr[...] = jnp.dot(q_in, wq_ref[...], preferred_element_type=f32).astype(cdt)

  # ---- attention, one head at a time ----
  # Heads occupy disjoint lane ranges [h*hd, (h+1)*hd) of the projected
  # Q/K/V, so each head only needs static lane-slice READS (no head-major
  # gather scratch, no masked stores).  The head merge is fused into the
  # output projection as an accumulation over heads, and the f32 (nq, Nk)
  # softmax temporaries are only live for one head at a time.
  y = jnp.broadcast_to(bp_ref[...].astype(f32), (nq, out_p))    # start from bias
  for h in range(num_heads):
    lo, hi = h * hd, (h + 1) * hd
    qh = q_scr[:, lo:hi]                                        # (nq, hd)
    kh = k_scr[:, lo:hi]                                        # (Nk, hd)
    vh = v_scr[:, lo:hi]                                        # (Nk, hd)
    # q @ k^T without materializing the transpose.
    s = jax.lax.dot_general(qh, kh, (((1,), (1,)), ((), ())),
                            preferred_element_type=f32)         # (nq, Nk) f32
    s = s - jnp.max(s, axis=-1, keepdims=True)
    p = jnp.exp(s)
    l = jnp.sum(p, axis=-1, keepdims=True)                      # (nq, 1)
    o = jnp.dot(p.astype(cdt), vh, preferred_element_type=f32)  # (nq, hd)
    # Normalize AFTER the PV matmul: (nq, hd) multiplies instead of (nq, Nk);
    # the approx reciprocal runs on the EUP slot.
    o = o * pl.reciprocal(l, approx=True)
    # Head merge fused into the output projection (accumulate over heads).
    y = y + jnp.dot(o.astype(cdt), wp_ref[lo:hi, :], preferred_element_type=f32)

  out_ref[0] = y.astype(out_ref.dtype)                          # single slab store


def attentive_block(x_q, x_kv, pos_q, pos_k, params, *, num_heads,
                    eps=1e-5, block_q=None):
  """AttentiveBlock forward.  `params` holds pre-transposed (D_in, D_out) weights."""
  B, Nq, D = x_q.shape
  Nk = x_kv.shape[1]
  assert D % num_heads == 0
  hd = D // num_heads
  scale = hd ** (-0.5)

  cdt = params["wq"].dtype                 # matmul-input dtype (bf16 or f32)
  wq = params["wq"]
  wk = params["wk"].astype(cdt)
  wv = params["wv"].astype(cdt)
  wp = params["wp"].astype(cdt)
  # Fold the attention scale into norm1_q's affine params (exact because the
  # q projection has no bias with qkv_bias=False).
  gq = params["gq"].astype(jnp.float32) * scale
  bq = params["bq"].astype(jnp.float32) * scale
  gk, bk = params["gk"].astype(jnp.float32), params["bk"].astype(jnp.float32)
  gv, bv = params["gv"].astype(jnp.float32), params["bv"].astype(jnp.float32)
  bp = params["bp"].astype(jnp.float32)

  out_dim = wp.shape[1]
  # Lane-dense output stores: pad the projection output dim to a multiple of
  # 128 (zero columns), crop back after the call (layout plumbing only).
  out_p = ((out_dim + 127) // 128) * 128
  if out_p != out_dim:
    wp = jnp.pad(wp, ((0, 0), (0, out_p - out_dim)))
    bp = jnp.pad(bp, ((0, 0), (0, out_p - out_dim)))

  # One batch element per grid step (small, budgetable working set even for
  # v7x's 64 MiB VMEM; megacore parallelism comes from the batch axis).
  # Query tiles capped at 256 rows: MXU-friendly and keeps the per-head f32
  # logits at (<=256, Nk).
  if block_q is None:
    block_q = Nq if Nq <= 256 else 256
  grid = (B, pl.cdiv(Nq, block_q))

  kernel = functools.partial(attentive_block_kernel, num_heads=num_heads, eps=eps)
  out_shape = jax.ShapeDtypeStruct((B, Nq, out_p), x_q.dtype)

  def build_and_call(aggressive):
    # Constant operands (weights / biases / LN params) never change across the
    # grid; single-buffer them to halve their static VMEM footprint.
    const_mode = pl.Buffered(1) if aggressive else None

    def const_spec(shape):
      idx_map = lambda b, qi: (0,) * len(shape)
      if const_mode is None:
        return pl.BlockSpec(shape, idx_map)
      return pl.BlockSpec(shape, idx_map, pipeline_mode=const_mode)

    q_seq = pl.BlockSpec((1, block_q, D), lambda b, qi: (b, qi, 0))
    kv_seq = pl.BlockSpec((1, Nk, D), lambda b, qi: (b, 0, 0))

    cp_kwargs = dict(dimension_semantics=("parallel", "arbitrary"))
    if aggressive:
      cp_kwargs["vmem_limit_bytes"] = 64 * 1024 * 1024

    return pl.pallas_call(
        kernel,
        out_shape=out_shape,
        grid=grid,
        in_specs=[
            q_seq, kv_seq, q_seq, kv_seq,                      # x_q, x_kv, pos_q, pos_k
            const_spec((1, D)), const_spec((1, D)),            # gq, bq (scale folded)
            const_spec((1, D)), const_spec((1, D)),            # gk, bk
            const_spec((1, D)), const_spec((1, D)),            # gv, bv
            const_spec((D, D)), const_spec((D, D)), const_spec((D, D)),  # Wq, Wk, Wv
            const_spec((D, out_p)), const_spec((1, out_p)),    # Wproj, bproj (padded)
        ],
        out_specs=pl.BlockSpec((1, block_q, out_p), lambda b, qi: (b, qi, 0)),
        scratch_shapes=[
            pltpu.VMEM((block_q, D), cdt),   # projected (pre-scaled) Q
            pltpu.VMEM((Nk, D), cdt),        # projected K (persists across q tiles)
            pltpu.VMEM((Nk, D), cdt),        # projected V (persists across q tiles)
        ],
        compiler_params=pltpu.CompilerParams(**cp_kwargs),
    )(x_q, x_kv, pos_q, pos_k, gq, bq, gk, bk, gv, bv, wq, wk, wv, wp, bp)

  try:
    out = jax.block_until_ready(build_and_call(aggressive=True))
  except Exception:
    # pipeline_mode=pl.Buffered(1) / vmem-limit hints unavailable on this
    # jax/libtpu combo -> fall back to default (double-buffered) specs.
    out = build_and_call(aggressive=False)

  return out[..., :out_dim] if out_p != out_dim else out


def attentive_block_ref(x_q, x_kv, pos_q, pos_k, params, *, num_heads, eps=1e-5):
  """Pure-JAX reference mirroring the PyTorch forward exactly (f32)."""
  def ln(x, g, b):
    mu = jnp.mean(x, axis=-1, keepdims=True)
    var = jnp.mean((x - mu) ** 2, axis=-1, keepdims=True)
    return (x - mu) / jnp.sqrt(var + eps) * g + b

  B, Nq, D = x_q.shape
  Nk = x_kv.shape[1]
  hd = D // num_heads
  scale = hd ** (-0.5)

  xq = ln(x_q + pos_q, params["gq"][0], params["bq"][0])
  xk = ln(x_kv + pos_k, params["gk"][0], params["bk"][0])
  xv = ln(x_kv, params["gv"][0], params["bv"][0])

  q = (xq @ params["wq"]).reshape(B, Nq, num_heads, hd).transpose(0, 2, 1, 3)
  k = (xk @ params["wk"]).reshape(B, Nk, num_heads, hd).transpose(0, 2, 1, 3)
  v = (xv @ params["wv"]).reshape(B, Nk, num_heads, hd).transpose(0, 2, 1, 3)

  attn = jax.nn.softmax((q * scale) @ jnp.swapaxes(k, -2, -1), axis=-1)
  o = (attn @ v).transpose(0, 2, 1, 3).reshape(B, Nq, D)
  return o @ params["wp"] + params["bp"][0]


if __name__ == "__main__":
  B, Nq, Nk, D, H = 2, 8, 16, 32, 4
  key = jax.random.PRNGKey(0)
  keys = jax.random.split(key, 12)

  x_q = jax.random.normal(keys[0], (B, Nq, D), jnp.float32)
  x_kv = jax.random.normal(keys[1], (B, Nk, D), jnp.float32)
  pos_q = jax.random.normal(keys[2], (B, Nq, D), jnp.float32)
  pos_k = jax.random.normal(keys[3], (B, Nk, D), jnp.float32)

  # Deterministic synthetic parameters (qkv_bias=False, out_dim=dim); weights
  # are already transposed to (D_in, D_out): x @ W == F.linear(x, W.T).
  params = {
      "gq": 1.0 + 0.1 * jax.random.normal(keys[9], (1, D), jnp.float32),
      "bq": 0.05 * jax.random.normal(keys[10], (1, D), jnp.float32),
      "gk": 1.0 + 0.1 * jax.random.normal(keys[11], (1, D), jnp.float32),
      "bk": 0.05 * jax.random.normal(keys[4], (1, D), jnp.float32),
      "gv": jnp.ones((1, D), jnp.float32),
      "bv": jnp.zeros((1, D), jnp.float32),
      "wq": 0.05 * jax.random.normal(keys[5], (D, D), jnp.float32),
      "wk": 0.05 * jax.random.normal(keys[6], (D, D), jnp.float32),
      "wv": 0.05 * jax.random.normal(keys[7], (D, D), jnp.float32),
      "wp": 0.05 * jax.random.normal(keys[8], (D, D), jnp.float32),
      "bp": 0.01 * jax.random.normal(keys[4], (1, D), jnp.float32),
  }

  ref = attentive_block_ref(x_q, x_kv, pos_q, pos_k, params, num_heads=H)

  # f32 weights: tight check (approx reciprocal -> small tolerance).
  out = attentive_block(x_q, x_kv, pos_q, pos_k, params, num_heads=H)
  out = jax.block_until_ready(out)
  assert out.shape == (B, Nq, D), out.shape
  err = float(jnp.max(jnp.abs(out - ref)))
  assert jnp.allclose(out, ref, atol=5e-3, rtol=5e-3), err

  # bf16 weights: bf16 MXU inputs with f32 accumulation (looser check).
  params_bf16 = dict(params)
  for name in ("wq", "wk", "wv", "wp"):
    params_bf16[name] = params[name].astype(jnp.bfloat16)
  out_bf = attentive_block(x_q, x_kv, pos_q, pos_k, params_bf16, num_heads=H)
  out_bf = jax.block_until_ready(out_bf)
  err_bf = float(jnp.max(jnp.abs(out_bf - ref)))
  assert jnp.allclose(out_bf, ref, atol=5e-2, rtol=5e-2), err_bf

  print("KERNEL_OK")
</pallas_src>

<mosaic_0001>
module attributes {stable_mosaic.version = 11 : i64} {
  func.func @attentive_block_kernel(%arg0: i32, %arg1: i32, %arg2: memref<1x8x32xf32, #tpu.memory_space<vmem>>, %arg3: memref<1x16x32xf32, #tpu.memory_space<vmem>>, %arg4: memref<1x8x32xf32, #tpu.memory_space<vmem>>, %arg5: memref<1x16x32xf32, #tpu.memory_space<vmem>>, %arg6: memref<1x32xf32, #tpu.memory_space<vmem>>, %arg7: memref<1x32xf32, #tpu.memory_space<vmem>>, %arg8: memref<1x32xf32, #tpu.memory_space<vmem>>, %arg9: memref<1x32xf32, #tpu.memory_space<vmem>>, %arg10: memref<1x32xf32, #tpu.memory_space<vmem>>, %arg11: memref<1x32xf32, #tpu.memory_space<vmem>>, %arg12: memref<32x32xf32, #tpu.memory_space<vmem>>, %arg13: memref<32x32xf32, #tpu.memory_space<vmem>>, %arg14: memref<32x32xf32, #tpu.memory_space<vmem>>, %arg15: memref<32x128xf32, #tpu.memory_space<vmem>>, %arg16: memref<1x128xf32, #tpu.memory_space<vmem>>, %arg17: memref<1x8x128xf32, #tpu.memory_space<vmem>>, %arg18: memref<8x32xf32, #tpu.memory_space<vmem>>, %arg19: memref<16x32xf32, #tpu.memory_space<vmem>>, %arg20: memref<16x32xf32, #tpu.memory_space<vmem>>) attributes {dimension_semantics = [#tpu.dimension_semantics<parallel>, #tpu.dimension_semantics<arbitrary>], iteration_bounds = array<i64: 2, 1>, scalar_prefetch = 0 : i64, scratch_operands = 3 : i64, tpu.core_type = #tpu.core_type<tc>, window_params = [{transform_indices = @transform_0, window_bounds = array<i64: 1, 8, 32>}, {transform_indices = @transform_1, window_bounds = array<i64: 1, 16, 32>}, {transform_indices = @transform_2, window_bounds = array<i64: 1, 8, 32>}, {transform_indices = @transform_3, window_bounds = array<i64: 1, 16, 32>}, {pipeline_mode = #tpu.pipeline_mode<synchronous>, transform_indices = @transform_4, window_bounds = array<i64: 1, 32>}, {pipeline_mode = #tpu.pipeline_mode<synchronous>, transform_indices = @transform_5, window_bounds = array<i64: 1, 32>}, {pipeline_mode = #tpu.pipeline_mode<synchronous>, transform_indices = @transform_6, window_bounds = array<i64: 1, 32>}, {pipeline_mode = #tpu.pipeline_mode<synchronous>, transform_indices = @transform_7, window_bounds = array<i64: 1, 32>}, {pipeline_mode = #tpu.pipeline_mode<synchronous>, transform_indices = @transform_8, window_bounds = array<i64: 1, 32>}, {pipeline_mode = #tpu.pipeline_mode<synchronous>, transform_indices = @transform_9, window_bounds = array<i64: 1, 32>}, {pipeline_mode = #tpu.pipeline_mode<synchronous>, transform_indices = @transform_10, window_bounds = array<i64: 32, 32>}, {pipeline_mode = #tpu.pipeline_mode<synchronous>, transform_indices = @transform_11, window_bounds = array<i64: 32, 32>}, {pipeline_mode = #tpu.pipeline_mode<synchronous>, transform_indices = @transform_12, window_bounds = array<i64: 32, 32>}, {pipeline_mode = #tpu.pipeline_mode<synchronous>, transform_indices = @transform_13, window_bounds = array<i64: 32, 128>}, {pipeline_mode = #tpu.pipeline_mode<synchronous>, transform_indices = @transform_14, window_bounds = array<i64: 1, 128>}, {transform_indices = @transform_15, window_bounds = array<i64: 1, 8, 128>}]} {
    %c0_i32 = arith.constant 0 : i32
    %0 = arith.cmpi eq, %arg1, %c0_i32 : i32
    %1 = arith.extui %0 : i1 to i32
    %c0_i32_0 = arith.constant 0 : i32
    %2 = arith.cmpi ne, %1, %c0_i32_0 : i32
    scf.if %2 {
      %c0_73 = arith.constant 0 : index
      %c0_74 = arith.constant 0 : index
      %c0_75 = arith.constant 0 : index
      %113 = vector.load %arg3[%c0_73, %c0_74, %c0_75] : memref<1x16x32xf32, #tpu.memory_space<vmem>>, vector<1x16x32xf32>
      %114 = vector.shape_cast %113 : vector<1x16x32xf32> to vector<16x32xf32>
      %c0_76 = arith.constant 0 : index
      %c0_77 = arith.constant 0 : index
      %c0_78 = arith.constant 0 : index
      %115 = vector.load %arg5[%c0_76, %c0_77, %c0_78] : memref<1x16x32xf32, #tpu.memory_space<vmem>>, vector<1x16x32xf32>
      %116 = vector.shape_cast %115 : vector<1x16x32xf32> to vector<16x32xf32>
      %117 = arith.addf %114, %116 : vector<16x32xf32>
      %c0_79 = arith.constant 0 : index
      %c0_80 = arith.constant 0 : index
      %c0_81 = arith.constant 0 : index
      %118 = vector.load %arg3[%c0_79, %c0_80, %c0_81] : memref<1x16x32xf32, #tpu.memory_space<vmem>>, vector<1x16x32xf32>
      %119 = vector.shape_cast %118 : vector<1x16x32xf32> to vector<16x32xf32>
      %cst_82 = arith.constant dense<0.000000e+00> : vector<16xf32>
      %120 = vector.multi_reduction <add>, %117, %cst_82 [1] : vector<16x32xf32> to vector<16xf32>
      %121 = vector.shape_cast %120 : vector<16xf32> to vector<16x1xf32>
      %cst_83 = arith.constant 3.200000e+01 : f32
      %122 = vector.broadcast %cst_83 : f32 to vector<16x1xf32>
      %123 = arith.divf %121, %122 : vector<16x1xf32>
      %124 = vector.broadcast %123 : vector<16x1xf32> to vector<16x32xf32>
      %125 = arith.subf %117, %124 : vector<16x32xf32>
      %126 = arith.mulf %125, %125 : vector<16x32xf32>
      %cst_84 = arith.constant dense<0.000000e+00> : vector<16xf32>
      %127 = vector.multi_reduction <add>, %126, %cst_84 [1] : vector<16x32xf32> to vector<16xf32>
      %128 = vector.shape_cast %127 : vector<16xf32> to vector<16x1xf32>
      %cst_85 = arith.constant 3.200000e+01 : f32
      %129 = vector.broadcast %cst_85 : f32 to vector<16x1xf32>
      %130 = arith.divf %128, %129 : vector<16x1xf32>
      %131 = vector.broadcast %123 : vector<16x1xf32> to vector<16x32xf32>
      %132 = arith.subf %117, %131 : vector<16x32xf32>
      %cst_86 = arith.constant 9.99999974E-6 : f32
      %133 = vector.broadcast %cst_86 : f32 to vector<16x1xf32>
      %134 = arith.addf %130, %133 : vector<16x1xf32>
      %135 = math.rsqrt %134 : vector<16x1xf32>
      %136 = vector.broadcast %135 : vector<16x1xf32> to vector<16x32xf32>
      %137 = arith.mulf %132, %136 : vector<16x32xf32>
      %c0_87 = arith.constant 0 : index
      %c0_88 = arith.constant 0 : index
      %138 = vector.load %arg8[%c0_87, %c0_88] : memref<1x32xf32, #tpu.memory_space<vmem>>, vector<1x32xf32>
      %139 = vector.broadcast %138 : vector<1x32xf32> to vector<16x32xf32>
      %140 = arith.mulf %137, %139 : vector<16x32xf32>
      %c0_89 = arith.constant 0 : index
      %c0_90 = arith.constant 0 : index
      %141 = vector.load %arg9[%c0_89, %c0_90] : memref<1x32xf32, #tpu.memory_space<vmem>>, vector<1x32xf32>
      %142 = vector.broadcast %141 : vector<1x32xf32> to vector<16x32xf32>
      %143 = arith.addf %140, %142 : vector<16x32xf32>
      %cst_91 = arith.constant dense<0.000000e+00> : vector<16xf32>
      %144 = vector.multi_reduction <add>, %119, %cst_91 [1] : vector<16x32xf32> to vector<16xf32>
      %145 = vector.shape_cast %144 : vector<16xf32> to vector<16x1xf32>
      %cst_92 = arith.constant 3.200000e+01 : f32
      %146 = vector.broadcast %cst_92 : f32 to vector<16x1xf32>
      %147 = arith.divf %145, %146 : vector<16x1xf32>
      %148 = vector.broadcast %147 : vector<16x1xf32> to vector<16x32xf32>
      %149 = arith.subf %119, %148 : vector<16x32xf32>
      %150 = arith.mulf %149, %149 : vector<16x32xf32>
      %cst_93 = arith.constant dense<0.000000e+00> : vector<16xf32>
      %151 = vector.multi_reduction <add>, %150, %cst_93 [1] : vector<16x32xf32> to vector<16xf32>
      %152 = vector.shape_cast %151 : vector<16xf32> to vector<16x1xf32>
      %cst_94 = arith.constant 3.200000e+01 : f32
      %153 = vector.broadcast %cst_94 : f32 to vector<16x1xf32>
      %154 = arith.divf %152, %153 : vector<16x1xf32>
      %155 = vector.broadcast %147 : vector<16x1xf32> to vector<16x32xf32>
      %156 = arith.subf %119, %155 : vector<16x32xf32>
      %cst_95 = arith.constant 9.99999974E-6 : f32
      %157 = vector.broadcast %cst_95 : f32 to vector<16x1xf32>
      %158 = arith.addf %154, %157 : vector<16x1xf32>
      %159 = math.rsqrt %158 : vector<16x1xf32>
      %160 = vector.broadcast %159 : vector<16x1xf32> to vector<16x32xf32>
      %161 = arith.mulf %156, %160 : vector<16x32xf32>
      %c0_96 = arith.constant 0 : index
      %c0_97 = arith.constant 0 : index
      %162 = vector.load %arg10[%c0_96, %c0_97] : memref<1x32xf32, #tpu.memory_space<vmem>>, vector<1x32xf32>
      %163 = vector.broadcast %162 : vector<1x32xf32> to vector<16x32xf32>
      %164 = arith.mulf %161, %163 : vector<16x32xf32>
      %c0_98 = arith.constant 0 : index
      %c0_99 = arith.constant 0 : index
      %165 = vector.load %arg11[%c0_98, %c0_99] : memref<1x32xf32, #tpu.memory_space<vmem>>, vector<1x32xf32>
      %166 = vector.broadcast %165 : vector<1x32xf32> to vector<16x32xf32>
      %167 = arith.addf %164, %166 : vector<16x32xf32>
      %c0_100 = arith.constant 0 : index
      %c0_101 = arith.constant 0 : index
      %168 = vector.load %arg13[%c0_100, %c0_101] : memref<32x32xf32, #tpu.memory_space<vmem>>, vector<32x32xf32>
      %cst_102 = arith.constant dense<0.000000e+00> : vector<16x32xf32>
      %169 = tpu.matmul %143, %168, %cst_102 {dimension_numbers = #tpu.dot_dimension_numbers<[1], [0], [0], [1], [0, 0, 1, 1], [], []>} : vector<16x32xf32>, vector<32x32xf32>, vector<16x32xf32> -> vector<16x32xf32>
      %c0_103 = arith.constant 0 : index
      %c0_104 = arith.constant 0 : index
      %170 = vector.load %arg19[%c0_103, %c0_104] : memref<16x32xf32, #tpu.memory_space<vmem>>, vector<16x32xf32>
      tpu.vector_store %arg19[%c0_103, %c0_104], %169 {strides = array<i32>} : memref<16x32xf32, #tpu.memory_space<vmem>>, vector<16x32xf32>,
      %c0_105 = arith.constant 0 : index
      %c0_106 = arith.constant 0 : index
      %171 = vector.load %arg14[%c0_105, %c0_106] : memref<32x32xf32, #tpu.memory_space<vmem>>, vector<32x32xf32>
      %cst_107 = arith.constant dense<0.000000e+00> : vector<16x32xf32>
      %172 = tpu.matmul %167, %171, %cst_107 {dimension_numbers = #tpu.dot_dimension_numbers<[1], [0], [0], [1], [0, 0, 1, 1], [], []>} : vector<16x32xf32>, vector<32x32xf32>, vector<16x32xf32> -> vector<16x32xf32>
      %c0_108 = arith.constant 0 : index
      %c0_109 = arith.constant 0 : index
      %173 = vector.load %arg20[%c0_108, %c0_109] : memref<16x32xf32, #tpu.memory_space<vmem>>, vector<16x32xf32>
      tpu.vector_store %arg20[%c0_108, %c0_109], %172 {strides = array<i32>} : memref<16x32xf32, #tpu.memory_space<vmem>>, vector<16x32xf32>,
    } else {
    }
    %c0 = arith.constant 0 : index
    %c0_1 = arith.constant 0 : index
    %c0_2 = arith.constant 0 : index
    %3 = vector.load %arg2[%c0, %c0_1, %c0_2] : memref<1x8x32xf32, #tpu.memory_space<vmem>>, vector<1x8x32xf32>
    %4 = vector.shape_cast %3 : vector<1x8x32xf32> to vector<8x32xf32>
    %c0_3 = arith.constant 0 : index
    %c0_4 = arith.constant 0 : index
    %c0_5 = arith.constant 0 : index
    %5 = vector.load %arg4[%c0_3, %c0_4, %c0_5] : memref<1x8x32xf32, #tpu.memory_space<vmem>>, vector<1x8x32xf32>
    %6 = vector.shape_cast %5 : vector<1x8x32xf32> to vector<8x32xf32>
    %7 = arith.addf %4, %6 : vector<8x32xf32>
    %cst = arith.constant dense<0.000000e+00> : vector<8xf32>
    %8 = vector.multi_reduction <add>, %7, %cst [1] : vector<8x32xf32> to vector<8xf32>
    %9 = vector.shape_cast %8 : vector<8xf32> to vector<8x1xf32>
    %cst_6 = arith.constant 3.200000e+01 : f32
    %10 = vector.broadcast %cst_6 : f32 to vector<8x1xf32>
    %11 = arith.divf %9, %10 : vector<8x1xf32>
    %12 = vector.broadcast %11 : vector<8x1xf32> to vector<8x32xf32>
    %13 = arith.subf %7, %12 : vector<8x32xf32>
    %14 = arith.mulf %13, %13 : vector<8x32xf32>
    %cst_7 = arith.constant dense<0.000000e+00> : vector<8xf32>
    %15 = vector.multi_reduction <add>, %14, %cst_7 [1] : vector<8x32xf32> to vector<8xf32>
    %16 = vector.shape_cast %15 : vector<8xf32> to vector<8x1xf32>
    %cst_8 = arith.constant 3.200000e+01 : f32
    %17 = vector.broadcast %cst_8 : f32 to vector<8x1xf32>
    %18 = arith.divf %16, %17 : vector<8x1xf32>
    %19 = vector.broadcast %11 : vector<8x1xf32> to vector<8x32xf32>
    %20 = arith.subf %7, %19 : vector<8x32xf32>
    %cst_9 = arith.constant 9.99999974E-6 : f32
    %21 = vector.broadcast %cst_9 : f32 to vector<8x1xf32>
    %22 = arith.addf %18, %21 : vector<8x1xf32>
    %23 = math.rsqrt %22 : vector<8x1xf32>
    %24 = vector.broadcast %23 : vector<8x1xf32> to vector<8x32xf32>
    %25 = arith.mulf %20, %24 : vector<8x32xf32>
    %c0_10 = arith.constant 0 : index
    %c0_11 = arith.constant 0 : index
    %26 = vector.load %arg6[%c0_10, %c0_11] : memref<1x32xf32, #tpu.memory_space<vmem>>, vector<1x32xf32>
    %27 = vector.broadcast %26 : vector<1x32xf32> to vector<8x32xf32>
    %28 = arith.mulf %25, %27 : vector<8x32xf32>
    %c0_12 = arith.constant 0 : index
    %c0_13 = arith.constant 0 : index
    %29 = vector.load %arg7[%c0_12, %c0_13] : memref<1x32xf32, #tpu.memory_space<vmem>>, vector<1x32xf32>
    %30 = vector.broadcast %29 : vector<1x32xf32> to vector<8x32xf32>
    %31 = arith.addf %28, %30 : vector<8x32xf32>
    %c0_14 = arith.constant 0 : index
    %c0_15 = arith.constant 0 : index
    %32 = vector.load %arg12[%c0_14, %c0_15] : memref<32x32xf32, #tpu.memory_space<vmem>>, vector<32x32xf32>
    %cst_16 = arith.constant dense<0.000000e+00> : vector<8x32xf32>
    %33 = tpu.matmul %31, %32, %cst_16 {dimension_numbers = #tpu.dot_dimension_numbers<[1], [0], [0], [1], [0, 0, 1, 1], [], []>} : vector<8x32xf32>, vector<32x32xf32>, vector<8x32xf32> -> vector<8x32xf32>
    %c0_17 = arith.constant 0 : index
    %c0_18 = arith.constant 0 : index
    %34 = vector.load %arg18[%c0_17, %c0_18] : memref<8x32xf32, #tpu.memory_space<vmem>>, vector<8x32xf32>
    tpu.vector_store %arg18[%c0_17, %c0_18], %33 {strides = array<i32>} : memref<8x32xf32, #tpu.memory_space<vmem>>, vector<8x32xf32>,
    %c0_19 = arith.constant 0 : index
    %c0_20 = arith.constant 0 : index
    %35 = vector.load %arg16[%c0_19, %c0_20] : memref<1x128xf32, #tpu.memory_space<vmem>>, vector<1x128xf32>
    %36 = vector.shape_cast %35 : vector<1x128xf32> to vector<1x128xf32>
    %37 = vector.broadcast %36 : vector<1x128xf32> to vector<8x128xf32>
    %c0_21 = arith.constant 0 : index
    %c0_22 = arith.constant 0 : index
    %38 = vector.load %arg18[%c0_21, %c0_22] : memref<8x32xf32, #tpu.memory_space<vmem>>, vector<8x8xf32>
    %c0_23 = arith.constant 0 : index
    %c0_24 = arith.constant 0 : index
    %39 = vector.load %arg19[%c0_23, %c0_24] : memref<16x32xf32, #tpu.memory_space<vmem>>, vector<16x8xf32>
    %c0_25 = arith.constant 0 : index
    %c0_26 = arith.constant 0 : index
    %40 = vector.load %arg20[%c0_25, %c0_26] : memref<16x32xf32, #tpu.memory_space<vmem>>, vector<16x8xf32>
    %cst_27 = arith.constant dense<0.000000e+00> : vector<8x16xf32>
    %41 = tpu.matmul %38, %39, %cst_27 {dimension_numbers = #tpu.dot_dimension_numbers<[1], [1], [0], [0], [0, 0, 1, 0], [], []>} : vector<8x8xf32>, vector<16x8xf32>, vector<8x16xf32> -> vector<8x16xf32>
    %cst_28 = arith.constant dense<0xFF800000> : vector<8xf32>
    %42 = vector.multi_reduction <maximumf>, %41, %cst_28 [1] : vector<8x16xf32> to vector<8xf32>
    %43 = vector.shape_cast %42 : vector<8xf32> to vector<8x1xf32>
    %44 = vector.broadcast %43 : vector<8x1xf32> to vector<8x16xf32>
    %45 = arith.subf %41, %44 : vector<8x16xf32>
    %46 = math.exp %45 : vector<8x16xf32>
    %cst_29 = arith.constant dense<0.000000e+00> : vector<8xf32>
    %47 = vector.multi_reduction <add>, %46, %cst_29 [1] : vector<8x16xf32> to vector<8xf32>
    %48 = vector.shape_cast %47 : vector<8xf32> to vector<8x1xf32>
    %cst_30 = arith.constant dense<0.000000e+00> : vector<8x8xf32>
    %49 = tpu.matmul %46, %40, %cst_30 {dimension_numbers = #tpu.dot_dimension_numbers<[1], [0], [0], [1], [0, 0, 1, 1], [], []>} : vector<8x16xf32>, vector<16x8xf32>, vector<8x8xf32> -> vector<8x8xf32>
    %50 = tpu.reciprocal %48 {approx = true} : vector<8x1xf32> -> vector<8x1xf32>
    %51 = vector.broadcast %50 : vector<8x1xf32> to vector<8x8xf32>
    %52 = arith.mulf %49, %51 : vector<8x8xf32>
    %c0_31 = arith.constant 0 : index
    %c0_32 = arith.constant 0 : index
    %53 = vector.load %arg15[%c0_31, %c0_32] : memref<32x128xf32, #tpu.memory_space<vmem>>, vector<8x128xf32>
    %cst_33 = arith.constant dense<0.000000e+00> : vector<8x128xf32>
    %54 = tpu.matmul %52, %53, %cst_33 {dimension_numbers = #tpu.dot_dimension_numbers<[1], [0], [0], [1], [0, 0, 1, 1], [], []>} : vector<8x8xf32>, vector<8x128xf32>, vector<8x128xf32> -> vector<8x128xf32>
    %55 = arith.addf %37, %54 : vector<8x128xf32>
    %c0_34 = arith.constant 0 : index
    %c8 = arith.constant 8 : index
    %56 = vector.load %arg18[%c0_34, %c8] : memref<8x32xf32, #tpu.memory_space<vmem>>, vector<8x8xf32>
    %c0_35 = arith.constant 0 : index
    %c8_36 = arith.constant 8 : index
    %57 = vector.load %arg19[%c0_35, %c8_36] : memref<16x32xf32, #tpu.memory_space<vmem>>, vector<16x8xf32>
    %c0_37 = arith.constant 0 : index
    %c8_38 = arith.constant 8 : index
    %58 = vector.load %arg20[%c0_37, %c8_38] : memref<16x32xf32, #tpu.memory_space<vmem>>, vector<16x8xf32>
    %cst_39 = arith.constant dense<0.000000e+00> : vector<8x16xf32>
    %59 = tpu.matmul %56, %57, %cst_39 {dimension_numbers = #tpu.dot_dimension_numbers<[1], [1], [0], [0], [0, 0, 1, 0], [], []>} : vector<8x8xf32>, vector<16x8xf32>, vector<8x16xf32> -> vector<8x16xf32>
    %cst_40 = arith.constant dense<0xFF800000> : vector<8xf32>
    %60 = vector.multi_reduction <maximumf>, %59, %cst_40 [1] : vector<8x16xf32> to vector<8xf32>
    %61 = vector.shape_cast %60 : vector<8xf32> to vector<8x1xf32>
    %62 = vector.broadcast %61 : vector<8x1xf32> to vector<8x16xf32>
    %63 = arith.subf %59, %62 : vector<8x16xf32>
    %64 = math.exp %63 : vector<8x16xf32>
    %cst_41 = arith.constant dense<0.000000e+00> : vector<8xf32>
    %65 = vector.multi_reduction <add>, %64, %cst_41 [1] : vector<8x16xf32> to vector<8xf32>
    %66 = vector.shape_cast %65 : vector<8xf32> to vector<8x1xf32>
    %cst_42 = arith.constant dense<0.000000e+00> : vector<8x8xf32>
    %67 = tpu.matmul %64, %58, %cst_42 {dimension_numbers = #tpu.dot_dimension_numbers<[1], [0], [0], [1], [0, 0, 1, 1], [], []>} : vector<8x16xf32>, vector<16x8xf32>, vector<8x8xf32> -> vector<8x8xf32>
    %68 = tpu.reciprocal %66 {approx = true} : vector<8x1xf32> -> vector<8x1xf32>
    %69 = vector.broadcast %68 : vector<8x1xf32> to vector<8x8xf32>
    %70 = arith.mulf %67, %69 : vector<8x8xf32>
    %c8_43 = arith.constant 8 : index
    %c0_44 = arith.constant 0 : index
    %71 = vector.load %arg15[%c8_43, %c0_44] : memref<32x128xf32, #tpu.memory_space<vmem>>, vector<8x128xf32>
    %cst_45 = arith.constant dense<0.000000e+00> : vector<8x128xf32>
    %72 = tpu.matmul %70, %71, %cst_45 {dimension_numbers = #tpu.dot_dimension_numbers<[1], [0], [0], [1], [0, 0, 1, 1], [], []>} : vector<8x8xf32>, vector<8x128xf32>, vector<8x128xf32> -> vector<8x128xf32>
    %73 = arith.addf %55, %72 : vector<8x128xf32>
    %c0_46 = arith.constant 0 : index
    %c16 = arith.constant 16 : index
    %74 = vector.load %arg18[%c0_46, %c16] : memref<8x32xf32, #tpu.memory_space<vmem>>, vector<8x8xf32>
    %c0_47 = arith.constant 0 : index
    %c16_48 = arith.constant 16 : index
    %75 = vector.load %arg19[%c0_47, %c16_48] : memref<16x32xf32, #tpu.memory_space<vmem>>, vector<16x8xf32>
    %c0_49 = arith.constant 0 : index
    %c16_50 = arith.constant 16 : index
    %76 = vector.load %arg20[%c0_49, %c16_50] : memref<16x32xf32, #tpu.memory_space<vmem>>, vector<16x8xf32>
    %cst_51 = arith.constant dense<0.000000e+00> : vector<8x16xf32>
    %77 = tpu.matmul %74, %75, %cst_51 {dimension_numbers = #tpu.dot_dimension_numbers<[1], [1], [0], [0], [0, 0, 1, 0], [], []>} : vector<8x8xf32>, vector<16x8xf32>, vector<8x16xf32> -> vector<8x16xf32>
    %cst_52 = arith.constant dense<0xFF800000> : vector<8xf32>
    %78 = vector.multi_reduction <maximumf>, %77, %cst_52 [1] : vector<8x16xf32> to vector<8xf32>
    %79 = vector.shape_cast %78 : vector<8xf32> to vector<8x1xf32>
    %80 = vector.broadcast %79 : vector<8x1xf32> to vector<8x16xf32>
    %81 = arith.subf %77, %80 : vector<8x16xf32>
    %82 = math.exp %81 : vector<8x16xf32>
    %cst_53 = arith.constant dense<0.000000e+00> : vector<8xf32>
    %83 = vector.multi_reduction <add>, %82, %cst_53 [1] : vector<8x16xf32> to vector<8xf32>
    %84 = vector.shape_cast %83 : vector<8xf32> to vector<8x1xf32>
    %cst_54 = arith.constant dense<0.000000e+00> : vector<8x8xf32>
    %85 = tpu.matmul %82, %76, %cst_54 {dimension_numbers = #tpu.dot_dimension_numbers<[1], [0], [0], [1], [0, 0, 1, 1], [], []>} : vector<8x16xf32>, vector<16x8xf32>, vector<8x8xf32> -> vector<8x8xf32>
    %86 = tpu.reciprocal %84 {approx = true} : vector<8x1xf32> -> vector<8x1xf32>
    %87 = vector.broadcast %86 : vector<8x1xf32> to vector<8x8xf32>
    %88 = arith.mulf %85, %87 : vector<8x8xf32>
    %c16_55 = arith.constant 16 : index
    %c0_56 = arith.constant 0 : index
    %89 = vector.load %arg15[%c16_55, %c0_56] : memref<32x128xf32, #tpu.memory_space<vmem>>, vector<8x128xf32>
    %cst_57 = arith.constant dense<0.000000e+00> : vector<8x128xf32>
    %90 = tpu.matmul %88, %89, %cst_57 {dimension_numbers = #tpu.dot_dimension_numbers<[1], [0], [0], [1], [0, 0, 1, 1], [], []>} : vector<8x8xf32>, vector<8x128xf32>, vector<8x128xf32> -> vector<8x128xf32>
    %91 = arith.addf %73, %90 : vector<8x128xf32>
    %c0_58 = arith.constant 0 : index
    %c24 = arith.constant 24 : index
    %92 = vector.load %arg18[%c0_58, %c24] : memref<8x32xf32, #tpu.memory_space<vmem>>, vector<8x8xf32>
    %c0_59 = arith.constant 0 : index
    %c24_60 = arith.constant 24 : index
    %93 = vector.load %arg19[%c0_59, %c24_60] : memref<16x32xf32, #tpu.memory_space<vmem>>, vector<16x8xf32>
    %c0_61 = arith.constant 0 : index
    %c24_62 = arith.constant 24 : index
    %94 = vector.load %arg20[%c0_61, %c24_62] : memref<16x32xf32, #tpu.memory_space<vmem>>, vector<16x8xf32>
    %cst_63 = arith.constant dense<0.000000e+00> : vector<8x16xf32>
    %95 = tpu.matmul %92, %93, %cst_63 {dimension_numbers = #tpu.dot_dimension_numbers<[1], [1], [0], [0], [0, 0, 1, 0], [], []>} : vector<8x8xf32>, vector<16x8xf32>, vector<8x16xf32> -> vector<8x16xf32>
    %cst_64 = arith.constant dense<0xFF800000> : vector<8xf32>
    %96 = vector.multi_reduction <maximumf>, %95, %cst_64 [1] : vector<8x16xf32> to vector<8xf32>
    %97 = vector.shape_cast %96 : vector<8xf32> to vector<8x1xf32>
    %98 = vector.broadcast %97 : vector<8x1xf32> to vector<8x16xf32>
    %99 = arith.subf %95, %98 : vector<8x16xf32>
    %100 = math.exp %99 : vector<8x16xf32>
    %cst_65 = arith.constant dense<0.000000e+00> : vector<8xf32>
    %101 = vector.multi_reduction <add>, %100, %cst_65 [1] : vector<8x16xf32> to vector<8xf32>
    %102 = vector.shape_cast %101 : vector<8xf32> to vector<8x1xf32>
    %cst_66 = arith.constant dense<0.000000e+00> : vector<8x8xf32>
    %103 = tpu.matmul %100, %94, %cst_66 {dimension_numbers = #tpu.dot_dimension_numbers<[1], [0], [0], [1], [0, 0, 1, 1], [], []>} : vector<8x16xf32>, vector<16x8xf32>, vector<8x8xf32> -> vector<8x8xf32>
    %104 = tpu.reciprocal %102 {approx = true} : vector<8x1xf32> -> vector<8x1xf32>
    %105 = vector.broadcast %104 : vector<8x1xf32> to vector<8x8xf32>
    %106 = arith.mulf %103, %105 : vector<8x8xf32>
    %c24_67 = arith.constant 24 : index
    %c0_68 = arith.constant 0 : index
    %107 = vector.load %arg15[%c24_67, %c0_68] : memref<32x128xf32, #tpu.memory_space<vmem>>, vector<8x128xf32>
    %cst_69 = arith.constant dense<0.000000e+00> : vector<8x128xf32>
    %108 = tpu.matmul %106, %107, %cst_69 {dimension_numbers = #tpu.dot_dimension_numbers<[1], [0], [0], [1], [0, 0, 1, 1], [], []>} : vector<8x8xf32>, vector<8x128xf32>, vector<8x128xf32> -> vector<8x128xf32>
    %109 = arith.addf %91, %108 : vector<8x128xf32>
    %c0_70 = arith.constant 0 : index
    %c0_71 = arith.constant 0 : index
    %c0_72 = arith.constant 0 : index
    %110 = vector.load %arg17[%c0_70, %c0_71, %c0_72] : memref<1x8x128xf32, #tpu.memory_space<vmem>>, vector<1x8x128xf32>
    %111 = vector.shape_cast %110 : vector<1x8x128xf32> to vector<8x128xf32>
    %112 = vector.shape_cast %109 : vector<8x128xf32> to vector<1x8x128xf32>
    tpu.vector_store %arg17[%c0_70, %c0_71, %c0_72], %112 {strides = array<i32>} : memref<1x8x128xf32, #tpu.memory_space<vmem>>, vector<1x8x128xf32>,
    return
  }
  func.func @transform_0(%arg0: i32, %arg1: i32) -> (i32, i32, i32) {
    %c0_i32 = arith.constant 0 : i32
    %c0_i32_0 = arith.constant 0 : i32
    return %arg0, %arg1, %c0_i32 : i32, i32, i32
  }
  func.func @transform_1(%arg0: i32, %arg1: i32) -> (i32, i32, i32) {
    %c0_i32 = arith.constant 0 : i32
    %c0_i32_0 = arith.constant 0 : i32
    %c0_i32_1 = arith.constant 0 : i32
    return %arg0, %c0_i32, %c0_i32_0 : i32, i32, i32
  }
  func.func @transform_2(%arg0: i32, %arg1: i32) -> (i32, i32, i32) {
    %c0_i32 = arith.constant 0 : i32
    %c0_i32_0 = arith.constant 0 : i32
    return %arg0, %arg1, %c0_i32 : i32, i32, i32
  }
  func.func @transform_3(%arg0: i32, %arg1: i32) -> (i32, i32, i32) {
    %c0_i32 = arith.constant 0 : i32
    %c0_i32_0 = arith.constant 0 : i32
    %c0_i32_1 = arith.constant 0 : i32
    return %arg0, %c0_i32, %c0_i32_0 : i32, i32, i32
  }
  func.func @transform_4(%arg0: i32, %arg1: i32) -> (i32, i32) {
    %c0_i32 = arith.constant 0 : i32
    %c0_i32_0 = arith.constant 0 : i32
    %c0_i32_1 = arith.constant 0 : i32
    return %c0_i32, %c0_i32_0 : i32, i32
  }
  func.func @transform_5(%arg0: i32, %arg1: i32) -> (i32, i32) {
    %c0_i32 = arith.constant 0 : i32
    %c0_i32_0 = arith.constant 0 : i32
    %c0_i32_1 = arith.constant 0 : i32
    return %c0_i32, %c0_i32_0 : i32, i32
  }
  func.func @transform_6(%arg0: i32, %arg1: i32) -> (i32, i32) {
    %c0_i32 = arith.constant 0 : i32
    %c0_i32_0 = arith.constant 0 : i32
    %c0_i32_1 = arith.constant 0 : i32
    return %c0_i32, %c0_i32_0 : i32, i32
  }
  func.func @transform_7(%arg0: i32, %arg1: i32) -> (i32, i32) {
    %c0_i32 = arith.constant 0 : i32
    %c0_i32_0 = arith.constant 0 : i32
    %c0_i32_1 = arith.constant 0 : i32
    return %c0_i32, %c0_i32_0 : i32, i32
  }
  func.func @transform_8(%arg0: i32, %arg1: i32) -> (i32, i32) {
    %c0_i32 = arith.constant 0 : i32
    %c0_i32_0 = arith.constant 0 : i32
    %c0_i32_1 = arith.constant 0 : i32
    return %c0_i32, %c0_i32_0 : i32, i32
  }
  func.func @transform_9(%arg0: i32, %arg1: i32) -> (i32, i32) {
    %c0_i32 = arith.constant 0 : i32
    %c0_i32_0 = arith.constant 0 : i32
    %c0_i32_1 = arith.constant 0 : i32
    return %c0_i32, %c0_i32_0 : i32, i32
  }
  func.func @transform_10(%arg0: i32, %arg1: i32) -> (i32, i32) {
    %c0_i32 = arith.constant 0 : i32
    %c0_i32_0 = arith.constant 0 : i32
    %c0_i32_1 = arith.constant 0 : i32
    return %c0_i32, %c0_i32_0 : i32, i32
  }
  func.func @transform_11(%arg0: i32, %arg1: i32) -> (i32, i32) {
    %c0_i32 = arith.constant 0 : i32
    %c0_i32_0 = arith.constant 0 : i32
    %c0_i32_1 = arith.constant 0 : i32
    return %c0_i32, %c0_i32_0 : i32, i32
  }
  func.func @transform_12(%arg0: i32, %arg1: i32) -> (i32, i32) {
    %c0_i32 = arith.constant 0 : i32
    %c0_i32_0 = arith.constant 0 : i32
    %c0_i32_1 = arith.constant 0 : i32
    return %c0_i32, %c0_i32_0 : i32, i32
  }
  func.func @transform_13(%arg0: i32, %arg1: i32) -> (i32, i32) {
    %c0_i32 = arith.constant 0 : i32
    %c0_i32_0 = arith.constant 0 : i32
    %c0_i32_1 = arith.constant 0 : i32
    return %c0_i32, %c0_i32_0 : i32, i32
  }
  func.func @transform_14(%arg0: i32, %arg1: i32) -> (i32, i32) {
    %c0_i32 = arith.constant 0 : i32
    %c0_i32_0 = arith.constant 0 : i32
    %c0_i32_1 = arith.constant 0 : i32
    return %c0_i32, %c0_i32_0 : i32, i32
  }
  func.func @transform_15(%arg0: i32, %arg1: i32) -> (i32, i32, i32) {
    %c0_i32 = arith.constant 0 : i32
    %c0_i32_0 = arith.constant 0 : i32
    return %arg0, %arg1, %c0_i32 : i32, i32, i32
  }
}

module attributes {stable_mosaic.version = 11 : i64} {
  func.func @attentive_block_kernel(%arg0: i32, %arg1: i32, %arg2: memref<1x8x32xf32, #tpu.memory_space<vmem>>, %arg3: memref<1x16x32xf32, #tpu.memory_space<vmem>>, %arg4: memref<1x8x32xf32, #tpu.memory_space<vmem>>, %arg5: memref<1x16x32xf32, #tpu.memory_space<vmem>>, %arg6: memref<1x32xf32, #tpu.memory_space<vmem>>, %arg7: memref<1x32xf32, #tpu.memory_space<vmem>>, %arg8: memref<1x32xf32, #tpu.memory_space<vmem>>, %arg9: memref<1x32xf32, #tpu.memory_space<vmem>>, %arg10: memref<1x32xf32, #tpu.memory_space<vmem>>, %arg11: memref<1x32xf32, #tpu.memory_space<vmem>>, %arg12: memref<32x32xf32, #tpu.memory_space<vmem>>, %arg13: memref<32x32xf32, #tpu.memory_space<vmem>>, %arg14: memref<32x32xf32, #tpu.memory_space<vmem>>, %arg15: memref<32x128xf32, #tpu.memory_space<vmem>>, %arg16: memref<1x128xf32, #tpu.memory_space<vmem>>, %arg17: memref<1x8x128xf32, #tpu.memory_space<vmem>>, %arg18: memref<8x32xf32, #tpu.memory_space<vmem>>, %arg19: memref<16x32xf32, #tpu.memory_space<vmem>>, %arg20: memref<16x32xf32, #tpu.memory_space<vmem>>) attributes {dimension_semantics = [#tpu.dimension_semantics<parallel>, #tpu.dimension_semantics<arbitrary>], iteration_bounds = array<i64: 2, 1>, scalar_prefetch = 0 : i64, scratch_operands = 3 : i64, tpu.core_type = #tpu.core_type<tc>, window_params = [{transform_indices = @transform_0, window_bounds = array<i64: 1, 8, 32>}, {transform_indices = @transform_1, window_bounds = array<i64: 1, 16, 32>}, {transform_indices = @transform_2, window_bounds = array<i64: 1, 8, 32>}, {transform_indices = @transform_3, window_bounds = array<i64: 1, 16, 32>}, {pipeline_mode = #tpu.pipeline_mode<synchronous>, transform_indices = @transform_4, window_bounds = array<i64: 1, 32>}, {pipeline_mode = #tpu.pipeline_mode<synchronous>, transform_indices = @transform_5, window_bounds = array<i64: 1, 32>}, {pipeline_mode = #tpu.pipeline_mode<synchronous>, transform_indices = @transform_6, window_bounds = array<i64: 1, 32>}, {pipeline_mode = #tpu.pipeline_mode<synchronous>, transform_indices = @transform_7, window_bounds = array<i64: 1, 32>}, {pipeline_mode = #tpu.pipeline_mode<synchronous>, transform_indices = @transform_8, window_bounds = array<i64: 1, 32>}, {pipeline_mode = #tpu.pipeline_mode<synchronous>, transform_indices = @transform_9, window_bounds = array<i64: 1, 32>}, {pipeline_mode = #tpu.pipeline_mode<synchronous>, transform_indices = @transform_10, window_bounds = array<i64: 32, 32>}, {pipeline_mode = #tpu.pipeline_mode<synchronous>, transform_indices = @transform_11, window_bounds = array<i64: 32, 32>}, {pipeline_mode = #tpu.pipeline_mode<synchronous>, transform_indices = @transform_12, window_bounds = array<i64: 32, 32>}, {pipeline_mode = #tpu.pipeline_mode<synchronous>, transform_indices = @transform_13, window_bounds = array<i64: 32, 128>}, {pipeline_mode = #tpu.pipeline_mode<synchronous>, transform_indices = @transform_14, window_bounds = array<i64: 1, 128>}, {transform_indices = @transform_15, window_bounds = array<i64: 1, 8, 128>}]} {
    %c0_i32 = arith.constant 0 : i32
    %0 = arith.cmpi eq, %arg1, %c0_i32 : i32
    %1 = arith.extui %0 : i1 to i32
    %c0_i32_0 = arith.constant 0 : i32
    %2 = arith.cmpi ne, %1, %c0_i32_0 : i32
    scf.if %2 {
      %c0_73 = arith.constant 0 : index
      %c0_74 = arith.constant 0 : index
      %c0_75 = arith.constant 0 : index
      %113 = vector.load %arg3[%c0_73, %c0_74, %c0_75] : memref<1x16x32xf32, #tpu.memory_space<vmem>>, vector<1x16x32xf32>
      %114 = vector.shape_cast %113 : vector<1x16x32xf32> to vector<16x32xf32>
      %c0_76 = arith.constant 0 : index
      %c0_77 = arith.constant 0 : index
      %c0_78 = arith.constant 0 : index
      %115 = vector.load %arg5[%c0_76, %c0_77, %c0_78] : memref<1x16x32xf32, #tpu.memory_space<vmem>>, vector<1x16x32xf32>
      %116 = vector.shape_cast %115 : vector<1x16x32xf32> to vector<16x32xf32>
      %117 = arith.addf %114, %116 : vector<16x32xf32>
      %c0_79 = arith.constant 0 : index
      %c0_80 = arith.constant 0 : index
      %c0_81 = arith.constant 0 : index
      %118 = vector.load %arg3[%c0_79, %c0_80, %c0_81] : memref<1x16x32xf32, #tpu.memory_space<vmem>>, vector<1x16x32xf32>
      %119 = vector.shape_cast %118 : vector<1x16x32xf32> to vector<16x32xf32>
      %cst_82 = arith.constant dense<0.000000e+00> : vector<16xf32>
      %120 = vector.multi_reduction <add>, %117, %cst_82 [1] : vector<16x32xf32> to vector<16xf32>
      %121 = vector.shape_cast %120 : vector<16xf32> to vector<16x1xf32>
      %cst_83 = arith.constant 3.200000e+01 : f32
      %122 = vector.broadcast %cst_83 : f32 to vector<16x1xf32>
      %123 = arith.divf %121, %122 : vector<16x1xf32>
      %124 = vector.broadcast %123 : vector<16x1xf32> to vector<16x32xf32>
      %125 = arith.subf %117, %124 : vector<16x32xf32>
      %126 = arith.mulf %125, %125 : vector<16x32xf32>
      %cst_84 = arith.constant dense<0.000000e+00> : vector<16xf32>
      %127 = vector.multi_reduction <add>, %126, %cst_84 [1] : vector<16x32xf32> to vector<16xf32>
      %128 = vector.shape_cast %127 : vector<16xf32> to vector<16x1xf32>
      %cst_85 = arith.constant 3.200000e+01 : f32
      %129 = vector.broadcast %cst_85 : f32 to vector<16x1xf32>
      %130 = arith.divf %128, %129 : vector<16x1xf32>
      %131 = vector.broadcast %123 : vector<16x1xf32> to vector<16x32xf32>
      %132 = arith.subf %117, %131 : vector<16x32xf32>
      %cst_86 = arith.constant 9.99999974E-6 : f32
      %133 = vector.broadcast %cst_86 : f32 to vector<16x1xf32>
      %134 = arith.addf %130, %133 : vector<16x1xf32>
      %135 = math.rsqrt %134 : vector<16x1xf32>
      %136 = vector.broadcast %135 : vector<16x1xf32> to vector<16x32xf32>
      %137 = arith.mulf %132, %136 : vector<16x32xf32>
      %c0_87 = arith.constant 0 : index
      %c0_88 = arith.constant 0 : index
      %138 = vector.load %arg8[%c0_87, %c0_88] : memref<1x32xf32, #tpu.memory_space<vmem>>, vector<1x32xf32>
      %139 = vector.broadcast %138 : vector<1x32xf32> to vector<16x32xf32>
      %140 = arith.mulf %137, %139 : vector<16x32xf32>
      %c0_89 = arith.constant 0 : index
      %c0_90 = arith.constant 0 : index
      %141 = vector.load %arg9[%c0_89, %c0_90] : memref<1x32xf32, #tpu.memory_space<vmem>>, vector<1x32xf32>
      %142 = vector.broadcast %141 : vector<1x32xf32> to vector<16x32xf32>
      %143 = arith.addf %140, %142 : vector<16x32xf32>
      %cst_91 = arith.constant dense<0.000000e+00> : vector<16xf32>
      %144 = vector.multi_reduction <add>, %119, %cst_91 [1] : vector<16x32xf32> to vector<16xf32>
      %145 = vector.shape_cast %144 : vector<16xf32> to vector<16x1xf32>
      %cst_92 = arith.constant 3.200000e+01 : f32
      %146 = vector.broadcast %cst_92 : f32 to vector<16x1xf32>
      %147 = arith.divf %145, %146 : vector<16x1xf32>
      %148 = vector.broadcast %147 : vector<16x1xf32> to vector<16x32xf32>
      %149 = arith.subf %119, %148 : vector<16x32xf32>
      %150 = arith.mulf %149, %149 : vector<16x32xf32>
      %cst_93 = arith.constant dense<0.000000e+00> : vector<16xf32>
      %151 = vector.multi_reduction <add>, %150, %cst_93 [1] : vector<16x32xf32> to vector<16xf32>
      %152 = vector.shape_cast %151 : vector<16xf32> to vector<16x1xf32>
      %cst_94 = arith.constant 3.200000e+01 : f32
      %153 = vector.broadcast %cst_94 : f32 to vector<16x1xf32>
      %154 = arith.divf %152, %153 : vector<16x1xf32>
      %155 = vector.broadcast %147 : vector<16x1xf32> to vector<16x32xf32>
      %156 = arith.subf %119, %155 : vector<16x32xf32>
      %cst_95 = arith.constant 9.99999974E-6 : f32
      %157 = vector.broadcast %cst_95 : f32 to vector<16x1xf32>
      %158 = arith.addf %154, %157 : vector<16x1xf32>
      %159 = math.rsqrt %158 : vector<16x1xf32>
      %160 = vector.broadcast %159 : vector<16x1xf32> to vector<16x32xf32>
      %161 = arith.mulf %156, %160 : vector<16x32xf32>
      %c0_96 = arith.constant 0 : index
      %c0_97 = arith.constant 0 : index
      %162 = vector.load %arg10[%c0_96, %c0_97] : memref<1x32xf32, #tpu.memory_space<vmem>>, vector<1x32xf32>
      %163 = vector.broadcast %162 : vector<1x32xf32> to vector<16x32xf32>
      %164 = arith.mulf %161, %163 : vector<16x32xf32>
      %c0_98 = arith.constant 0 : index
      %c0_99 = arith.constant 0 : index
      %165 = vector.load %arg11[%c0_98, %c0_99] : memref<1x32xf32, #tpu.memory_space<vmem>>, vector<1x32xf32>
      %166 = vector.broadcast %165 : vector<1x32xf32> to vector<16x32xf32>
      %167 = arith.addf %164, %166 : vector<16x32xf32>
      %c0_100 = arith.constant 0 : index
      %c0_101 = arith.constant 0 : index
      %168 = vector.load %arg13[%c0_100, %c0_101] : memref<32x32xf32, #tpu.memory_space<vmem>>, vector<32x32xf32>
      %cst_102 = arith.constant dense<0.000000e+00> : vector<16x32xf32>
      %169 = tpu.matmul %143, %168, %cst_102 {dimension_numbers = #tpu.dot_dimension_numbers<[1], [0], [0], [1], [0, 0, 1, 1], [], []>} : vector<16x32xf32>, vector<32x32xf32>, vector<16x32xf32> -> vector<16x32xf32>
      %c0_103 = arith.constant 0 : index
      %c0_104 = arith.constant 0 : index
      %170 = vector.load %arg19[%c0_103, %c0_104] : memref<16x32xf32, #tpu.memory_space<vmem>>, vector<16x32xf32>
      tpu.vector_store %arg19[%c0_103, %c0_104], %169 {strides = array<i32>} : memref<16x32xf32, #tpu.memory_space<vmem>>, vector<16x32xf32>,
      %c0_105 = arith.constant 0 : index
      %c0_106 = arith.constant 0 : index
      %171 = vector.load %arg14[%c0_105, %c0_106] : memref<32x32xf32, #tpu.memory_space<vmem>>, vector<32x32xf32>
      %cst_107 = arith.constant dense<0.000000e+00> : vector<16x32xf32>
      %172 = tpu.matmul %167, %171, %cst_107 {dimension_numbers = #tpu.dot_dimension_numbers<[1], [0], [0], [1], [0, 0, 1, 1], [], []>} : vector<16x32xf32>, vector<32x32xf32>, vector<16x32xf32> -> vector<16x32xf32>
      %c0_108 = arith.constant 0 : index
      %c0_109 = arith.constant 0 : index
      %173 = vector.load %arg20[%c0_108, %c0_109] : memref<16x32xf32, #tpu.memory_space<vmem>>, vector<16x32xf32>
      tpu.vector_store %arg20[%c0_108, %c0_109], %172 {strides = array<i32>} : memref<16x32xf32, #tpu.memory_space<vmem>>, vector<16x32xf32>,
    } else {
    }
    %c0 = arith.constant 0 : index
    %c0_1 = arith.constant 0 : index
    %c0_2 = arith.constant 0 : index
    %3 = vector.load %arg2[%c0, %c0_1, %c0_2] : memref<1x8x32xf32, #tpu.memory_space<vmem>>, vector<1x8x32xf32>
    %4 = vector.shape_cast %3 : vector<1x8x32xf32> to vector<8x32xf32>
    %c0_3 = arith.constant 0 : index
    %c0_4 = arith.constant 0 : index
    %c0_5 = arith.constant 0 : index
    %5 = vector.load %arg4[%c0_3, %c0_4, %c0_5] : memref<1x8x32xf32, #tpu.memory_space<vmem>>, vector<1x8x32xf32>
    %6 = vector.shape_cast %5 : vector<1x8x32xf32> to vector<8x32xf32>
    %7 = arith.addf %4, %6 : vector<8x32xf32>
    %cst = arith.constant dense<0.000000e+00> : vector<8xf32>
    %8 = vector.multi_reduction <add>, %7, %cst [1] : vector<8x32xf32> to vector<8xf32>
    %9 = vector.shape_cast %8 : vector<8xf32> to vector<8x1xf32>
    %cst_6 = arith.constant 3.200000e+01 : f32
    %10 = vector.broadcast %cst_6 : f32 to vector<8x1xf32>
    %11 = arith.divf %9, %10 : vector<8x1xf32>
    %12 = vector.broadcast %11 : vector<8x1xf32> to vector<8x32xf32>
    %13 = arith.subf %7, %12 : vector<8x32xf32>
    %14 = arith.mulf %13, %13 : vector<8x32xf32>
    %cst_7 = arith.constant dense<0.000000e+00> : vector<8xf32>
    %15 = vector.multi_reduction <add>, %14, %cst_7 [1] : vector<8x32xf32> to vector<8xf32>
    %16 = vector.shape_cast %15 : vector<8xf32> to vector<8x1xf32>
    %cst_8 = arith.constant 3.200000e+01 : f32
    %17 = vector.broadcast %cst_8 : f32 to vector<8x1xf32>
    %18 = arith.divf %16, %17 : vector<8x1xf32>
    %19 = vector.broadcast %11 : vector<8x1xf32> to vector<8x32xf32>
    %20 = arith.subf %7, %19 : vector<8x32xf32>
    %cst_9 = arith.constant 9.99999974E-6 : f32
    %21 = vector.broadcast %cst_9 : f32 to vector<8x1xf32>
    %22 = arith.addf %18, %21 : vector<8x1xf32>
    %23 = math.rsqrt %22 : vector<8x1xf32>
    %24 = vector.broadcast %23 : vector<8x1xf32> to vector<8x32xf32>
    %25 = arith.mulf %20, %24 : vector<8x32xf32>
    %c0_10 = arith.constant 0 : index
    %c0_11 = arith.constant 0 : index
    %26 = vector.load %arg6[%c0_10, %c0_11] : memref<1x32xf32, #tpu.memory_space<vmem>>, vector<1x32xf32>
    %27 = vector.broadcast %26 : vector<1x32xf32> to vector<8x32xf32>
    %28 = arith.mulf %25, %27 : vector<8x32xf32>
    %c0_12 = arith.constant 0 : index
    %c0_13 = arith.constant 0 : index
    %29 = vector.load %arg7[%c0_12, %c0_13] : memref<1x32xf32, #tpu.memory_space<vmem>>, vector<1x32xf32>
    %30 = vector.broadcast %29 : vector<1x32xf32> to vector<8x32xf32>
    %31 = arith.addf %28, %30 : vector<8x32xf32>
    %c0_14 = arith.constant 0 : index
    %c0_15 = arith.constant 0 : index
    %32 = vector.load %arg12[%c0_14, %c0_15] : memref<32x32xf32, #tpu.memory_space<vmem>>, vector<32x32xf32>
    %cst_16 = arith.constant dense<0.000000e+00> : vector<8x32xf32>
    %33 = tpu.matmul %31, %32, %cst_16 {dimension_numbers = #tpu.dot_dimension_numbers<[1], [0], [0], [1], [0, 0, 1, 1], [], []>} : vector<8x32xf32>, vector<32x32xf32>, vector<8x32xf32> -> vector<8x32xf32>
    %c0_17 = arith.constant 0 : index
    %c0_18 = arith.constant 0 : index
    %34 = vector.load %arg18[%c0_17, %c0_18] : memref<8x32xf32, #tpu.memory_space<vmem>>, vector<8x32xf32>
    tpu.vector_store %arg18[%c0_17, %c0_18], %33 {strides = array<i32>} : memref<8x32xf32, #tpu.memory_space<vmem>>, vector<8x32xf32>,
    %c0_19 = arith.constant 0 : index
    %c0_20 = arith.constant 0 : index
    %35 = vector.load %arg16[%c0_19, %c0_20] : memref<1x128xf32, #tpu.memory_space<vmem>>, vector<1x128xf32>
    %36 = vector.shape_cast %35 : vector<1x128xf32> to vector<1x128xf32>
    %37 = vector.broadcast %36 : vector<1x128xf32> to vector<8x128xf32>
    %c0_21 = arith.constant 0 : index
    %c0_22 = arith.constant 0 : index
    %38 = vector.load %arg18[%c0_21, %c0_22] : memref<8x32xf32, #tpu.memory_space<vmem>>, vector<8x8xf32>
    %c0_23 = arith.constant 0 : index
    %c0_24 = arith.constant 0 : index
    %39 = vector.load %arg19[%c0_23, %c0_24] : memref<16x32xf32, #tpu.memory_space<vmem>>, vector<16x8xf32>
    %c0_25 = arith.constant 0 : index
    %c0_26 = arith.constant 0 : index
    %40 = vector.load %arg20[%c0_25, %c0_26] : memref<16x32xf32, #tpu.memory_space<vmem>>, vector<16x8xf32>
    %cst_27 = arith.constant dense<0.000000e+00> : vector<8x16xf32>
    %41 = tpu.matmul %38, %39, %cst_27 {dimension_numbers = #tpu.dot_dimension_numbers<[1], [1], [0], [0], [0, 0, 1, 0], [], []>} : vector<8x8xf32>, vector<16x8xf32>, vector<8x16xf32> -> vector<8x16xf32>
    %cst_28 = arith.constant dense<0xFF800000> : vector<8xf32>
    %42 = vector.multi_reduction <maximumf>, %41, %cst_28 [1] : vector<8x16xf32> to vector<8xf32>
    %43 = vector.shape_cast %42 : vector<8xf32> to vector<8x1xf32>
    %44 = vector.broadcast %43 : vector<8x1xf32> to vector<8x16xf32>
    %45 = arith.subf %41, %44 : vector<8x16xf32>
    %46 = math.exp %45 : vector<8x16xf32>
    %cst_29 = arith.constant dense<0.000000e+00> : vector<8xf32>
    %47 = vector.multi_reduction <add>, %46, %cst_29 [1] : vector<8x16xf32> to vector<8xf32>
    %48 = vector.shape_cast %47 : vector<8xf32> to vector<8x1xf32>
    %cst_30 = arith.constant dense<0.000000e+00> : vector<8x8xf32>
    %49 = tpu.matmul %46, %40, %cst_30 {dimension_numbers = #tpu.dot_dimension_numbers<[1], [0], [0], [1], [0, 0, 1, 1], [], []>} : vector<8x16xf32>, vector<16x8xf32>, vector<8x8xf32> -> vector<8x8xf32>
    %50 = tpu.reciprocal %48 {approx = true} : vector<8x1xf32> -> vector<8x1xf32>
    %51 = vector.broadcast %50 : vector<8x1xf32> to vector<8x8xf32>
    %52 = arith.mulf %49, %51 : vector<8x8xf32>
    %c0_31 = arith.constant 0 : index
    %c0_32 = arith.constant 0 : index
    %53 = vector.load %arg15[%c0_31, %c0_32] : memref<32x128xf32, #tpu.memory_space<vmem>>, vector<8x128xf32>
    %cst_33 = arith.constant dense<0.000000e+00> : vector<8x128xf32>
    %54 = tpu.matmul %52, %53, %cst_33 {dimension_numbers = #tpu.dot_dimension_numbers<[1], [0], [0], [1], [0, 0, 1, 1], [], []>} : vector<8x8xf32>, vector<8x128xf32>, vector<8x128xf32> -> vector<8x128xf32>
    %55 = arith.addf %37, %54 : vector<8x128xf32>
    %c0_34 = arith.constant 0 : index
    %c8 = arith.constant 8 : index
    %56 = vector.load %arg18[%c0_34, %c8] : memref<8x32xf32, #tpu.memory_space<vmem>>, vector<8x8xf32>
    %c0_35 = arith.constant 0 : index
    %c8_36 = arith.constant 8 : index
    %57 = vector.load %arg19[%c0_35, %c8_36] : memref<16x32xf32, #tpu.memory_space<vmem>>, vector<16x8xf32>
    %c0_37 = arith.constant 0 : index
    %c8_38 = arith.constant 8 : index
    %58 = vector.load %arg20[%c0_37, %c8_38] : memref<16x32xf32, #tpu.memory_space<vmem>>, vector<16x8xf32>
    %cst_39 = arith.constant dense<0.000000e+00> : vector<8x16xf32>
    %59 = tpu.matmul %56, %57, %cst_39 {dimension_numbers = #tpu.dot_dimension_numbers<[1], [1], [0], [0], [0, 0, 1, 0], [], []>} : vector<8x8xf32>, vector<16x8xf32>, vector<8x16xf32> -> vector<8x16xf32>
    %cst_40 = arith.constant dense<0xFF800000> : vector<8xf32>
    %60 = vector.multi_reduction <maximumf>, %59, %cst_40 [1] : vector<8x16xf32> to vector<8xf32>
    %61 = vector.shape_cast %60 : vector<8xf32> to vector<8x1xf32>
    %62 = vector.broadcast %61 : vector<8x1xf32> to vector<8x16xf32>
    %63 = arith.subf %59, %62 : vector<8x16xf32>
    %64 = math.exp %63 : vector<8x16xf32>
    %cst_41 = arith.constant dense<0.000000e+00> : vector<8xf32>
    %65 = vector.multi_reduction <add>, %64, %cst_41 [1] : vector<8x16xf32> to vector<8xf32>
    %66 = vector.shape_cast %65 : vector<8xf32> to vector<8x1xf32>
    %cst_42 = arith.constant dense<0.000000e+00> : vector<8x8xf32>
    %67 = tpu.matmul %64, %58, %cst_42 {dimension_numbers = #tpu.dot_dimension_numbers<[1], [0], [0], [1], [0, 0, 1, 1], [], []>} : vector<8x16xf32>, vector<16x8xf32>, vector<8x8xf32> -> vector<8x8xf32>
    %68 = tpu.reciprocal %66 {approx = true} : vector<8x1xf32> -> vector<8x1xf32>
    %69 = vector.broadcast %68 : vector<8x1xf32> to vector<8x8xf32>
    %70 = arith.mulf %67, %69 : vector<8x8xf32>
    %c8_43 = arith.constant 8 : index
    %c0_44 = arith.constant 0 : index
    %71 = vector.load %arg15[%c8_43, %c0_44] : memref<32x128xf32, #tpu.memory_space<vmem>>, vector<8x128xf32>
    %cst_45 = arith.constant dense<0.000000e+00> : vector<8x128xf32>
    %72 = tpu.matmul %70, %71, %cst_45 {dimension_numbers = #tpu.dot_dimension_numbers<[1], [0], [0], [1], [0, 0, 1, 1], [], []>} : vector<8x8xf32>, vector<8x128xf32>, vector<8x128xf32> -> vector<8x128xf32>
    %73 = arith.addf %55, %72 : vector<8x128xf32>
    %c0_46 = arith.constant 0 : index
    %c16 = arith.constant 16 : index
    %74 = vector.load %arg18[%c0_46, %c16] : memref<8x32xf32, #tpu.memory_space<vmem>>, vector<8x8xf32>
    %c0_47 = arith.constant 0 : index
    %c16_48 = arith.constant 16 : index
    %75 = vector.load %arg19[%c0_47, %c16_48] : memref<16x32xf32, #tpu.memory_space<vmem>>, vector<16x8xf32>
    %c0_49 = arith.constant 0 : index
    %c16_50 = arith.constant 16 : index
    %76 = vector.load %arg20[%c0_49, %c16_50] : memref<16x32xf32, #tpu.memory_space<vmem>>, vector<16x8xf32>
    %cst_51 = arith.constant dense<0.000000e+00> : vector<8x16xf32>
    %77 = tpu.matmul %74, %75, %cst_51 {dimension_numbers = #tpu.dot_dimension_numbers<[1], [1], [0], [0], [0, 0, 1, 0], [], []>} : vector<8x8xf32>, vector<16x8xf32>, vector<8x16xf32> -> vector<8x16xf32>
    %cst_52 = arith.constant dense<0xFF800000> : vector<8xf32>
    %78 = vector.multi_reduction <maximumf>, %77, %cst_52 [1] : vector<8x16xf32> to vector<8xf32>
    %79 = vector.shape_cast %78 : vector<8xf32> to vector<8x1xf32>
    %80 = vector.broadcast %79 : vector<8x1xf32> to vector<8x16xf32>
    %81 = arith.subf %77, %80 : vector<8x16xf32>
    %82 = math.exp %81 : vector<8x16xf32>
    %cst_53 = arith.constant dense<0.000000e+00> : vector<8xf32>
    %83 = vector.multi_reduction <add>, %82, %cst_53 [1] : vector<8x16xf32> to vector<8xf32>
    %84 = vector.shape_cast %83 : vector<8xf32> to vector<8x1xf32>
    %cst_54 = arith.constant dense<0.000000e+00> : vector<8x8xf32>
    %85 = tpu.matmul %82, %76, %cst_54 {dimension_numbers = #tpu.dot_dimension_numbers<[1], [0], [0], [1], [0, 0, 1, 1], [], []>} : vector<8x16xf32>, vector<16x8xf32>, vector<8x8xf32> -> vector<8x8xf32>
    %86 = tpu.reciprocal %84 {approx = true} : vector<8x1xf32> -> vector<8x1xf32>
    %87 = vector.broadcast %86 : vector<8x1xf32> to vector<8x8xf32>
    %88 = arith.mulf %85, %87 : vector<8x8xf32>
    %c16_55 = arith.constant 16 : index
    %c0_56 = arith.constant 0 : index
    %89 = vector.load %arg15[%c16_55, %c0_56] : memref<32x128xf32, #tpu.memory_space<vmem>>, vector<8x128xf32>
    %cst_57 = arith.constant dense<0.000000e+00> : vector<8x128xf32>
    %90 = tpu.matmul %88, %89, %cst_57 {dimension_numbers = #tpu.dot_dimension_numbers<[1], [0], [0], [1], [0, 0, 1, 1], [], []>} : vector<8x8xf32>, vector<8x128xf32>, vector<8x128xf32> -> vector<8x128xf32>
    %91 = arith.addf %73, %90 : vector<8x128xf32>
    %c0_58 = arith.constant 0 : index
    %c24 = arith.constant 24 : index
    %92 = vector.load %arg18[%c0_58, %c24] : memref<8x32xf32, #tpu.memory_space<vmem>>, vector<8x8xf32>
    %c0_59 = arith.constant 0 : index
    %c24_60 = arith.constant 24 : index
    %93 = vector.load %arg19[%c0_59, %c24_60] : memref<16x32xf32, #tpu.memory_space<vmem>>, vector<16x8xf32>
    %c0_61 = arith.constant 0 : index
    %c24_62 = arith.constant 24 : index
    %94 = vector.load %arg20[%c0_61, %c24_62] : memref<16x32xf32, #tpu.memory_space<vmem>>, vector<16x8xf32>
    %cst_63 = arith.constant dense<0.000000e+00> : vector<8x16xf32>
    %95 = tpu.matmul %92, %93, %cst_63 {dimension_numbers = #tpu.dot_dimension_numbers<[1], [1], [0], [0], [0, 0, 1, 0], [], []>} : vector<8x8xf32>, vector<16x8xf32>, vector<8x16xf32> -> vector<8x16xf32>
    %cst_64 = arith.constant dense<0xFF800000> : vector<8xf32>
    %96 = vector.multi_reduction <maximumf>, %95, %cst_64 [1] : vector<8x16xf32> to vector<8xf32>
    %97 = vector.shape_cast %96 : vector<8xf32> to vector<8x1xf32>
    %98 = vector.broadcast %97 : vector<8x1xf32> to vector<8x16xf32>
    %99 = arith.subf %95, %98 : vector<8x16xf32>
    %100 = math.exp %99 : vector<8x16xf32>
    %cst_65 = arith.constant dense<0.000000e+00> : vector<8xf32>
    %101 = vector.multi_reduction <add>, %100, %cst_65 [1] : vector<8x16xf32> to vector<8xf32>
    %102 = vector.shape_cast %101 : vector<8xf32> to vector<8x1xf32>
    %cst_66 = arith.constant dense<0.000000e+00> : vector<8x8xf32>
    %103 = tpu.matmul %100, %94, %cst_66 {dimension_numbers = #tpu.dot_dimension_numbers<[1], [0], [0], [1], [0, 0, 1, 1], [], []>} : vector<8x16xf32>, vector<16x8xf32>, vector<8x8xf32> -> vector<8x8xf32>
    %104 = tpu.reciprocal %102 {approx = true} : vector<8x1xf32> -> vector<8x1xf32>
    %105 = vector.broadcast %104 : vector<8x1xf32> to vector<8x8xf32>
    %106 = arith.mulf %103, %105 : vector<8x8xf32>
    %c24_67 = arith.constant 24 : index
    %c0_68 = arith.constant 0 : index
    %107 = vector.load %arg15[%c24_67, %c0_68] : memref<32x128xf32, #tpu.memory_space<vmem>>, vector<8x128xf32>
    %cst_69 = arith.constant dense<0.000000e+00> : vector<8x128xf32>
    %108 = tpu.matmul %106, %107, %cst_69 {dimension_numbers = #tpu.dot_dimension_numbers<[1], [0], [0], [1], [0, 0, 1, 1], [], []>} : vector<8x8xf32>, vector<8x128xf32>, vector<8x128xf32> -> vector<8x128xf32>
    %109 = arith.addf %91, %108 : vector<8x128xf32>
    %c0_70 = arith.constant 0 : index
    %c0_71 = arith.constant 0 : index
    %c0_72 = arith.constant 0 : index
    %110 = vector.load %arg17[%c0_70, %c0_71, %c0_72] : memref<1x8x128xf32, #tpu.memory_space<vmem>>, vector<1x8x128xf32>
    %111 = vector.shape_cast %110 : vector<1x8x128xf32> to vector<8x128xf32>
    %112 = vector.shape_cast %109 : vector<8x128xf32> to vector<1x8x128xf32>
    tpu.vector_store %arg17[%c0_70, %c0_71, %c0_72], %112 {strides = array<i32>} : memref<1x8x128xf32, #tpu.memory_space<vmem>>, vector<1x8x128xf32>,
    return
  }
  func.func @transform_0(%arg0: i32, %arg1: i32) -> (i32, i32, i32) {
    %c0_i32 = arith.constant 0 : i32
    %c0_i32_0 = arith.constant 0 : i32
    return %arg0, %arg1, %c0_i32 : i32, i32, i32
  }
  func.func @transform_1(%arg0: i32, %arg1: i32) -> (i32, i32, i32) {
    %c0_i32 = arith.constant 0 : i32
    %c0_i32_0 = arith.constant 0 : i32
    %c0_i32_1 = arith.constant 0 : i32
    return %arg0, %c0_i32, %c0_i32_0 : i32, i32, i32
  }
  func.func @transform_2(%arg0: i32, %arg1: i32) -> (i32, i32, i32) {
    %c0_i32 = arith.constant 0 : i32
    %c0_i32_0 = arith.constant 0 : i32
    return %arg0, %arg1, %c0_i32 : i32, i32, i32
  }
  func.func @transform_3(%arg0: i32, %arg1: i32) -> (i32, i32, i32) {
    %c0_i32 = arith.constant 0 : i32
    %c0_i32_0 = arith.constant 0 : i32
    %c0_i32_1 = arith.constant 0 : i32
    return %arg0, %c0_i32, %c0_i32_0 : i32, i32, i32
  }
  func.func @transform_4(%arg0: i32, %arg1: i32) -> (i32, i32) {
    %c0_i32 = arith.constant 0 : i32
    %c0_i32_0 = arith.constant 0 : i32
    %c0_i32_1 = arith.constant 0 : i32
    return %c0_i32, %c0_i32_0 : i32, i32
  }
  func.func @transform_5(%arg0: i32, %arg1: i32) -> (i32, i32) {
    %c0_i32 = arith.constant 0 : i32
    %c0_i32_0 = arith.constant 0 : i32
    %c0_i32_1 = arith.constant 0 : i32
    return %c0_i32, %c0_i32_0 : i32, i32
  }
  func.func @transform_6(%arg0: i32, %arg1: i32) -> (i32, i32) {
    %c0_i32 = arith.constant 0 : i32
    %c0_i32_0 = arith.constant 0 : i32
    %c0_i32_1 = arith.constant 0 : i32
    return %c0_i32, %c0_i32_0 : i32, i32
  }
  func.func @transform_7(%arg0: i32, %arg1: i32) -> (i32, i32) {
    %c0_i32 = arith.constant 0 : i32
    %c0_i32_0 = arith.constant 0 : i32
    %c0_i32_1 = arith.constant 0 : i32
    return %c0_i32, %c0_i32_0 : i32, i32
  }
  func.func @transform_8(%arg0: i32, %arg1: i32) -> (i32, i32) {
    %c0_i32 = arith.constant 0 : i32
    %c0_i32_0 = arith.constant 0 : i32
    %c0_i32_1 = arith.constant 0 : i32
    return %c0_i32, %c0_i32_0 : i32, i32
  }
  func.func @transform_9(%arg0: i32, %arg1: i32) -> (i32, i32) {
    %c0_i32 = arith.constant 0 : i32
    %c0_i32_0 = arith.constant 0 : i32
    %c0_i32_1 = arith.constant 0 : i32
    return %c0_i32, %c0_i32_0 : i32, i32
  }
  func.func @transform_10(%arg0: i32, %arg1: i32) -> (i32, i32) {
    %c0_i32 = arith.constant 0 : i32
    %c0_i32_0 = arith.constant 0 : i32
    %c0_i32_1 = arith.constant 0 : i32
    return %c0_i32, %c0_i32_0 : i32, i32
  }
  func.func @transform_11(%arg0: i32, %arg1: i32) -> (i32, i32) {
    %c0_i32 = arith.constant 0 : i32
    %c0_i32_0 = arith.constant 0 : i32
    %c0_i32_1 = arith.constant 0 : i32
    return %c0_i32, %c0_i32_0 : i32, i32
  }
  func.func @transform_12(%arg0: i32, %arg1: i32) -> (i32, i32) {
    %c0_i32 = arith.constant 0 : i32
    %c0_i32_0 = arith.constant 0 : i32
    %c0_i32_1 = arith.constant 0 : i32
    return %c0_i32, %c0_i32_0 : i32, i32
  }
  func.func @transform_13(%arg0: i32, %arg1: i32) -> (i32, i32) {
    %c0_i32 = arith.constant 0 : i32
    %c0_i32_0 = arith.constant 0 : i32
    %c0_i32_1 = arith.constant 0 : i32
    return %c0_i32, %c0_i32_0 : i32, i32
  }
  func.func @transform_14(%arg0: i32, %arg1: i32) -> (i32, i32) {
    %c0_i32 = arith.constant 0 : i32
    %c0_i32_0 = arith.constant 0 : i32
    %c0_i32_1 = arith.constant 0 : i32
    return %c0_i32, %c0_i32_0 : i32, i32
  }
  func.func @transform_15(%arg0: i32, %arg1: i32) -> (i32, i32, i32) {
    %c0_i32 = arith.constant 0 : i32
    %c0_i32_0 = arith.constant 0 : i32
    return %arg0, %arg1, %c0_i32 : i32, i32, i32
  }
}

</mosaic_0001>

<bundles_post_ra>
// kernel: tpu_custom_call.1
= control target key start
LH: loop header
LB: loop body
LE: loop exit
PB: predicated region body
PF: predicated region fallthrough
CT: control target
= control target key end

     0   :  { %s4347_s0 = inlined_call_operand.hbm [shape: f32[2,8,32], index: 0, kind: input, shape index: {}]   ;;  %s4348_s1 = inlined_call_operand.hbm [shape: f32[2,16,32], index: 1, kind: input, shape index: {}]   ;;  %s4349_s2 = inlined_call_operand.hbm [shape: f32[2,8,32], index: 2, kind: input, shape index: {}]   ;;  %s4350_s3 = inlined_call_operand.hbm [shape: f32[2,16,32], index: 3, kind: input, shape index: {}]   ;;  %s4351_s4 = inlined_call_operand.hbm [shape: f32[1,32], index: 4, kind: input, shape index: {}]   ;;  %s4352_s5 = inlined_call_operand.hbm [shape: f32[1,32], index: 5, kind: input, shape index: {}]   ;;  %s4353_s6 = inlined_call_operand.hbm [shape: f32[1,32], index: 6, kind: input, shape index: {}]   ;;  %s4354_s7 = inlined_call_operand.hbm [shape: f32[1,32], index: 7, kind: input, shape index: {}]   ;;  %s4355_s8 = inlined_call_operand.hbm [shape: f32[1,32], index: 8, kind: input, shape index: {}]   ;;  %s4356_s9 = inlined_call_operand.hbm [shape: f32[1,32], index: 9, kind: input, shape index: {}]   ;;  %s4357_s10 = inlined_call_operand.hbm [shape: f32[32,32], index: 10, kind: input, shape index: {}]   ;;  %s4358_s11 = inlined_call_operand.hbm [shape: f32[32,32], index: 11, kind: input, shape index: {}]   ;;  %s4359_s12 = inlined_call_operand.hbm [shape: f32[32,32], index: 12, kind: input, shape index: {}]   ;;  %s4360_s13 = inlined_call_operand.hbm [shape: f32[32,128], index: 13, kind: input, shape index: {}]   ;;  %s4361_s14 = inlined_call_operand.hbm [shape: f32[1,128], index: 14, kind: input, shape index: {}]   ;;  %s4362_s15 = inlined_call_operand.hbm [shape: f32[2,8,128], index: 15, kind: output, shape index: {}]  }
   0x1   :  { %4397 = sst [smem:[#allocation49_spill]] %s4347_s0 }
   0x2   :  { %4398 = sst [smem:[#allocation50_spill]] %s4348_s1 }
   0x3   :  { %4399 = sst [smem:[#allocation51_spill]] %s4349_s2 }
   0x4   :  { %4400 = sst [smem:[#allocation52_spill]] %s4351_s4 }
   0x5   :  { %4401 = sst [smem:[#allocation53_spill]] %s4352_s5 }
   0x6   :  { %4402 = sst [smem:[#allocation54_spill]] %s4353_s6 }
   0x7   :  { %4403 = sst [smem:[#allocation55_spill]] %s4354_s7 }
   0x8   :  { %4404 = sst [smem:[#allocation56_spill]] %s4355_s8 }
   0x9   :  { %4405 = sst [smem:[#allocation57_spill]] %s4356_s9 }
   0xa   :  { %4406 = sst [smem:[#allocation58_spill]] %s4358_s11 }
   0xb   :  { %4407 = sst [smem:[#allocation59_spill]] %s4359_s12 }
   0xc   :  { %4408 = sst [smem:[#allocation60_spill]] %s4360_s13 }
   0xd   :  { %4409 = sst [smem:[#allocation61_spill]] %s4361_s14 }
   0xe   :  { %4410 = sst [smem:[#allocation62_spill]] %s4362_s15 }
   0xf   :  { %20 = vsyncpa [#allocation6], 0 }
  0x10   :  { %22 = vsyncpa [#allocation6 + $0x1], 0 }
  0x11   :  { %23 = vsyncpa [#allocation9], 0 }
  0x12   :  { %25 = vsyncpa [#allocation9 + $0x1], 0 }
  0x13   :  { %26 = vsyncpa [#allocation12], 0 }
  0x14   :  { %28 = vsyncpa [#allocation12 + $0x1], 0 }
  0x15   :  { %29 = vsyncpa [#allocation15], 0 }
  0x16   :  { %30 = vsyncpa [#allocation18], 0 }
  0x17   :  { %31 = vsyncpa [#allocation21], 0 }
  0x18   :  { %32 = vsyncpa [#allocation24], 0 }
  0x19   :  { %33 = vsyncpa [#allocation27], 0 }
  0x1a   :  { %34 = vsyncpa [#allocation7], 0 }
  0x1b   :  { %36 = vsyncpa [#allocation7 + $0x1], 0  ;;  %s3632_s18 = smov 0   ;;  %s3634_s19 = smov 0  }
  0x1c   :  { %s3636_s20 = smov 0   ;;  %s3638_s21 = smov 0  }
  0x1d   :  { %s3640_s22 = smov 0   ;;  %s3642_s23 = smov 0  }
  0x1e LB: > { %4411 = sst [smem:[#allocation40_spill]] %s3506_s18  ;;  %s3663_s24 = sadd.s32 4294967295, %s3526_s23   ;;  %s3526_s23 = sphi %s3642_s23, %s42_s23   ;;  %s3522_s22 = sphi %s3640_s22, %s4489_s22   ;;  %s3518_s21 = sphi %s3638_s21, %s4488_s21   ;;  %s3514_s20 = sphi %s3636_s20, %s4484_s20   ;;  %s3510_s19 = sphi %s3634_s19, %s4487_s19   ;;  %s3506_s18 = sphi %s3632_s18, %s4486_s18  }
  0x1f   : > { %4412 = sst [smem:[#allocation41_spill]] %s3514_s20  ;;  %p2439_p0 = scmp.ge.s32.totalorder %s3526_s23, 1 }
  0x20   : > { %4413 = sst [smem:[#allocation42_spill]] %s3518_s21  ;;  %p4367_p1 = scmp.eq.s32.totalorder %s3663_s24, 0 }
  0x21   : > { %4414 = sst [smem:[#allocation43_spill]] %s3663_s24  ;;  %p426_p2 = scmp.lt.s32.totalorder %s3526_s23, 3 }
  0x22   : > { %s3528_s26 = smov [#allocation13]   ;;  %s3529_s28 = smov [#allocation14]  }
  0x23   : > { %p3668_p3 = pnand %p2439_p0, %p426_p2  ;;  %s439_s27 = sshll.u32 %s3528_s26, 4  ;;  %s440_s27 = int_to_ptr.vmem [resolvable:$true] %s439_s27 }
  0x24   : > { %s450_s29 = sshll.u32 %s3529_s28, 4  ;;  %s3530_s16 = smov [#allocation17]   ;;  %s3681_s29 = int_to_ptr.vmem [resolvable:$true] %s450_s29 }
  0x25   : > { %s4415_s25 = scalar_select %p3668_p3, 1, 0 }
  0x26   : > { %p2786_p5 = pneg %p3668_p3  ;;  %s472_s17 = sshll.u32 %s3530_s16, 4  ;;  %s3683_s17 = int_to_ptr.vmem [resolvable:$true] %s472_s17 }
  0x27   : > { %4416 = sst [smem:[#allocation44_spill]] %s4415_s25  ;;  %s4418_s4 = sld [smem:[#allocation52_spill]] }
  0x28   : > { %p3677_p6 = pnand %p2786_p5, %p4367_p1 }
  0x2a   : > { %s4417_s30 = scalar_select %p3677_p6, 1, 0 }
  0x2b   : > { %p3693_p8 = pneg %p3677_p6 }
  0x2d   : > { %s2984_s21 = scalar_lea.hbm %s4418_s4, 16 }
  0x2e   : > { %p2985_p7 = scmp.ne.s32.totalorder %s4418_s4, %s2984_s21  ;;  %p2991_p11 = scmp.lt.u32.totalorder %s2984_s21, %s4418_s4 }
  0x2f   : > { %s4419_s28 = scalar_select %p3693_p8, 1, 0 }
  0x30   : > { %p2987_p9 = pnand %p3693_p8, %p2985_p7 }
  0x32   : > { %p2988_p10 = pneg %p2987_p9 }
  0x34   : > { %p2993_p12 = pnand %p2991_p11, %p2988_p10 }
  0x36   : > { %2996 = shalt.err (!%p2993_p12)
}
  0x37   : > { %s2997_s15 = scalar_lea.vmem %s440_s27, 16  ;;  %s3004_s2 = scalar_lea.vmem %s440_s27, 32 }
  0x38   : > { %p2998_p13 = scmp.ne.s32.totalorder %s440_s27, %s2997_s15  ;;  %p3005_p5 = scmp.lt.s32.totalorder %s440_s27, %s440_s27 }
  0x39   : > { %p3006_p4 = scmp.lt.s32.totalorder %s3004_s2, %s2997_s15 }
  0x3a   : > { %p3000_p0 = pnand %p2998_p13, %p3693_p8 }
  0x3b   : > { %p3007_p1 = por %p3006_p4, %p3005_p5 }
  0x3c   : > { %p3001_p2 = pneg %p3000_p0 }
  0x3e   : > { %p3008_p3 = pnand %p3007_p1, %p3001_p2 }
  0x40   : > { %3011 = shalt.err (!%p3008_p3)
}
  0x41   : > { %2789 = dma.hbm_to_vmem [thread:$0]  (!%p3677_p6), %s4418_s4, 16, %s440_s27, [#allocation12]  }
  0x42   : > { %s4420_s5 = sld [smem:[#allocation53_spill]] }
  0x48   : > { %s3012_s16 = scalar_lea.hbm %s4420_s5, 16 }
  0x49   : > { %p3013_p7 = scmp.ne.s32.totalorder %s4420_s5, %s3012_s16  ;;  %p3019_p1 = scmp.lt.u32.totalorder %s3012_s16, %s4420_s5 }
  0x4b   : > { %p3015_p9 = pnand %p3013_p7, %p3693_p8 }
  0x4d   : > { %p3016_p4 = pneg %p3015_p9 }
  0x4f   : > { %p3021_p3 = pnand %p3019_p1, %p3016_p4 }
  0x51   : > { %3024 = shalt.err (!%p3021_p3)
}
  0x52   : > { %s3025_s27 = scalar_lea.vmem %s3681_s29, 16  ;;  %s3032_s12 = scalar_lea.vmem %s3681_s29, 32 }
  0x53   : > { %p3026_p10 = scmp.ne.s32.totalorder %s3681_s29, %s3025_s27  ;;  %p3033_p13 = scmp.lt.s32.totalorder %s3681_s29, %s3681_s29 }
  0x54   : > { %p3034_p0 = scmp.lt.s32.totalorder %s3032_s12, %s3025_s27 }
  0x55   : > { %p3028_p11 = pnand %p3026_p10, %p3693_p8 }
  0x56   : > { %p3035_p2 = por %p3034_p0, %p3033_p13 }
  0x57   : > { %p3029_p12 = pneg %p3028_p11 }
  0x59   : > { %p3036_p5 = pnand %p3035_p2, %p3029_p12 }
  0x5b   : > { %3039 = shalt.err (!%p3036_p5)
}
  0x5c   : > { %2792 = dma.hbm_to_vmem [thread:$0]  (!%p3677_p6), %s4420_s5, 16, %s3681_s29, [#allocation15]  }
  0x5d   : > { %s4421_s7 = sld [smem:[#allocation55_spill]] }
  0x63   : > { %s3040_s21 = scalar_lea.hbm %s4421_s7, 16 }
  0x64   : > { %p3041_p7 = scmp.ne.s32.totalorder %s4421_s7, %s3040_s21  ;;  %p3047_p1 = scmp.lt.u32.totalorder %s3040_s21, %s4421_s7 }
  0x66   : > { %p3043_p9 = pnand %p3041_p7, %p3693_p8 }
  0x68   : > { %p3044_p4 = pneg %p3043_p9 }
  0x6a   : > { %p3049_p3 = pnand %p3047_p1, %p3044_p4 }
  0x6c   : > { %3052 = shalt.err (!%p3049_p3)
}
  0x6d   : > { %s3053_s29 = scalar_lea.vmem %s3683_s17, 16  ;;  %s3060_s12 = scalar_lea.vmem %s3683_s17, 32 }
  0x6e   : > { %p3054_p10 = scmp.ne.s32.totalorder %s3683_s17, %s3053_s29  ;;  %p3061_p13 = scmp.lt.s32.totalorder %s3683_s17, %s3683_s17 }
  0x6f   : > { %p3062_p0 = scmp.lt.s32.totalorder %s3060_s12, %s3053_s29 }
  0x70   : > { %p3056_p11 = pnand %p3054_p10, %p3693_p8 }
  0x71   : > { %p3063_p2 = por %p3062_p0, %p3061_p13 }
  0x72   : > { %p3057_p12 = pneg %p3056_p11 }
  0x74   : > { %p3064_p5 = pnand %p3063_p2, %p3057_p12 }
  0x76   : > { %3067 = shalt.err (!%p3064_p5)
}
  0x77   : > { %2798 = dma.hbm_to_vmem [thread:$0]  (!%p3677_p6), %s4421_s7, 16, %s3683_s17, [#allocation18]  }
  0x78   : > { %s3531_s26 = smov [#allocation20]   ;;  %s4422_s9 = sld [smem:[#allocation57_spill]] }
  0x79   : > { %s494_s0 = sshll.u32 %s3531_s26, 4  ;;  %s495_s0 = int_to_ptr.vmem [resolvable:$true] %s494_s0 }
  0x7e   : > { %s3068_s15 = scalar_lea.hbm %s4422_s9, 16 }
  0x7f   : > { %p3069_p7 = scmp.ne.s32.totalorder %s4422_s9, %s3068_s15  ;;  %p3075_p1 = scmp.lt.u32.totalorder %s3068_s15, %s4422_s9 }
  0x81   : > { %p3071_p9 = pnand %p3069_p7, %p3693_p8 }
  0x83   : > { %p3072_p4 = pneg %p3071_p9 }
  0x85   : > { %p3077_p3 = pnand %p3075_p1, %p3072_p4 }
  0x87   : > { %3080 = shalt.err (!%p3077_p3)
}
  0x88   : > { %s3081_s17 = scalar_lea.vmem %s495_s0, 16  ;;  %s3088_s14 = scalar_lea.vmem %s495_s0, 32 }
  0x89   : > { %p3082_p10 = scmp.ne.s32.totalorder %s495_s0, %s3081_s17  ;;  %p3089_p13 = scmp.lt.s32.totalorder %s495_s0, %s495_s0 }
  0x8a   : > { %p3090_p0 = scmp.lt.s32.totalorder %s3088_s14, %s3081_s17 }
  0x8b   : > { %p3084_p11 = pnand %p3082_p10, %p3693_p8 }
  0x8c   : > { %p3091_p2 = por %p3090_p0, %p3089_p13 }
  0x8d   : > { %p3085_p12 = pneg %p3084_p11 }
  0x8f   : > { %p3092_p5 = pnand %p3091_p2, %p3085_p12 }
  0x91   : > { %3095 = shalt.err (!%p3092_p5)
}
  0x92   : > { %2804 = dma.hbm_to_vmem [thread:$0]  (!%p3677_p6), %s4422_s9, 16, %s495_s0, [#allocation21]  }
  0x93   : > { %s3532_s21 = smov [#allocation23]   ;;  %s3533_s15 = smov [#allocation26]  }
  0x94   : > { %s517_s16 = sshll.u32 %s3532_s21, 4  ;;  %s543_s2 = sshll.u32 %s3533_s15, 4  ;;  %s518_s16 = int_to_ptr.vmem [resolvable:$true] %s517_s16  ;;  %s3775_s2 = int_to_ptr.vmem [resolvable:$true] %s543_s2 }
  0x95   : > { %s4423_s11 = sld [smem:[#allocation58_spill]] }
  0x9b   : > { %s3096_s12 = scalar_lea.hbm %s4423_s11, 512 }
  0x9c   : > { %p3097_p7 = scmp.ne.s32.totalorder %s4423_s11, %s3096_s12  ;;  %p3103_p1 = scmp.lt.u32.totalorder %s3096_s12, %s4423_s11 }
  0x9e   : > { %p3099_p9 = pnand %p3097_p7, %p3693_p8 }
  0xa0   : > { %p3100_p4 = pneg %p3099_p9 }
  0xa2   : > { %p3105_p3 = pnand %p3103_p1, %p3100_p4 }
  0xa4   : > { %3108 = shalt.err (!%p3105_p3)
}
  0xa5   : > { %s3109_s26 = scalar_lea.vmem %s518_s16, 512  ;;  %p3117_p13 = scmp.lt.s32.totalorder %s518_s16, %s518_s16 }
  0xa6   : > { %p3110_p10 = scmp.ne.s32.totalorder %s518_s16, %s3109_s26  ;;  %p3118_p0 = scmp.lt.s32.totalorder %s3109_s26, %s3109_s26 }
  0xa8   : > { %p3112_p11 = pnand %p3110_p10, %p3693_p8  ;;  %p3119_p2 = por %p3118_p0, %p3117_p13 }
  0xaa   : > { %p3113_p12 = pneg %p3112_p11 }
  0xac   : > { %p3120_p5 = pnand %p3119_p2, %p3113_p12 }
  0xae   : > { %3123 = shalt.err (!%p3120_p5)
}
  0xaf   : > { %s4371_s21 = smov 128   ;;  %s4373_s15 = smov 8  }
  0xb0   : > { %2810 = dma.hbm_to_vmem [thread:$0]  (!%p3677_p6), %s4423_s11, 512, %s518_s16, [#allocation24], %s4371_s21, %s4371_s21, %s4373_s15  }
  0xb1   : > { %s4424_s13 = sld [smem:[#allocation60_spill]] }
  0xb7   : > { %s3124_s14 = scalar_lea.hbm %s4424_s13, 512 }
  0xb8   : > { %p3125_p7 = scmp.ne.s32.totalorder %s4424_s13, %s3124_s14  ;;  %p3131_p1 = scmp.lt.u32.totalorder %s3124_s14, %s4424_s13 }
  0xba   : > { %p3127_p9 = pnand %p3125_p7, %p3693_p8 }
  0xbc   : > { %p3128_p4 = pneg %p3127_p9 }
  0xbe   : > { %p3133_p3 = pnand %p3131_p1, %p3128_p4 }
  0xc0   : > { %3136 = shalt.err (!%p3133_p3)
}
  0xc1   : > { %s3137_s16 = scalar_lea.vmem %s3775_s2, 512  ;;  %p3145_p13 = scmp.lt.s32.totalorder %s3775_s2, %s3775_s2 }
  0xc2   : > { %p3138_p10 = scmp.ne.s32.totalorder %s3775_s2, %s3137_s16  ;;  %p3146_p0 = scmp.lt.s32.totalorder %s3137_s16, %s3137_s16 }
  0xc4   : > { %p3140_p11 = pnand %p3138_p10, %p3693_p8  ;;  %p3147_p2 = por %p3146_p0, %p3145_p13 }
  0xc6   : > { %p3141_p12 = pneg %p3140_p11 }
  0xc8   : > { %p3148_p5 = pnand %p3147_p2, %p3141_p12 }
  0xca   : > { %3151 = shalt.err (!%p3148_p5)
}
  0xcb   : > { %2816 = dma.hbm_to_vmem [thread:$0]  (!%p3677_p6), %s4424_s13, 512, %s3775_s2, [#allocation27], %s4371_s21, %s4371_s21, %s4373_s15  }
  0xcc   : > { %s2438_s29 = sadd.s32 4294967294, %s3526_s23   ;;  %s54_s12 = sadd.s32 1, %s3522_s22 }
  0xcd   : > { %p56_p7 = scmp.ge.s32.totalorder %s54_s12, 2  ;;  %s63_s17 = sadd.s32 1, %s3514_s20 }
  0xce   : > { %p70_p9 = scmp.ne.s32.totalorder %s3514_s20, %s3510_s19  ;;  %p71_p4 = scmp.eq.s32.totalorder %s3526_s23, 0 }
  0xcf   : > { %s4491_s12 = smov (%p56_p7, %s54_s12), 0  ;;  %p76_p3 = scmp.ne.s32.totalorder %s3510_s19, %s3506_s18 }
  0xd0   : > { %4425 = sst [smem:[#allocation45_spill]] %s4491_s12  ;;  %p3832_p1 = por %p71_p4, %p70_p9 }
  0xd1   : > { %s58_s2 = ssub.s32 %s3522_s22, %s4491_s12  ;;  %p413_p10 = scmp.eq.s32.totalorder %s3663_s24, 1 }
  0xd2   : > { %p61_p11 = scmp.eq.s32.totalorder %s58_s2, 0  ;;  %p4427_p12 = scmp.eq.s32.totalorder %s3663_s24, 0 }
  0xd3   : > { %p3847_p0 = por %p413_p10, %p70_p9  ;;  %p419_p2 = scmp.eq.s32.totalorder %s2438_s29, 1 }
  0xd4   : > { %p3843_p13 = por %p4427_p12, %p76_p3  ;;  %p2848_p7 = scmp.lt.s32.totalorder %s3526_s23, 2 }
  0xd5   : > { %s4429_s0 = scalar_select %p3847_p0, 1, 0 }
  0xd6   : > { %s4428_s25 = scalar_select %p3843_p13, 1, 0 }
  0xd7   : > { %4430 = sst [smem:[#allocation46_spill]] %s4429_s0  ;;  %p3854_p5 = por %p419_p2, %p76_p3 }
  0xd8   : > { %s3852_s26 = scalar_select %p61_p11, %s3514_s20, %s63_s17  }
  0xd9   : > { %s4432_s16 = scalar_select %p3854_p5, 1, 0 }
  0xda   : > { %4431 = sst [smem:[#allocation47_spill]] %s3852_s26  ;;  %s3860_s4 = sand.u32 1, %s3514_s20  }
  0xdb   : > { %4433 = sst [smem:[#allocation48_spill]] %s4432_s16  ;;  %p3865_p4 = pnand %p2848_p7, %p3832_p1 }
  0xdc   : > { %s4375_s21 = sshll.u32 %s3860_s4, 4  ;;  %s4376_s29 = sshll.u32 %s3522_s22, 8 }
  0xdd   : > { %s4434_s2 = scalar_select %p3865_p4, 1, 0 }
  0xde   : > { %s4435_s1 = sld [smem:[#allocation50_spill]]  ;;  %s591_s27 = scalar_lea.vmem [#allocation8], %s4375_s21 }
  0xdf   : > { %s598_s14 = sshll.u32 %s591_s27, 4  ;;  %s4436_s7 = sand.u32 1, %s3526_s23   ;;  %s3880_s14 = int_to_ptr.vmem [resolvable:$true] %s598_s14 }
  0xe0   : > { %s3884_s9 = scalar_lea.sflag [#allocation9], %s4436_s7  ;;  %p3890_p1 = pneg %p3865_p4 }
  0xe2   : > { %s4437_s13 = scalar_select %p3890_p1, 1, 0 }
  0xe4   : > { %s3876_s5 = scalar_lea.hbm %s4435_s1, %s4376_s29  ;;  %s3157_s27 = scalar_lea.hbm %s4435_s1, 512 }
  0xe5   : > { %s3152_s11 = scalar_lea.hbm %s3876_s5, 256  ;;  %p3158_p11 = scmp.lt.u32.totalorder %s3876_s5, %s4435_s1 }
  0xe6   : > { %p3153_p9 = scmp.ne.s32.totalorder %s3876_s5, %s3152_s11  ;;  %p3159_p12 = scmp.lt.u32.totalorder %s3157_s27, %s3152_s11 }
  0xe7   : > { %p3161_p7 = scmp.lt.u32.totalorder %s3152_s11, %s3876_s5 }
  0xe8   : > { %p3155_p3 = pnand %p3890_p1, %p3153_p9  ;;  %p3160_p2 = por %p3159_p12, %p3158_p11 }
  0xea   : > { %p3156_p10 = pneg %p3155_p3  ;;  %p3162_p5 = por %p3161_p7, %p3160_p2 }
  0xec   : > { %p3163_p0 = pnand %p3162_p5, %p3156_p10 }
  0xee   : > { %3166 = shalt.err (!%p3163_p0)
}
  0xef   : > { %s3167_s7 = scalar_lea.vmem %s3880_s14, 256  ;;  %s3536_s15 = smov [#allocation8]  }
  0xf0   : > { %p3168_p9 = scmp.ne.s32.totalorder %s3880_s14, %s3167_s7  ;;  %s3172_s17 = sshll.u32 %s3536_s15, 4  ;;  %s3173_s17 = int_to_ptr.vmem [resolvable:$false] %s3172_s17 }
  0xf1   : > { %s3174_s21 = scalar_lea.vmem %s3173_s17, 512  ;;  %p3175_p6 = scmp.lt.s32.totalorder %s3880_s14, %s3173_s17 }
  0xf2   : > { %p3170_p3 = pnand %p3168_p9, %p3890_p1  ;;  %p3176_p8 = scmp.lt.s32.totalorder %s3174_s21, %s3167_s7 }
  0xf4   : > { %p3171_p13 = pneg %p3170_p3  ;;  %p3177_p11 = por %p3176_p8, %p3175_p6 }
  0xf6   : > { %p3178_p12 = pnand %p3177_p11, %p3171_p13 }
  0xf8   : > { %3181 = shalt.err (!%p3178_p12)
}
  0xf9   : > { %s4438_s11 = smov 8   ;;  %s4439_s29 = smov 128  }
  0xfa   : > { %2826 = dma.hbm_to_vmem [thread:$0]  (!%p3865_p4), %s3876_s5, 256, %s3880_s14, %s3884_s9, %s4439_s29, %s4439_s29, %s4438_s11  }
  0xfb   : > { %s4440_s27 = sshll.u32 %s3522_s22, 8  ;;  %s4441_s17 = sshll.u32 %s3860_s4, 4 }
  0xfc   : > { %s3922_s7 = scalar_lea.hbm %s4350_s3, %s4440_s27  ;;  %s3926_s21 = scalar_lea.vmem [#allocation11], %s4441_s17 }
  0xfd   : > { %s3537_s26 = smov [#allocation16]   ;;  %s4442_s6 = sld [smem:[#allocation54_spill]] }
  0xfe   : > { %s461_s20 = sshll.u32 %s3537_s26, 4  ;;  %p4443_p8 = scmp.ne.s32.totalorder %s4419_s28, 0  ;;  %s462_s20 = int_to_ptr.vmem [resolvable:$true] %s461_s20 }
 0x103   : > { %s3182_s0 = scalar_lea.hbm %s4442_s6, 16 }
 0x104   : > { %p3183_p6 = scmp.ne.s32.totalorder %s4442_s6, %s3182_s0  ;;  %p3189_p5 = scmp.lt.u32.totalorder %s3182_s0, %s4442_s6 }
 0x106   : > { %p3185_p13 = pnand %p3183_p6, %p4443_p8 }
 0x108   : > { %p3186_p0 = pneg %p3185_p13 }
 0x10a   : > { %p3191_p10 = pnand %p3189_p5, %p3186_p0 }
 0x10c   : > { %3194 = shalt.err (!%p3191_p10)
}
 0x10d   : > { %s3195_s27 = scalar_lea.vmem %s462_s20, 16  ;;  %s3202_s18 = scalar_lea.vmem %s462_s20, 32 }
 0x10e   : > { %p3196_p2 = scmp.ne.s32.totalorder %s462_s20, %s3195_s27  ;;  %p3203_p3 = scmp.lt.s32.totalorder %s462_s20, %s462_s20 }
 0x10f   : > { %p3204_p11 = scmp.lt.s32.totalorder %s3202_s18, %s3195_s27 }
 0x110   : > { %p3198_p7 = pnand %p3196_p2, %p4443_p8 }
 0x111   : > { %p3205_p12 = por %p3204_p11, %p3203_p3 }
 0x112   : > { %p3199_p9 = pneg %p3198_p7 }
 0x114   : > { %p3206_p4 = pnand %p3205_p12, %p3199_p9 }
 0x116   : > { %3209 = shalt.err (!%p3206_p4)
}
 0x117   : > { %p4444_p6 = scmp.ne.s32.totalorder %s4417_s30, 0  ;;  %s3538_s0 = smov [#allocation19]  }
 0x118   : > { %s483_s16 = sshll.u32 %s3538_s0, 4  ;;  %s3539_s15 = smov [#allocation22]   ;;  %s484_s16 = int_to_ptr.vmem [resolvable:$true] %s483_s16 }
 0x119   : > { %2795 = dma.hbm_to_vmem [thread:$0]  (!%p4444_p6), %s4442_s6, 16, %s462_s20, [#allocation15]  }
 0x11a   : > { %s504_s17 = sshll.u32 %s3539_s15, 4  ;;  %s4445_s8 = sld [smem:[#allocation56_spill]]  ;;  %s505_s17 = int_to_ptr.vmem [resolvable:$true] %s504_s17 }
 0x120   : > { %s3210_s14 = scalar_lea.hbm %s4445_s8, 16 }
 0x121   : > { %p3211_p4 = scmp.ne.s32.totalorder %s4445_s8, %s3210_s14  ;;  %p3217_p5 = scmp.lt.u32.totalorder %s3210_s14, %s4445_s8 }
 0x123   : > { %p3213_p13 = pnand %p3211_p4, %p4443_p8 }
 0x125   : > { %p3214_p0 = pneg %p3213_p13 }
 0x127   : > { %p3219_p10 = pnand %p3217_p5, %p3214_p0 }
 0x129   : > { %3222 = shalt.err (!%p3219_p10)
}
 0x12a   : > { %s3223_s20 = scalar_lea.vmem %s484_s16, 16  ;;  %s3230_s26 = scalar_lea.vmem %s484_s16, 32 }
 0x12b   : > { %p3224_p2 = scmp.ne.s32.totalorder %s484_s16, %s3223_s20  ;;  %p3231_p3 = scmp.lt.s32.totalorder %s484_s16, %s484_s16 }
 0x12c   : > { %p3232_p11 = scmp.lt.s32.totalorder %s3230_s26, %s3223_s20 }
 0x12d   : > { %p3226_p7 = pnand %p3224_p2, %p4443_p8 }
 0x12e   : > { %p3233_p12 = por %p3232_p11, %p3231_p3 }
 0x12f   : > { %p3227_p9 = pneg %p3226_p7 }
 0x131   : > { %p3234_p1 = pnand %p3233_p12, %p3227_p9 }
 0x133   : > { %3237 = shalt.err (!%p3234_p1)
}
 0x134   : > { %2801 = dma.hbm_to_vmem [thread:$0]  (!%p4444_p6), %s4445_s8, 16, %s484_s16, [#allocation18]  }
 0x135   : > { %s3238_s1 = scalar_lea.hbm %s4357_s10, 512 }
 0x136   : > { %p3239_p4 = scmp.ne.s32.totalorder %s4357_s10, %s3238_s1  ;;  %p3245_p1 = scmp.lt.u32.totalorder %s3238_s1, %s4357_s10 }
 0x138   : > { %p3241_p13 = pnand %p3239_p4, %p4443_p8 }
 0x13a   : > { %p3242_p0 = pneg %p3241_p13 }
 0x13c   : > { %p3247_p5 = pnand %p3245_p1, %p3242_p0 }
 0x13e   : > { %3250 = shalt.err (!%p3247_p5)
}
 0x13f   : > { %s3251_s20 = scalar_lea.vmem %s505_s17, 512  ;;  %p3259_p9 = scmp.lt.s32.totalorder %s505_s17, %s505_s17 }
 0x140   : > { %p3252_p10 = scmp.ne.s32.totalorder %s505_s17, %s3251_s20  ;;  %p3260_p3 = scmp.lt.s32.totalorder %s3251_s20, %s3251_s20 }
 0x142   : > { %p3254_p2 = pnand %p3252_p10, %p4443_p8  ;;  %p3261_p11 = por %p3260_p3, %p3259_p9 }
 0x144   : > { %p3255_p7 = pneg %p3254_p2 }
 0x146   : > { %p3262_p12 = pnand %p3261_p11, %p3255_p7 }
 0x148   : > { %3265 = shalt.err (!%p3262_p12)
}
 0x149   : > { %2807 = dma.hbm_to_vmem [thread:$0]  (!%p4444_p6), %s4357_s10, 512, %s505_s17, [#allocation21], %s4439_s29, %s4439_s29, %s4438_s11  }
 0x14a   : > { %s3540_s0 = smov [#allocation25]   ;;  %s3541_s12 = smov [#allocation28]  }
 0x14b   : > { %s530_s15 = sshll.u32 %s3540_s0, 4  ;;  %s557_s5 = sshll.u32 %s3541_s12, 4  ;;  %s531_s15 = int_to_ptr.vmem [resolvable:$true] %s530_s15  ;;  %s558_s5 = int_to_ptr.vmem [resolvable:$true] %s557_s5 }
 0x14c   : > { %s4446_s27 = sld [smem:[#allocation59_spill]] }
 0x152   : > { %s3266_s18 = scalar_lea.hbm %s4446_s27, 512 }
 0x153   : > { %p3267_p4 = scmp.ne.s32.totalorder %s4446_s27, %s3266_s18  ;;  %p3273_p1 = scmp.lt.u32.totalorder %s3266_s18, %s4446_s27 }
 0x155   : > { %p3269_p13 = pnand %p3267_p4, %p4443_p8 }
 0x157   : > { %p3270_p0 = pneg %p3269_p13 }
 0x159   : > { %p3275_p5 = pnand %p3273_p1, %p3270_p0 }
 0x15b   : > { %3278 = shalt.err (!%p3275_p5)
}
 0x15c   : > { %s3279_s17 = scalar_lea.vmem %s531_s15, 512  ;;  %p3287_p9 = scmp.lt.s32.totalorder %s531_s15, %s531_s15 }
 0x15d   : > { %p3280_p10 = scmp.ne.s32.totalorder %s531_s15, %s3279_s17  ;;  %p3288_p3 = scmp.lt.s32.totalorder %s3279_s17, %s3279_s17 }
 0x15f   : > { %p3282_p2 = pnand %p3280_p10, %p4443_p8  ;;  %p3289_p11 = por %p3288_p3, %p3287_p9 }
 0x161   : > { %p3283_p7 = pneg %p3282_p2 }
 0x163   : > { %p3290_p12 = pnand %p3289_p11, %p3283_p7 }
 0x165   : > { %3293 = shalt.err (!%p3290_p12)
}
 0x166   : > { %2813 = dma.hbm_to_vmem [thread:$0]  (!%p4444_p6), %s4446_s27, 512, %s531_s15, [#allocation24], %s4439_s29, %s4439_s29, %s4438_s11  }
 0x167   : > { %s4447_s1 = sld [smem:[#allocation61_spill]] }
 0x16d   : > { %s3294_s14 = scalar_lea.hbm %s4447_s1, 16 }
 0x16e   : > { %p3295_p4 = scmp.ne.s32.totalorder %s4447_s1, %s3294_s14  ;;  %p3301_p1 = scmp.lt.u32.totalorder %s3294_s14, %s4447_s1 }
 0x170   : > { %p3297_p13 = pnand %p3295_p4, %p4443_p8 }
 0x172   : > { %p3298_p0 = pneg %p3297_p13 }
 0x174   : > { %p3303_p5 = pnand %p3301_p1, %p3298_p0 }
 0x176   : > { %3306 = shalt.err (!%p3303_p5)
}
 0x177   : > { %s3307_s17 = scalar_lea.vmem %s558_s5, 16  ;;  %s3314_s15 = scalar_lea.vmem %s558_s5, 32 }
 0x178   : > { %p3308_p10 = scmp.ne.s32.totalorder %s558_s5, %s3307_s17  ;;  %p3315_p9 = scmp.lt.s32.totalorder %s558_s5, %s558_s5 }
 0x179   : > { %p3316_p3 = scmp.lt.s32.totalorder %s3314_s15, %s3307_s17 }
 0x17a   : > { %p3310_p2 = pnand %p3308_p10, %p4443_p8 }
 0x17b   : > { %p3317_p11 = por %p3316_p3, %p3315_p9 }
 0x17c   : > { %p3311_p7 = pneg %p3310_p2 }
 0x17e   : > { %p3318_p12 = pnand %p3317_p11, %p3311_p7 }
 0x180   : > { %3321 = shalt.err (!%p3318_p12)
}
 0x181   : > { %2819 = dma.hbm_to_vmem [thread:$0]  (!%p4444_p6), %s4447_s1, 16, %s558_s5, [#allocation27]  }
 0x182   : > { %s4396_s28 = sshll.u32 %s3860_s4, 3  ;;  %s2453_s0 = sshll.u32 %s3522_s22, 7 }
 0x183   : > { %s4448_s18 = sld [smem:[#allocation49_spill]]  ;;  %s572_s30 = scalar_lea.vmem [#allocation5], %s4396_s28 }
 0x184   : > { %s580_s16 = sshll.u32 %s572_s30, 4  ;;  %s4450_s6 = sld [smem:[#allocation51_spill]]  ;;  %s4034_s16 = int_to_ptr.vmem [resolvable:$true] %s580_s16 }
 0x185   : > { %s569_s26 = scalar_lea.sflag [#allocation6], %s3860_s4  ;;  %p4451_p6 = scmp.ne.s32.totalorder %s4437_s13, 0 }
 0x189   : > { %s4449_s24 = smov %s4448_s18  ;;  %s4030_s20 = scalar_lea.hbm %s4448_s18, %s2453_s0 }
 0x18a   : > { %s4039_s5 = scalar_lea.hbm %s4450_s6, %s2453_s0  ;;  %s3322_s1 = scalar_lea.hbm %s4030_s20, 128 }
 0x18b   : > { %p3323_p8 = scmp.ne.s32.totalorder %s4030_s20, %s3322_s1  ;;  %s3327_s18 = scalar_lea.hbm %s4449_s24, 256 }
 0x18c   : > { %p3328_p0 = scmp.lt.u32.totalorder %s4030_s20, %s4449_s24  ;;  %p3329_p1 = scmp.lt.u32.totalorder %s3327_s18, %s3322_s1 }
 0x18d   : > { %p3325_p4 = pnand %p3323_p8, %p4451_p6  ;;  %p3331_p10 = scmp.lt.u32.totalorder %s3322_s1, %s4030_s20 }
 0x18e   : > { %p3330_p5 = por %p3329_p1, %p3328_p0 }
 0x18f   : > { %p3326_p13 = pneg %p3325_p4 }
 0x190   : > { %p3332_p2 = por %p3331_p10, %p3330_p5 }
 0x192   : > { %p3333_p7 = pnand %p3332_p2, %p3326_p13 }
 0x194   : > { %3336 = shalt.err (!%p3333_p7)
}
 0x195   : > { %s3337_s0 = scalar_lea.vmem %s4034_s16, 128  ;;  %s3542_s30 = smov [#allocation5]  }
 0x196   : > { %p3338_p9 = scmp.ne.s32.totalorder %s4034_s16, %s3337_s0  ;;  %s3342_s17 = sshll.u32 %s3542_s30, 4  ;;  %s3343_s17 = int_to_ptr.vmem [resolvable:$false] %s3342_s17 }
 0x197   : > { %s3344_s8 = scalar_lea.vmem %s3343_s17, 256  ;;  %p3345_p12 = scmp.lt.s32.totalorder %s4034_s16, %s3343_s17 }
 0x198   : > { %p3340_p3 = pnand %p3338_p9, %p4451_p6  ;;  %p3346_p8 = scmp.lt.s32.totalorder %s3344_s8, %s3337_s0 }
 0x19a   : > { %p3341_p11 = pneg %p3340_p3  ;;  %p3347_p4 = por %p3346_p8, %p3345_p12 }
 0x19c   : > { %p3348_p0 = pnand %p3347_p4, %p3341_p11 }
 0x19e   : > { %3351 = shalt.err (!%p3348_p0)
}
 0x19f   : > { %p4452_p13 = scmp.ne.s32.totalorder %s4434_s2, 0  ;;  %s4453_s1 = sshll.u32 %s3926_s21, 4  ;;  %s4065_s1 = int_to_ptr.vmem [resolvable:$true] %s4453_s1 }
 0x1a0   : > { %s4454_s28 = sshll.u32 %s3860_s4, 3  ;;  %s3352_s14 = scalar_lea.hbm %s4039_s5, 128 }
 0x1a1   : > { %2823 = dma.hbm_to_vmem [thread:$0]  (!%p4452_p13), %s4030_s20, 128, %s4034_s16, %s569_s26  }
 0x1a2   : > { %s612_s15 = scalar_lea.vmem [#allocation10], %s4454_s28  ;;  %p3353_p1 = scmp.ne.s32.totalorder %s4039_s5, %s3352_s14 }
 0x1a3   : > { %s620_s12 = sshll.u32 %s612_s15, 4  ;;  %s3357_s30 = scalar_lea.hbm %s4450_s6, 256  ;;  %s621_s12 = int_to_ptr.vmem [resolvable:$true] %s620_s12 }
 0x1a4   : > { %p3355_p5 = pnand %p3353_p1, %p4451_p6  ;;  %p3358_p2 = scmp.lt.u32.totalorder %s4039_s5, %s4450_s6 }
 0x1a5   : > { %p3359_p7 = scmp.lt.u32.totalorder %s3357_s30, %s3352_s14  ;;  %p3361_p3 = scmp.lt.u32.totalorder %s3352_s14, %s4039_s5 }
 0x1a6   : > { %p3356_p10 = pneg %p3355_p5 }
 0x1a7   : > { %p3360_p9 = por %p3359_p7, %p3358_p2 }
 0x1a9   : > { %p3362_p11 = por %p3361_p3, %p3360_p9 }
 0x1ab   : > { %p3363_p12 = pnand %p3362_p11, %p3356_p10 }
 0x1ad   : > { %3366 = shalt.err (!%p3363_p12)
}
 0x1ae   : > { %s3367_s4 = scalar_lea.vmem %s621_s12, 128  ;;  %s3543_s21 = smov [#allocation10]  }
 0x1af   : > { %p3368_p8 = scmp.ne.s32.totalorder %s621_s12, %s3367_s4  ;;  %s3372_s20 = sshll.u32 %s3543_s21, 4  ;;  %s3373_s20 = int_to_ptr.vmem [resolvable:$false] %s3372_s20 }
 0x1b0   : > { %s3374_s16 = scalar_lea.vmem %s3373_s20, 256  ;;  %p3375_p1 = scmp.lt.s32.totalorder %s621_s12, %s3373_s20 }
 0x1b1   : > { %p3370_p4 = pnand %p3368_p8, %p4451_p6  ;;  %p3376_p5 = scmp.lt.s32.totalorder %s3374_s16, %s3367_s4 }
 0x1b3   : > { %p3371_p0 = pneg %p3370_p4  ;;  %p3377_p13 = por %p3376_p5, %p3375_p1 }
 0x1b5   : > { %p3378_p2 = pnand %p3377_p13, %p3371_p0 }
 0x1b7   : > { %3381 = shalt.err (!%p3378_p2)
}
 0x1b8   : > { %p4455_p7 = scmp.ne.s32.totalorder %s4434_s2, 0  ;;  %s4456_s26 = sand.u32 1, %s3526_s23  }
 0x1b9   : > { %s4089_s28 = scalar_lea.sflag [#allocation12], %s4456_s26  ;;  %s3382_s15 = scalar_lea.hbm %s3922_s7, 256 }
 0x1ba   : > { %2829 = dma.hbm_to_vmem [thread:$0]  (!%p4455_p7), %s4039_s5, 128, %s621_s12, %s3884_s9  }
 0x1bb   : > { %p3383_p10 = scmp.ne.s32.totalorder %s3922_s7, %s3382_s15  ;;  %s3387_s0 = scalar_lea.hbm %s4350_s3, 512 }
 0x1bc   : > { %p3388_p3 = scmp.lt.u32.totalorder %s3922_s7, %s4350_s3  ;;  %p3389_p11 = scmp.lt.u32.totalorder %s3387_s0, %s3382_s15 }
 0x1bd   : > { %p3385_p9 = pnand %p3383_p10, %p4451_p6  ;;  %p3391_p8 = scmp.lt.u32.totalorder %s3382_s15, %s3922_s7 }
 0x1be   : > { %p3390_p12 = por %p3389_p11, %p3388_p3 }
 0x1bf   : > { %p3386_p13 = pneg %p3385_p9 }
 0x1c0   : > { %p3392_p4 = por %p3391_p8, %p3390_p12 }
 0x1c2   : > { %p3393_p0 = pnand %p3392_p4, %p3386_p13 }
 0x1c4   : > { %3396 = shalt.err (!%p3393_p0)
}
 0x1c5   : > { %s3397_s9 = scalar_lea.vmem %s4065_s1, 256  ;;  %s3544_s5 = smov [#allocation11]  }
 0x1c6   : > { %p3398_p1 = scmp.ne.s32.totalorder %s4065_s1, %s3397_s9  ;;  %s3402_s12 = sshll.u32 %s3544_s5, 4  ;;  %s3403_s12 = int_to_ptr.vmem [resolvable:$false] %s3402_s12 }
 0x1c7   : > { %s3404_s8 = scalar_lea.vmem %s3403_s12, 512  ;;  %p3405_p10 = scmp.lt.s32.totalorder %s4065_s1, %s3403_s12 }
 0x1c8   : > { %p3400_p5 = pnand %p3398_p1, %p4451_p6  ;;  %p3406_p9 = scmp.lt.s32.totalorder %s3404_s8, %s3397_s9 }
 0x1ca   : > { %p3401_p2 = pneg %p3400_p5  ;;  %p3407_p3 = por %p3406_p9, %p3405_p10 }
 0x1cc   : > { %p3408_p11 = pnand %p3407_p3, %p3401_p2 }
 0x1ce   : > { %3411 = shalt.err (!%p3408_p11)
}
 0x1cf   : > { %2832 = dma.hbm_to_vmem [thread:$0]  (!%p4455_p7), %s3922_s7, 256, %s4065_s1, %s4089_s28, %s4439_s29, %s4439_s29, %s4438_s11  }
 0x1d0   : > { %s4457_s13 = sld [smem:[#allocation44_spill]] }
 0x1d6   : > { %p4458_p6 = scmp.ne.s32.totalorder %s4457_s13, 0 }
 0x1d7   : > { %s4119_s4 = sand.u32 (!%p4458_p6), 1, %s3510_s19   ;;  %p4459_p13 = scmp.ne.s32.totalorder (!%p4458_p6), %s4428_s25, 0 }
 0x1d8   : > { %650 = sbr.rel (%p4458_p6) target bundleno = 2687 (0xa7f), region = 80  ;;  %s4122_s21 = sshll.u32 (!%p4458_p6), %s4119_s4, 3 }
 0x1d9   : > { %s653_s2 = scalar_lea.sflag (!%p4458_p6), [#allocation6], %s4119_s4  ;;  %s656_s20 = scalar_lea.vmem (!%p4458_p6), [#allocation5], %s4122_s21 }
 0x1df   : > { %3465 = dma.done.wait (%p4459_p13), %s653_s2, 128  }
 0x1e0   : > { %3467 = vsyncadd (%p4459_p13), %s653_s2, 4294967168  ;;  %s4460_s11 = sld [smem:[#allocation43_spill]]  ;;  %s2464_s7 = sshll.u32 %s4119_s4, 4 }
 0x1e1   : > { %s665_s16 = scalar_lea.vmem [#allocation8], %s2464_s7 }
 0x1e6   : > { %s661_s29 = sand.u32 1, %s4460_s11  }
 0x1e7   : > { %s662_s1 = scalar_lea.sflag [#allocation9], %s661_s29 }
 0x1e8   : > { %3469 = dma.done.wait (%p4459_p13), %s662_s1, 384  }
 0x1e9   : > { %3471 = vsyncadd (%p4459_p13), %s662_s1, 4294966912  ;;  %s674_s26 = scalar_lea.vmem [#allocation10], %s4122_s21  ;;  %s680_s28 = scalar_lea.sflag [#allocation12], %s661_s29 }
 0x1ea   : > { %s683_s15 = scalar_lea.vmem [#allocation11], %s2464_s7 }
 0x1eb   : > { %3473 = dma.done.wait (%p4459_p13), %s680_s28, 256  }
 0x1ec   : > { %3475 = vsyncadd (%p4459_p13), %s680_s28, 4294967040  ;;  %p4461_p7 = scmp.eq.s32.totalorder %s4460_s11, 0 }
 0x1ee   : > { %3477 = dma.done.wait (%p4461_p7), [#allocation12], 16   ;;  %p4462_p12 = pmov %p4461_p7 }
 0x1ef   : > { %p4463_p8 = pmov %p4461_p7 }
 0x1f0   : > { %3479 = vsyncadd (%p4462_p12), [#allocation12], 4294967280 }
 0x1f1   : > { %3481 = dma.done.wait (%p4463_p8), [#allocation15], 32   ;;  %p4464_p4 = pmov %p4461_p7 }
 0x1f3   : > { %3483 = vsyncadd (%p4464_p4), [#allocation15], 4294967264  ;;  %p4465_p0 = pmov %p4464_p4 }
 0x1f5   : > { %3485 = dma.done.wait (%p4465_p0), [#allocation18], 32   ;;  %p4466_p1 = pmov %p4465_p0 }
 0x1f6   : > { %p4467_p5 = pmov %p4465_p0 }
 0x1f7   : > { %3487 = vsyncadd (%p4466_p1), [#allocation18], 4294967264 }
 0x1f8   : > { %3489 = dma.done.wait (%p4467_p5), [#allocation21], 528   ;;  %p4468_p2 = pmov %p4465_p0 }
 0x1f9   : > { %p4469_p10 = pmov %p4465_p0 }
 0x1fa   : > { %3491 = vsyncadd (%p4468_p2), [#allocation21], 4294966768 }
 0x1fb   : > { %3493 = dma.done.wait (%p4469_p10), [#allocation24], 1024   ;;  %p4470_p9 = pmov %p4465_p0 }
 0x1fc   : > { %p4471_p3 = pmov %p4465_p0 }
 0x1fd   : > { %3495 = vsyncadd (%p4470_p9), [#allocation24], 4294966272 }
 0x1fe   : > { %3497 = dma.done.wait (%p4471_p3), [#allocation27], 528   ;;  %p4472_p11 = pmov %p4465_p0 }
 0x1ff   : > { %v4165_v0 = vld [vmem:[%s665_s16] sm:$0xff]  ;;  %v795_v1 = vld [vmem:[%s683_s15] sm:$0xff]  ;;  %vm799_vm0 = vcmask 261120   ;;  %v794_v5 = vld [vmem:[%s665_s16 + $0x8] sm:$0xff]  ;;  %v3545_v35 = vmov 0.0|0.0   ;;  %vm3546_vm1 = vmmov 0  }
 0x200   : > { %3499 = vsyncadd (%p4472_p11), [#allocation27], 4294966768  ;;  %v1063_v2 = vld [vmem:[%s656_s20] sm:$0xff]  ;;  %v797_v3 = vadd.f32 %v795_v1, %v4165_v0  ;;  %v1064_v4 = vld [vmem:[%s674_s26] sm:$0xff]  ;;  %v848_v27 = vsel %vm799_vm0, %v794_v5, 0.0  ;;  %v845_v28 = vsel %vm799_vm0, %v4165_v0, 0.0 }
 0x201   : > { %v796_v6 = vld [vmem:[%s683_s15 + $0x8] sm:$0xff]  ;;  %v1065_v7 = vadd.f32 %v1064_v4, %v1063_v2  ;;  %v2479_v56 = vld [vmem:[#allocation16] ss:$0 sm:$0xff]  ;;  %v2480_v58 = vld [vmem:[#allocation17] ss:$0 sm:$0xff]  ;;  %vm1187_vm2 = vcmask 64512  }
 0x202   : > { %v798_v8 = vadd.f32 %v796_v6, %v794_v5  ;;  %v800_v9 = vsel %vm799_vm0, %v797_v3, 0.0  ;;  %v889_v29 = vld [vmem:[#allocation23] sm:$0xff]  ;;  %v890_v30 = vld [vmem:[#allocation23 + $0x8] sm:$0xff]  ;;  %v891_v32 = vld [vmem:[#allocation23 + $0x10] sm:$0xff]  ;;  %s3548_s25 = smov 120   ;;  %s3549_s14 = smov 112  }
 0x203   : > { %801 = vadd.xlane.f32.xlu0 %v800_v9  ;;  %v1067_v10 = vsel %vm799_vm0, %v1065_v7, 0.0  ;;  %v2675_v31 = vpack.c.bf16 %v890_v30, %v889_v29  ;;  %v892_v33 = vld [vmem:[#allocation23 + $0x18] sm:$0xff]  ;;  %v1097_v63 = vld [vmem:[#allocation22] sm:$0xff]  ;;  %v1099_v6 = vld [vmem:[#allocation22 + $0x10] sm:$0xff]  ;;  %vm1267_vm4 = vcmask 130048   ;;  %s3550_s18 = smov 104  }
 0x204   : > { %1068 = vadd.xlane.f32.xlu1 %v1067_v10  ;;  %v803_v11 = vsel %vm799_vm0, %v798_v8, 0.0  ;;  %v2679_v34 = vpack.c.bf16 %v892_v33, %v891_v32  ;;  %v3547_v10 = vmov 0.0   ;;  %vm4215_vm3 = vmpackc.low %vm1187_vm2, %vm1187_vm2  ;;  %s4475_s0 = sld [smem:[#allocation42_spill]]  ;;  %s4476_s30 = sld [smem:[#allocation46_spill]] }
 0x205   : > { %2676 = vmatprep.subr.bf16.mxu0 %v2675_v31  ;;  %s788_s9 = scalar_lea.vmem [#allocation29], %s4122_s21  ;;  %s4477_s13 = sld [smem:[#allocation62_spill]] }
 0x206   : > { %2678 = vmatpush3.bf16.msra.mxu0 %v2675_v31  ;;  %v2482_v31 = vld [vmem:[#allocation20] ss:$0 sm:$0xff]  ;;  %s2186_s5 = sshll.u32 %s788_s9, 4  ;;  %s2172_s20 = scalar_lea.sflag [#allocation7], %s4119_s4  ;;  %s4300_s5 = int_to_ptr.vmem [resolvable:$true] %s2186_s5 }
 0x207   : > { %804 = vadd.xlane.f32.xlu0 %v803_v11  ;;  %2680 = vmatprep.subr.bf16.mxu0 %v2679_v34  ;;  %s3412_s11 = scalar_lea.vmem %s4300_s5, 128  ;;  %s3551_s21 = smov [#allocation29]  }
 0x208   : > { %p3413_p6 = scmp.ne.s32.totalorder %s4300_s5, %s3412_s11  ;;  %s3416_s29 = sshll.u32 %s3551_s21, 4  ;;  %s3417_s29 = int_to_ptr.vmem [resolvable:$false] %s3416_s29 }
 0x209   : > { %s3418_s7 = scalar_lea.vmem %s3417_s29, 256  ;;  %p3419_p8 = scmp.lt.s32.totalorder %s4300_s5, %s3417_s29 }
 0x20a   : > { %2682 = vmatpush3.bf16.msra.mxu0 %v2679_v34  ;;  %s2512_s17 = sshll.u32 %s4475_s0, 7  ;;  %p4478_p13 = scmp.ne.s32.totalorder %s4476_s30, 0 }
 0x20b   : > { %2691 = vmatprep.subr.bf16.mxu0 %v3545_v35  ;;  %s4298_s2 = scalar_lea.hbm %s4477_s13, %s2512_s17  ;;  %p3420_p4 = scmp.lt.s32.totalorder %s3418_s7, %s3412_s11 }
 0x20c   : > { %p3414_p7 = pnand %p3413_p6, %p4478_p13 }
 0x20d   : > { %p3421_p0 = por %p3420_p4, %p3419_p8 }
 0x20e   : > { %p3415_p12 = pneg %p3414_p7 }
 0x210   : > { %p3422_p1 = pnand %p3421_p0, %p3415_p12 }
 0x290   : > { %v802_v12 = vpop.xlane.xlu0 %801 }
 0x291   : > { %v807_v13 = vmul.f32 0.03125, %v802_v12  ;;  %v1069_v14 = vpop.xlane.xlu1 %1068  ;;  %v2488_v12 = vld [vmem:[#allocation14] ss:$0 sm:$0xff] }
 0x292   : > { %v1071_v15 = vmul.f32 0.03125, %v1069_v14  ;;  %v976_v14 = vld [vmem:[#allocation25] sm:$0xff] }
 0x293   : > { %v809_v16 = vsub.f32 %v797_v3, %v807_v13 }
 0x294   : > { %v4171_v17 = vsub.f32 %v1065_v7, %v1071_v15  ;;  %v805_v18 = vpop.xlane.xlu0 %804  ;;  %v1100_v7 = vld [vmem:[#allocation22 + $0x18] sm:$0xff]  ;;  %v977_v15 = vld [vmem:[#allocation25 + $0x8] sm:$0xff] }
 0x295   : > { %v808_v19 = vmul.f32 0.03125, %v805_v18  ;;  %v811_v20 = vmul.f32 %v809_v16, %v809_v16  ;;  %v2695_v9 = vpack.c.bf16 %v1100_v7, %v1099_v6  ;;  %v979_v18 = vld [vmem:[#allocation25 + $0x18] sm:$0xff]  ;;  %v1352_v7 = vld [vmem:[#allocation26] sm:$0xff] }
 0x296   : > { %v1073_v21 = vmul.f32 %v4171_v17, %v4171_v17 }
 0x297   : > { %v810_v22 = vsub.f32 %v798_v8, %v808_v19  ;;  %v813_v23 = vsel %vm799_vm0, %v811_v20, 0.0  ;;  %v2487_v8 = vld [vmem:[#allocation13] ss:$0 sm:$0xff] }
 0x298   : > { %814 = vadd.xlane.f32.xlu1 %v813_v23  ;;  %v1074_v24 = vsel %vm799_vm0, %v1073_v21, 0.0 }
 0x299   : > { %v812_v25 = vmul.f32 %v810_v22, %v810_v22 }
 0x29b   : > { %v816_v26 = vsel %vm799_vm0, %v812_v25, 0.0 }
 0x29c   : > { %1075 = vadd.xlane.f32.xlu1 %v1074_v24  ;;  %817 = vadd.xlane.f32.xlu0 %v816_v26 }
 0x2a0   : > { %849 = vadd.xlane.f32.xlu1 %v848_v27  ;;  %846 = vadd.xlane.f32.xlu0 %v845_v28  ;;  %v2481_v27 = vld [vmem:[#allocation19] ss:$0 sm:$0xff] }
 0x325   : > { %v815_v36 = vpop.xlane.xlu1 %814 }
 0x326   : > { %v819_v37 = vmul.f32 0.03125, %v815_v36 }
 0x328   : > { %v821_v38 = vadd.f32 1e-05, %v819_v37 }
 0x329   : > { %v1076_v39 = vpop.xlane.xlu1 %1075  ;;  %v818_v40 = vpop.xlane.xlu0 %817 }
 0x32a   : > { %2958 = vrsqrt.f32 %v821_v38  ;;  %v1077_v41 = vmul.f32 0.03125, %v1076_v39  ;;  %v820_v42 = vmul.f32 0.03125, %v818_v40 }
 0x32c   : > { %v822_v43 = vadd.f32 1e-05, %v820_v42  ;;  %v1078_v44 = vadd.f32 1e-05, %v1077_v41 }
 0x32d   : > { %v850_v45 = vpop.xlane.xlu1 %849  ;;  %v847_v46 = vpop.xlane.xlu0 %846 }
 0x32e   : > { %v852_v47 = vmul.f32 0.03125, %v850_v45  ;;  %v851_v48 = vmul.f32 0.03125, %v847_v46  ;;  %2960 = vrsqrt.f32 %v822_v43  ;;  %v1601_v43 = vld [vmem:[#allocation26 + $0x8] sm:$0xff] }
 0x32f   : > { %2962 = vrsqrt.f32 %v1078_v44 }
 0x330   : > { %v4182_v49 = vsub.f32 %v794_v5, %v852_v47  ;;  %v4185_v50 = vsub.f32 %v4165_v0, %v851_v48  ;;  %v1098_v0 = vld [vmem:[#allocation22 + $0x8] sm:$0xff] }
 0x331   : > { %v2692_v3 = vpack.c.bf16 %v1098_v0, %v1097_v63 }
 0x332   : > { %v856_v51 = vmul.f32 %v4182_v49, %v4182_v49  ;;  %v855_v52 = vmul.f32 %v4185_v50, %v4185_v50 }
 0x334   : > { %v2959_v53 = vpop.eup %2958  ;;  %v860_v54 = vsel %vm799_vm0, %v856_v51, 0.0  ;;  %v857_v55 = vsel %vm799_vm0, %v855_v52, 0.0 }
 0x335   : > { %861 = vadd.xlane.f32.xlu1 %v860_v54  ;;  %858 = vadd.xlane.f32.xlu0 %v857_v55  ;;  %v825_v57 = vmul.f32 %v2959_v53, %v809_v16  ;;  %v978_v16 = vld [vmem:[#allocation25 + $0x10] sm:$0xff] }
 0x336   : > { %v2687_v19 = vpack.c.bf16 %v979_v18, %v978_v16 }
 0x337   : > { %v834_v59 = vmul.f32 %v2479_v56, %v825_v57 }
 0x338   : > { %v2961_v60 = vpop.eup %2960 }
 0x339   : > { %v843_v61 = vadd.f32 %v2480_v58, %v834_v59  ;;  %v826_v62 = vmul.f32 %v2961_v60, %v810_v22  ;;  %v2963_v1 = vpop.eup %2962 }
 0x33a   : > { %v1080_v4 = vmul.f32 %v2963_v1, %v4171_v17  ;;  %v2683_v17 = vpack.c.bf16 %v977_v15, %v976_v14 }
 0x33b   : > { %2574 = vmatprep.mubr.msk.f32.mxu0 %vm799_vm0, %v843_v61  ;;  %v835_v2 = vmul.f32 %v2479_v56, %v826_v62 }
 0x33c   : > { %v1088_v11 = vmul.f32 %v2487_v8, %v1080_v4  ;;  %2684 = vmatprep.subr.bf16.mxu1 %v2683_v17 }
 0x33d   : > { %v844_v5 = vadd.f32 %v2480_v58, %v835_v2  ;;  %2686 = vmatpush3.bf16.msra.mxu1 %v2683_v17 }
 0x33e   : > { %v1096_v13 = vadd.f32 %v2488_v12, %v1088_v11  ;;  %2688 = vmatprep.subr.bf16.mxu1 %v2687_v19 }
 0x33f   : > { %2575 = vmatmul.mubr.msk.f32.vlgmr.msra.gmra.mrb[0].mxu0 %vm799_vm0, %v844_v5 }
 0x340   : > { %2693 = vmatpush3.bf16.msra.mxu0 %v2692_v3  ;;  %2596 = vmatprep.mubr.msk.f32.mxu0 %vm3546_vm1, %v3547_v10 }
 0x341   : > { %2694 = vmatprep.subr.bf16.mxu0 %v3545_v35  ;;  %2690 = vmatpush3.bf16.msra.mxu1 %v2687_v19 }
 0x342   : > { %2697 = vmatprep.subr.bf16.mxu1 %v3545_v35 }
 0x344   : > { %2696 = vmatpush3.bf16.msra.mxu0 %v2695_v9 }
 0x345   : > { %2701 = vmatprep.subr.bf16.mxu0 %v3545_v35 }
 0x347   : > { %2597 = vmatmul.mubr.msk.f32.vlgmr.msra.gmra.mrb[2].mxu0 %vm799_vm0, %v1096_v13 }
 0x348   : > { %2610 = vmatprep.mubr.msk.f32.mxu0 %vm3546_vm1, %v3547_v10 }
 0x3c2   : > { %v862_v20 = vpop.xlane.xlu1 %861  ;;  %v859_v21 = vpop.xlane.xlu0 %858 }
 0x3c3   : > { %v864_v22 = vmul.f32 0.03125, %v862_v20  ;;  %v863_v23 = vmul.f32 0.03125, %v859_v21 }
 0x3c5   : > { %v866_v24 = vadd.f32 1e-05, %v864_v22  ;;  %v865_v25 = vadd.f32 1e-05, %v863_v23 }
 0x3c7   : > { %2964 = vrsqrt.f32 %v866_v24 }
 0x3c8   : > { %2966 = vrsqrt.f32 %v865_v25 }
 0x3d1   : > { %v2965_v26 = vpop.eup %2964 }
 0x3d2   : > { %v2967_v28 = vpop.eup %2966  ;;  %v870_v29 = vmul.f32 %v2965_v26, %v4182_v49 }
 0x3d3   : > { %v869_v30 = vmul.f32 %v2967_v28, %v4185_v50 }
 0x3d4   : > { %v879_v32 = vmul.f32 %v2481_v27, %v870_v29 }
 0x3d5   : > { %v878_v33 = vmul.f32 %v2481_v27, %v869_v30 }
 0x3d6   : > { %v888_v34 = vadd.f32 %v2482_v31, %v879_v32 }
 0x3d7   : > { %v887_v36 = vadd.f32 %v2482_v31, %v878_v33 }
 0x3d9   : > { %2585 = vmatprep.mubr.msk.f32.mxu1 %vm799_vm0, %v887_v36 }
 0x3da   : > { %2586 = vmatmul.mubr.msk.f32.vlgmr.msra.gmra.mrb[0].mxu1 %vm799_vm0, %v888_v34 }
 0x3db   : > { %2603 = vmatprep.mubr.msk.f32.mxu1 %vm3546_vm1, %v3547_v10 }
 0x412   : > { %v2576_v37 = vpop.f32.mrb[0].mxu0 }
 0x413   : > { %975 = vst.msk [vmem:[#allocation3 + $0x8] sm:$0xff] %vm799_vm0, %v2576_v37  ;;  %v965_v38 = vpop.f32.mrb[1].mxu0 }
 0x414   : > { %974 = vst.msk [vmem:[#allocation3] sm:$0xff] %vm799_vm0, %v965_v38 }
 0x41a   : > { %v1170_v39 = vpop.f32.mrb[2].mxu0  ;;  %v1184_v40 = vld [vmem:[#allocation3 + $0x8] sm:$0xff] }
 0x41b   : > { %1174 = vst.msk [vmem:[#allocation2] sm:$0xff] %vm799_vm0, %v1170_v39  ;;  %v2598_v41 = vpop.f32.mrb[3].mxu0  ;;  %v1183_v42 = vld [vmem:[#allocation3] sm:$0xff] }
 0x41c   : > { %v2928_v44 = vpack.i.bf16 %v1184_v40, %v1183_v42  ;;  %v2698_v45 = vpack.c.bf16 %v1184_v40, %v1183_v42 }
 0x41e   : > { %2929 = vrot.lane.b32.xlu1 %v2928_v44, %s3548_s25  ;;  %2700 = vmatpush3.bf16.xpose.msk.msra.mxu1 %vm4215_vm3, %v2698_v45 }
 0x41f   : > { %2613 = vmatprep.subr.mxu1 %v3547_v10 }
 0x422   : > { %2934 = vrot.lane.b32.xlu1 %v2928_v44, %s3549_s14  ;;  %v1182_v46 = vld [vmem:[#allocation2] sm:$0xff] }
 0x425   : > { %2604 = vmatmul.mubr.msk.f32.vlgmr.msra.gmra.mrb[2].mxu1 %vm1187_vm2, %v1182_v46 }
 0x426   : > { %1676 = vrot.lane.b32.xlu1 %v1182_v46, %s3549_s14  ;;  %2615 = vmatprep.mubr.msk.f32.mxu1 %vm3546_vm1, %v3547_v10 }
 0x427   : > { %2614 = vmatpush3.msra.mxu1 %v1352_v7 }
 0x428   : > { %2708 = vmatprep.subr.bf16.mxu1 %v3545_v35 }
 0x490   : > { %v2930_v59 = vpop.permute.xlu1 %2929 }
 0x491   : > { %v2932_v60 = vunpack.i.h.bf16 %v2930_v59  ;;  %v2931_v61 = vunpack.i.l.bf16 %v2930_v59 }
 0x493   : > { %v2705_v63 = vpack.c.bf16 %v2932_v60, %v2931_v61 }
 0x494   : > { %v2935_v0 = vpop.permute.xlu1 %2934 }
 0x495   : > { %v2937_v2 = vunpack.i.h.bf16 %v2935_v0  ;;  %v2936_v3 = vunpack.i.l.bf16 %v2935_v0 }
 0x497   : > { %v2712_v4 = vpack.c.bf16 %v2937_v2, %v2936_v3 }
 0x498   : > { %v1677_v6 = vpop.permute.xlu1 %1676 }
 0x4ad   : > { %v2587_v47 = vpop.f32.mrb[0].mxu1 }
 0x4ae   : > { %1062 = vst.msk [vmem:[#allocation4 + $0x8] sm:$0xff] %vm799_vm0, %v2587_v47  ;;  %v1052_v48 = vpop.f32.mrb[1].mxu1 }
 0x4af   : > { %1061 = vst.msk [vmem:[#allocation4] sm:$0xff] %vm799_vm0, %v1052_v48 }
 0x4b5   : > { %v1186_v49 = vld [vmem:[#allocation4 + $0x8] sm:$0xff] }
 0x4b6   : > { %v1185_v50 = vld [vmem:[#allocation4] sm:$0xff] }
 0x4b7   : > { %v2702_v51 = vpack.c.bf16 %v1186_v49, %v1185_v50  ;;  %v4230_v52 = vpack.i.bf16 %v1186_v49, %v1185_v50 }
 0x4b9   : > { %2703 = vmatpush3.bf16.msra.mxu0 %v2702_v51 }
 0x4ba   : > { %2704 = vmatprep.subr.bf16.mxu0 %v3545_v35 }
 0x4f8   : > { %v1263_v53 = vpop.f32.mrb[2].mxu1 }
 0x4f9   : > { %v2605_v54 = vpop.f32.mrb[3].mxu1  ;;  %v1268_v55 = vsel %vm1267_vm4, %v1263_v53, -inf }
 0x4fa   : > { %1269 = vmax.xlane.f32.xlu0 %v1268_v55 }
 0x510   : > { %1427 = vrot.lane.b32.xlu0 %v1182_v46, %s3548_s25 }
 0x587   : > { %v1270_v56 = vpop.xlane.xlu0 %1269 }
 0x588   : > { %v1271_v57 = vsub.f32 %v1263_v53, %v1270_v56 }
 0x58a   : > { %v1272_v58 = vmul.f32 1.442695, %v1271_v57 }
 0x58b   : > { %v1428_v5 = vpop.permute.xlu0 %1427 }
 0x58c   : > { %2968 = vpow2.f32 %v1272_v58  ;;  %v1848_v58 = vld [vmem:[#allocation26 + $0x10] sm:$0xff] }
 0x596   : > { %v2969_v62 = vpop.eup %2968 }
 0x597   : > { %2611 = vmatmul.mubr.msk.f32.vlgmr.msra.gmra.mrb[4].mxu0 %vm1267_vm4, %v2969_v62  ;;  %v1274_v1 = vsel %vm1267_vm4, %v2969_v62, 0.0 }
 0x598   : > { %2707 = vmatpush3.bf16.xpose.msk.msra.mxu0 %vm4215_vm3, %v2705_v63  ;;  %1275 = vadd.xlane.f32.xlu1 %v1274_v1 }
 0x599   : > { %2622 = vmatprep.mubr.msk.f32.mxu0 %vm3546_vm1, %v3547_v10  ;;  %2711 = vmatprep.subr.bf16.mxu0 %v3545_v35 }
 0x59f   : > { %2623 = vmatmul.mubr.msk.f32.vlgmr.msra.gmra.mrb[6].mxu0 %vm1187_vm2, %v1428_v5 }
 0x5a0   : > { %2714 = vmatpush3.bf16.xpose.msk.msra.mxu0 %vm4215_vm3, %v2712_v4  ;;  %2641 = vmatprep.mubr.msk.f32.mxu0 %vm3546_vm1, %v3547_v10 }
 0x5a1   : > { %2718 = vmatprep.subr.bf16.mxu0 %v3545_v35 }
 0x5a7   : > { %2642 = vmatmul.mubr.msk.f32.vlgmr.msra.gmra.mrb[8].mxu0 %vm1187_vm2, %v1677_v6 }
 0x5a8   : > { %2660 = vmatprep.mubr.msk.f32.mxu0 %vm3546_vm1, %v3547_v10 }
 0x5a9   : > { %2944 = vrot.lane.b32.xlu1 %v2928_v44, %s3550_s18 }
 0x5ad   : > { %1923 = vrot.lane.b32.xlu1 %v1182_v46, %s3550_s18 }
 0x625   : > { %v1276_v8 = vpop.xlane.xlu1 %1275 }
 0x626   : > { %2970 = vrcp.f32 %v1276_v8 }
 0x629   : > { %v2945_v9 = vpop.permute.xlu1 %2944 }
 0x62a   : > { %v2947_v11 = vunpack.i.h.bf16 %v2945_v9  ;;  %v2946_v12 = vunpack.i.l.bf16 %v2945_v9  ;;  %v2490_v9 = vld [vmem:[#allocation28] ss:$0 sm:$0xff] }
 0x62c   : > { %v2719_v13 = vpack.c.bf16 %v2947_v11, %v2946_v12 }
 0x62d   : > { %v1924_v14 = vpop.permute.xlu1 %1923 }
 0x62e   : > { %2721 = vmatpush3.bf16.xpose.msk.msra.mxu0 %vm4215_vm3, %v2719_v13 }
 0x630   : > { %v2971_v15 = vpop.eup %2970 }
 0x635   : > { %2661 = vmatmul.mubr.msk.f32.vlgmr.msra.gmra.mrb[10].mxu0 %vm1187_vm2, %v1924_v14 }
 0x66a   : > { %v1346_v16 = vpop.f32.mrb[4].mxu0 }
 0x66b   : > { %v1351_v17 = vmul.f32 %v2971_v15, %v1346_v16  ;;  %v2612_v18 = vpop.f32.mrb[5].mxu0 }
 0x66d   : > { %2616 = vmatmul.mubr.msk.f32.vlgmr.msra.gmra.mrb[4].mxu1 %vm1187_vm2, %v1351_v17 }
 0x66e   : > { %2629 = vmatprep.mubr.msk.f32.mxu1 %vm3546_vm1, %v3547_v10 }
 0x672   : > { %v1505_v19 = vpop.f32.mrb[6].mxu0 }
 0x673   : > { %v2624_v20 = vpop.f32.mrb[7].mxu0  ;;  %v1509_v21 = vsel %vm1267_vm4, %v1505_v19, -inf }
 0x674   : > { %1510 = vmax.xlane.f32.xlu0 %v1509_v21 }
 0x67a   : > { %v1754_v22 = vpop.f32.mrb[8].mxu0 }
 0x67b   : > { %v2643_v23 = vpop.f32.mrb[9].mxu0  ;;  %v1758_v24 = vsel %vm1267_vm4, %v1754_v22, -inf }
 0x67c   : > { %1759 = vmax.xlane.f32.xlu1 %v1758_v24 }
 0x68a   : > { %2939 = vrot.lane.b32.xlu0 %v4230_v52, %s3548_s25 }
 0x701   : > { %v1511_v25 = vpop.xlane.xlu0 %1510 }
 0x702   : > { %v1512_v26 = vsub.f32 %v1505_v19, %v1511_v25 }
 0x704   : > { %v1513_v27 = vmul.f32 1.442695, %v1512_v26 }
 0x705   : > { %v2940_v28 = vpop.permute.xlu0 %2939 }
 0x706   : > { %2972 = vpow2.f32 %v1513_v27  ;;  %v2942_v29 = vunpack.i.h.bf16 %v2940_v28  ;;  %v2941_v30 = vunpack.i.l.bf16 %v2940_v28 }
 0x708   : > { %v2709_v31 = vpack.c.bf16 %v2942_v29, %v2941_v30  ;;  %v2001_v32 = vpop.f32.mrb[10].mxu0 }
 0x709   : > { %v1760_v33 = vpop.xlane.xlu1 %1759  ;;  %v2662_v34 = vpop.f32.mrb[11].mxu0  ;;  %v2005_v36 = vsel %vm1267_vm4, %v2001_v32, -inf }
 0x70a   : > { %v1761_v37 = vsub.f32 %v1754_v22, %v1760_v33  ;;  %2710 = vmatpush3.bf16.msra.mxu1 %v2709_v31  ;;  %2006 = vmax.xlane.f32.xlu1 %v2005_v36 }
 0x70b   : > { %2632 = vmatprep.subr.mxu1 %v3547_v10 }
 0x70c   : > { %v1762_v38 = vmul.f32 1.442695, %v1761_v37 }
 0x70e   : > { %2974 = vpow2.f32 %v1762_v38 }
 0x710   : > { %v2973_v39 = vpop.eup %2972 }
 0x711   : > { %2630 = vmatmul.mubr.msk.f32.vlgmr.msra.gmra.mrb[6].mxu1 %vm1267_vm4, %v2973_v39  ;;  %v1515_v40 = vsel %vm1267_vm4, %v2973_v39, 0.0 }
 0x712   : > { %1516 = vadd.xlane.f32.xlu0 %v1515_v40  ;;  %2634 = vmatprep.mubr.msk.f32.mxu1 %vm3546_vm1, %v3547_v10 }
 0x713   : > { %2633 = vmatpush3.msra.mxu1 %v1601_v43 }
 0x714   : > { %2715 = vmatprep.subr.bf16.mxu1 %v3545_v35 }
 0x718   : > { %v2975_v41 = vpop.eup %2974 }
 0x719   : > { %v1764_v42 = vsel %vm1267_vm4, %v2975_v41, 0.0 }
 0x71a   : > { %1765 = vadd.xlane.f32.xlu1 %v1764_v42 }
 0x728   : > { %2949 = vrot.lane.b32.xlu0 %v4230_v52, %s3549_s14 }
 0x72b   : > { %2954 = vrot.lane.b32.xlu1 %v4230_v52, %s3550_s18 }
 0x797   : > { %v2007_v44 = vpop.xlane.xlu1 %2006 }
 0x798   : > { %v2008_v45 = vsub.f32 %v2001_v32, %v2007_v44 }
 0x79a   : > { %v2009_v46 = vmul.f32 1.442695, %v2008_v45 }
 0x79c   : > { %2976 = vpow2.f32 %v2009_v46 }
 0x79f   : > { %v1517_v49 = vpop.xlane.xlu0 %1516 }
 0x7a0   : > { %2978 = vrcp.f32 %v1517_v49 }
 0x7a3   : > { %v2950_v50 = vpop.permute.xlu0 %2949 }
 0x7a4   : > { %v2952_v51 = vunpack.i.h.bf16 %v2950_v50  ;;  %v2951_v53 = vunpack.i.l.bf16 %v2950_v50 }
 0x7a6   : > { %v2977_v47 = vpop.eup %2976  ;;  %v2716_v57 = vpack.c.bf16 %v2952_v51, %v2951_v53 }
 0x7a7   : > { %v2011_v48 = vsel %vm1267_vm4, %v2977_v47, 0.0  ;;  %v1766_v59 = vpop.xlane.xlu1 %1765 }
 0x7a8   : > { %2012 = vadd.xlane.f32.xlu0 %v2011_v48  ;;  %2980 = vrcp.f32 %v1766_v59 }
 0x7aa   : > { %v2979_v54 = vpop.eup %2978 }
 0x7ab   : > { %v2955_v60 = vpop.permute.xlu1 %2954 }
 0x7ac   : > { %v2957_v61 = vunpack.i.h.bf16 %v2955_v60  ;;  %v2956_v62 = vunpack.i.l.bf16 %v2955_v60 }
 0x7ae   : > { %v2723_v3 = vpack.c.bf16 %v2957_v61, %v2956_v62 }
 0x7b2   : > { %v2981_v63 = vpop.eup %2980 }
 0x7e4   : > { %v1595_v55 = vpop.f32.mrb[6].mxu1 }
 0x7e5   : > { %v1600_v52 = vmul.f32 %v2979_v54, %v1595_v55  ;;  %v2631_v56 = vpop.f32.mrb[7].mxu1 }
 0x7e7   : > { %2635 = vmatmul.mubr.msk.f32.vlgmr.msra.gmra.mrb[4].mxu1 %vm1187_vm2, %v1600_v52 }
 0x7e8   : > { %2717 = vmatpush3.bf16.msra.mxu1 %v2716_v57  ;;  %2648 = vmatprep.mubr.msk.f32.mxu1 %vm3546_vm1, %v3547_v10 }
 0x7e9   : > { %2651 = vmatprep.subr.mxu1 %v3547_v10 }
 0x7eb   : > { %2649 = vmatmul.mubr.msk.f32.vlgmr.msra.gmra.mrb[8].mxu1 %vm1267_vm4, %v2975_v41 }
 0x7ec   : > { %2652 = vmatpush3.msra.mxu1 %v1848_v58  ;;  %2653 = vmatprep.mubr.msk.f32.mxu1 %vm3546_vm1, %v3547_v10 }
 0x7ed   : > { %2722 = vmatprep.subr.bf16.mxu1 %v3545_v35  ;;  %v2095_v35 = vld [vmem:[#allocation26 + $0x18] sm:$0xff] }
 0x835   : > { %v2013_v4 = vpop.xlane.xlu0 %2012 }
 0x836   : > { %2982 = vrcp.f32 %v2013_v4 }
 0x840   : > { %v2983_v5 = vpop.eup %2982 }
 0x8be   : > { %v1842_v0 = vpop.f32.mrb[8].mxu1 }
 0x8bf   : > { %v1847_v1 = vmul.f32 %v2981_v63, %v1842_v0  ;;  %v2650_v2 = vpop.f32.mrb[9].mxu1 }
 0x8c1   : > { %2654 = vmatmul.mubr.msk.f32.vlgmr.msra.gmra.mrb[4].mxu1 %vm1187_vm2, %v1847_v1 }
 0x8c2   : > { %2724 = vmatpush3.bf16.msra.mxu1 %v2723_v3  ;;  %2667 = vmatprep.mubr.msk.f32.mxu1 %vm3546_vm1, %v3547_v10 }
 0x8c3   : > { %2670 = vmatprep.subr.mxu1 %v3547_v10 }
 0x8c5   : > { %2668 = vmatmul.mubr.msk.f32.vlgmr.msra.gmra.mrb[10].mxu1 %vm1267_vm4, %v2977_v47 }
 0x8c6   : > { %2671 = vmatpush3.msra.mxu1 %v2095_v35  ;;  %2672 = vmatprep.mubr.msk.f32.mxu1 %vm3546_vm1, %v3547_v10 }
 0x998   : > { %v2089_v6 = vpop.f32.mrb[10].mxu1 }
 0x999   : > { %v2094_v7 = vmul.f32 %v2983_v5, %v2089_v6  ;;  %v2669_v8 = vpop.f32.mrb[11].mxu1 }
 0x99b   : > { %2673 = vmatmul.mubr.msk.f32.vlgmr.msra.gmra.mrb[4].mxu1 %vm1187_vm2, %v2094_v7 }
 0xa6e   : > { %v2165_v11 = vpop.f32.mrb[4].mxu1 }
 0xa6f   : > { %v2725_v12 = vadd.f32 %v2490_v9, %v2165_v11  ;;  %v2674_v13 = vpop.f32.mrb[5].mxu1 }
 0xa71   : > { %2170 = vst [vmem:[%s788_s9] sm:$0xff] %v2725_v12 }
 0xa72   : > { %3425 = shalt.err (!%p3422_p1)
}
 0xa73   : > { %s3426_s4 = scalar_lea.hbm %s4298_s2, 128  ;;  %s3430_s26 = scalar_lea.hbm %s4477_s13, 256 }
 0xa74   : > { %p3427_p5 = scmp.ne.s32.totalorder %s4298_s2, %s3426_s4  ;;  %p3431_p9 = scmp.lt.u32.totalorder %s4298_s2, %s4477_s13 }
 0xa75   : > { %p3432_p3 = scmp.lt.u32.totalorder %s3430_s26, %s3426_s4  ;;  %p3434_p6 = scmp.lt.u32.totalorder %s3426_s4, %s4298_s2 }
 0xa76   : > { %p3428_p2 = pnand %p3427_p5, %p4478_p13 }
 0xa77   : > { %p3433_p11 = por %p3432_p3, %p3431_p9 }
 0xa78   : > { %p3429_p10 = pneg %p3428_p2 }
 0xa79   : > { %p3435_p7 = por %p3434_p6, %p3433_p11 }
 0xa7b   : > { %p3436_p12 = pnand %p3435_p7, %p3429_p10 }
 0xa7d   : > { %3439 = shalt.err (!%p3436_p12)
}
 0xa7e   : > { %2784 = dma.vmem_to_hbm [thread:$0]  (%p4478_p13), %s4300_s5, 128, %s4298_s2, %s2172_s20  }
 0xa7f PF: > { %s4479_s25 = sld [smem:[#allocation40_spill]]  ;;  %s4480_s14 = sld [smem:[#allocation48_spill]] }
 0xa80   : > { %p4482_p4 = scmp.ge.s32.totalorder %s3526_s23, 2 }
 0xa85   : > { %s2198_s18 = sand.u32 1, %s4479_s25   ;;  %p4481_p8 = scmp.ne.s32.totalorder %s4480_s14, 0 }
 0xa86   : > { %s2199_s0 = scalar_lea.sflag [#allocation7], %s2198_s18 }
 0xa87   : > { %p2834_p0 = pnand %p4482_p4, %p4481_p8 }
 0xa89   : > { %3501 = dma.done.wait (!%p2834_p0), %s2199_s0, 128  }
 0xa8a   : > { %3503 = vsyncadd (!%p2834_p0), %s2199_s0, 4294967168  ;;  %s42_s23 = sadd.s32 1, %s3526_s23   ;;  %s4483_s17 = sld [smem:[#allocation41_spill]] }
 0xa8b   : > { %p39_p1 = scmp.ge.s32.totalorder %s42_s23, 4   ;;  %s4484_s20 = sld [smem:[#allocation47_spill]] }
 0xa8c   : > { %s4485_s30 = sld [smem:[#allocation45_spill]]  ;;  %s4486_s18 = smov %s3510_s19 }
 0xa8d   : > { %s4488_s21 = smov %s3522_s22  ;;  %41 = sbr.rel (!%p39_p1) target bundleno = 30 (0x1e), region = 210 }
 0xa90   : > { %s4487_s19 = smov %s4483_s17 }
 0xa92   : > { %s4489_s22 = smov %s4485_s30 }
 0xa94   :  { %2204 = vsyncpa [#allocation6], 1 }
 0xa95   :  { %2206 = vsyncpa [#allocation6 + $0x1], 1 }
 0xa96   :  { %2207 = vsyncpa [#allocation9], 1 }
 0xa97   :  { %2209 = vsyncpa [#allocation9 + $0x1], 1 }
 0xa98   :  { %2210 = vsyncpa [#allocation12], 1 }
 0xa99   :  { %2212 = vsyncpa [#allocation12 + $0x1], 1 }
 0xa9a   :  { %2213 = vsyncpa [#allocation15], 1 }
 0xa9b   :  { %2214 = vsyncpa [#allocation18], 1 }
 0xa9c   :  { %2215 = vsyncpa [#allocation21], 1 }
 0xa9d   :  { %2216 = vsyncpa [#allocation24], 1 }
 0xa9e   :  { %2217 = vsyncpa [#allocation27], 1 }
 0xa9f   :  { %2218 = vsyncpa [#allocation7], 1 }
 0xaa0   :  { %2220 = vsyncpa [#allocation7 + $0x1], 1 }

// kernel: tpu_custom_call.1
= control target key start
LH: loop header
LB: loop body
LE: loop exit
PB: predicated region body
PF: predicated region fallthrough
CT: control target
= control target key end

     0   :  { %s3755_s0 = inlined_call_operand.hbm [shape: f32[2,8,32], index: 0, kind: input, shape index: {}]   ;;  %s3756_s1 = inlined_call_operand.hbm [shape: f32[2,16,32], index: 1, kind: input, shape index: {}]   ;;  %s3757_s2 = inlined_call_operand.hbm [shape: f32[2,8,32], index: 2, kind: input, shape index: {}]   ;;  %s3758_s3 = inlined_call_operand.hbm [shape: f32[2,16,32], index: 3, kind: input, shape index: {}]   ;;  %s3759_s4 = inlined_call_operand.vmem [shape: f32[1,32], index: 4, kind: input, shape index: {}]   ;;  %s3760_s5 = inlined_call_operand.vmem [shape: f32[1,32], index: 5, kind: input, shape index: {}]   ;;  %s3761_s6 = inlined_call_operand.vmem [shape: f32[1,32], index: 6, kind: input, shape index: {}]   ;;  %s3762_s7 = inlined_call_operand.vmem [shape: f32[1,32], index: 7, kind: input, shape index: {}]   ;;  %s3763_s8 = inlined_call_operand.vmem [shape: f32[1,32], index: 8, kind: input, shape index: {}]   ;;  %s3764_s9 = inlined_call_operand.hbm [shape: f32[1,32], index: 9, kind: input, shape index: {}]   ;;  %s3765_s10 = inlined_call_operand.vmem [shape: f32[32,32], index: 10, kind: input, shape index: {}]   ;;  %s3766_s11 = inlined_call_operand.hbm [shape: f32[32,32], index: 11, kind: input, shape index: {}]   ;;  %s3767_s12 = inlined_call_operand.hbm [shape: f32[32,32], index: 12, kind: input, shape index: {}]   ;;  %s3768_s13 = inlined_call_operand.hbm [shape: f32[32,128], index: 13, kind: input, shape index: {}]   ;;  %s3769_s14 = inlined_call_operand.vmem [shape: f32[1,128], index: 14, kind: input, shape index: {}]   ;;  %s3770_s15 = inlined_call_operand.hbm [shape: f32[2,8,128], index: 15, kind: output, shape index: {}]  }
   0x1   :  { %3803 = sst [smem:[#allocation37_spill]] %s3756_s1 }
   0x2   :  { %3804 = sst [smem:[#allocation38_spill]] %s3759_s4 }
   0x3   :  { %3805 = sst [smem:[#allocation39_spill]] %s3760_s5 }
   0x4   :  { %3806 = sst [smem:[#allocation40_spill]] %s3761_s6 }
   0x5   :  { %3807 = sst [smem:[#allocation41_spill]] %s3762_s7 }
   0x6   :  { %3808 = sst [smem:[#allocation42_spill]] %s3763_s8 }
   0x7   :  { %3809 = sst [smem:[#allocation43_spill]] %s3764_s9 }
   0x8   :  { %3810 = sst [smem:[#allocation44_spill]] %s3765_s10 }
   0x9   :  { %3811 = sst [smem:[#allocation45_spill]] %s3766_s11 }
   0xa   :  { %3812 = sst [smem:[#allocation46_spill]] %s3769_s14 }
   0xb   :  { %3813 = sst [smem:[#allocation47_spill]] %s3770_s15 }
   0xc   :  { %20 = vsyncpa [#allocation6], 0 }
   0xd   :  { %22 = vsyncpa [#allocation6 + $0x1], 0 }
   0xe   :  { %23 = vsyncpa [#allocation9], 0 }
   0xf   :  { %25 = vsyncpa [#allocation9 + $0x1], 0 }
  0x10   :  { %26 = vsyncpa [#allocation12], 0 }
  0x11   :  { %28 = vsyncpa [#allocation12 + $0x1], 0 }
  0x12   :  { %29 = vsyncpa [#allocation15], 0 }
  0x13   :  { %30 = vsyncpa [#allocation18], 0 }
  0x14   :  { %31 = vsyncpa [#allocation7], 0 }
  0x15   :  { %33 = vsyncpa [#allocation7 + $0x1], 0  ;;  %s3178_s18 = smov 0   ;;  %s3180_s19 = smov 0  }
  0x16   :  { %s3182_s20 = smov 0   ;;  %s3184_s21 = smov 0  }
  0x17   :  { %s3186_s22 = smov 0   ;;  %s3188_s23 = smov 0  }
  0x18 LB: > { %3814 = sst [smem:[#allocation27_spill]] %s3059_s18  ;;  %s3209_s24 = sadd.s32 4294967295, %s3079_s23   ;;  %s3079_s23 = sphi %s3188_s23, %s39_s23   ;;  %s3075_s22 = sphi %s3186_s22, %s3879_s22   ;;  %s3071_s21 = sphi %s3184_s21, %s3878_s21   ;;  %s3067_s20 = sphi %s3182_s20, %s3876_s20   ;;  %s3063_s19 = sphi %s3180_s19, %s3875_s19   ;;  %s3059_s18 = sphi %s3178_s18, %s3874_s18  }
  0x19   : > { %3815 = sst [smem:[#allocation28_spill]] %s3063_s19  ;;  %s2283_s25 = sadd.s32 4294967294, %s3079_s23  }
  0x1a   : > { %3816 = sst [smem:[#allocation29_spill]] %s3067_s20  ;;  %p73_p0 = scmp.ne.s32.totalorder %s3063_s19, %s3059_s18 }
  0x1b   : > { %3817 = sst [smem:[#allocation30_spill]] %s3071_s21  ;;  %p3774_p1 = scmp.eq.s32.totalorder %s3209_s24, 0 }
  0x1c   : > { %3818 = sst [smem:[#allocation31_spill]] %s3209_s24  ;;  %p416_p3 = scmp.eq.s32.totalorder %s2283_s25, 1 }
  0x1d   : > { %p3218_p4 = por %p3774_p1, %p73_p0  ;;  %p2284_p5 = scmp.ge.s32.totalorder %s3079_s23, 1 }
  0x1e   : > { %p3223_p6 = por %p416_p3, %p73_p0  ;;  %p423_p7 = scmp.lt.s32.totalorder %s3079_s23, 3 }
  0x1f   : > { %s3819_s26 = scalar_select %p3218_p4, 1, 0 }
  0x20   : > { %s3821_s27 = scalar_select %p3223_p6, 1, 0 }
  0x21   : > { %3820 = sst [smem:[#allocation32_spill]] %s3819_s26  ;;  %p3228_p8 = pnand %p2284_p5, %p423_p7 }
  0x22   : > { %3822 = sst [smem:[#allocation33_spill]] %s3821_s27  ;;  %s3081_s29 = smov [#allocation13]  }
  0x23   : > { %s3823_s28 = scalar_select %p3228_p8, 1, 0 }
  0x24   : > { %s451_s30 = sshll.u32 %s3081_s29, 4  ;;  %p2589_p10 = pneg %p3228_p8  ;;  %s452_s30 = int_to_ptr.vmem [resolvable:$true] %s451_s30 }
  0x25   : > { %s3082_s16 = smov [#allocation14]   ;;  %s3825_s9 = sld [smem:[#allocation43_spill]] }
  0x26   : > { %s464_s17 = sshll.u32 %s3082_s16, 4  ;;  %p3237_p11 = pnand %p2589_p10, %p3774_p1  ;;  %s3241_s17 = int_to_ptr.vmem [resolvable:$true] %s464_s17 }
  0x28   : > { %s3824_s25 = scalar_select %p3237_p11, 1, 0 }
  0x29   : > { %p3251_p13 = pneg %p3237_p11 }
  0x2b   : > { %s2745_s15 = scalar_lea.hbm %s3825_s9, 16 }
  0x2c   : > { %p2746_p12 = scmp.ne.s32.totalorder %s3825_s9, %s2745_s15  ;;  %p2752_p5 = scmp.lt.u32.totalorder %s2745_s15, %s3825_s9 }
  0x2d   : > { %s3826_s21 = scalar_select %p3251_p13, 1, 0 }
  0x2e   : > { %p2748_p0 = pnand %p3251_p13, %p2746_p12 }
  0x30   : > { %p2749_p3 = pneg %p2748_p0 }
  0x32   : > { %p2754_p7 = pnand %p2752_p5, %p2749_p3 }
  0x34   : > { %2757 = shalt.err (!%p2754_p7)
}
  0x35   : > { %s2758_s18 = scalar_lea.vmem %s452_s30, 16  ;;  %s2765_s14 = scalar_lea.vmem %s452_s30, 32 }
  0x36   : > { %p2759_p10 = scmp.ne.s32.totalorder %s452_s30, %s2758_s18  ;;  %p2766_p2 = scmp.lt.s32.totalorder %s452_s30, %s452_s30 }
  0x37   : > { %p2767_p6 = scmp.lt.s32.totalorder %s2765_s14, %s2758_s18 }
  0x38   : > { %p2761_p9 = pnand %p2759_p10, %p3251_p13 }
  0x39   : > { %p2768_p4 = por %p2767_p6, %p2766_p2 }
  0x3a   : > { %p2762_p1 = pneg %p2761_p9 }
  0x3c   : > { %p2769_p8 = pnand %p2768_p4, %p2762_p1 }
  0x3e   : > { %2772 = shalt.err (!%p2769_p8)
}
  0x3f   : > { %2592 = dma.hbm_to_vmem [thread:$0]  (!%p3237_p11), %s3825_s9, 16, %s452_s30, [#allocation12]  }
  0x40   : > { %s3827_s11 = sld [smem:[#allocation45_spill]] }
  0x46   : > { %s2773_s16 = scalar_lea.hbm %s3827_s11, 512 }
  0x47   : > { %p2774_p9 = scmp.ne.s32.totalorder %s3827_s11, %s2773_s16  ;;  %p2780_p1 = scmp.lt.u32.totalorder %s2773_s16, %s3827_s11 }
  0x49   : > { %p2776_p12 = pnand %p2774_p9, %p3251_p13 }
  0x4b   : > { %p2777_p2 = pneg %p2776_p12 }
  0x4d   : > { %p2782_p4 = pnand %p2780_p1, %p2777_p2 }
  0x4f   : > { %2785 = shalt.err (!%p2782_p4)
}
  0x50   : > { %s2786_s30 = scalar_lea.vmem %s3241_s17, 512  ;;  %p2794_p3 = scmp.lt.s32.totalorder %s3241_s17, %s3241_s17 }
  0x51   : > { %p2787_p6 = scmp.ne.s32.totalorder %s3241_s17, %s2786_s30  ;;  %p2795_p5 = scmp.lt.s32.totalorder %s2786_s30, %s2786_s30 }
  0x53   : > { %p2789_p8 = pnand %p2787_p6, %p3251_p13  ;;  %p2796_p7 = por %p2795_p5, %p2794_p3 }
  0x55   : > { %p2790_p0 = pneg %p2789_p8 }
  0x57   : > { %p2797_p10 = pnand %p2796_p7, %p2790_p0 }
  0x59   : > { %2800 = shalt.err (!%p2797_p10)
}
  0x5a   : > { %s3777_s4 = smov 128   ;;  %s3779_s5 = smov 8  }
  0x5b   : > { %2595 = dma.hbm_to_vmem [thread:$0]  (!%p3237_p11), %s3827_s11, 512, %s3241_s17, [#allocation15], %s3777_s4, %s3777_s4, %s3779_s5  }
  0x5c   : > { %s51_s8 = sadd.s32 1, %s3075_s22  ;;  %s60_s15 = sadd.s32 1, %s3067_s20 }
  0x5d   : > { %p53_p9 = scmp.ge.s32.totalorder %s51_s8, 2  ;;  %p67_p12 = scmp.ne.s32.totalorder %s3067_s20, %s3063_s19 }
  0x5e   : > { %p68_p2 = scmp.eq.s32.totalorder %s3079_s23, 0  ;;  %p2623_p1 = scmp.lt.s32.totalorder %s3079_s23, 2 }
  0x5f   : > { %s3881_s8 = smov (%p53_p9, %s51_s8), 0  ;;  %p3829_p6 = scmp.eq.s32.totalorder %s3209_s24, 1 }
  0x60   : > { %3828 = sst [smem:[#allocation34_spill]] %s3881_s8  ;;  %p69_p4 = por %p68_p2, %p67_p12 }
  0x61   : > { %p3303_p8 = por %p3829_p6, %p67_p12  ;;  %s55_s17 = ssub.s32 %s3075_s22, %s3881_s8 }
  0x62   : > { %s3310_s18 = sand.u32 1, %s3067_s20   ;;  %p58_p0 = scmp.eq.s32.totalorder %s55_s17, 0 }
  0x63   : > { %s3830_s16 = scalar_select %p3303_p8, 1, 0 }
  0x64   : > { %p3312_p3 = pnand %p2623_p1, %p69_p4  ;;  %s3786_s30 = sand.u32 1, %s3079_s23  }
  0x65   : > { %3831 = sst [smem:[#allocation35_spill]] %s3830_s16  ;;  %s3784_s27 = sshll.u32 %s3310_s18, 4 }
  0x66   : > { %s3832_s14 = scalar_select %p3312_p3, 1, 0 }
  0x67   : > { %s3319_s29 = scalar_select %p58_p0, %s3067_s20, %s60_s15  }
  0x68   : > { %s3785_s4 = sshll.u32 %s3075_s22, 8  ;;  %s3834_s1 = sld [smem:[#allocation37_spill]] }
  0x69   : > { %3833 = sst [smem:[#allocation36_spill]] %s3319_s29  ;;  %s530_s17 = scalar_lea.vmem [#allocation8], %s3784_s27 }
  0x6a   : > { %s537_s8 = sshll.u32 %s530_s17, 4  ;;  %s3335_s16 = scalar_lea.sflag [#allocation9], %s3786_s30  ;;  %s3331_s8 = int_to_ptr.vmem [resolvable:$true] %s537_s8 }
  0x6b   : > { %p3341_p7 = pneg %p3312_p3 }
  0x6d   : > { %s3835_s29 = scalar_select %p3341_p7, 1, 0 }
  0x6e   : > { %s3327_s11 = scalar_lea.hbm %s3834_s1, %s3785_s4  ;;  %s2806_s17 = scalar_lea.hbm %s3834_s1, 512 }
  0x6f   : > { %s2801_s15 = scalar_lea.hbm %s3327_s11, 256  ;;  %p2807_p12 = scmp.lt.u32.totalorder %s3327_s11, %s3834_s1 }
  0x70   : > { %p2802_p5 = scmp.ne.s32.totalorder %s3327_s11, %s2801_s15  ;;  %p2808_p2 = scmp.lt.u32.totalorder %s2806_s17, %s2801_s15 }
  0x71   : > { %p2810_p4 = scmp.lt.u32.totalorder %s2801_s15, %s3327_s11 }
  0x72   : > { %p2804_p10 = pnand %p3341_p7, %p2802_p5  ;;  %p2809_p1 = por %p2808_p2, %p2807_p12 }
  0x74   : > { %p2805_p9 = pneg %p2804_p10  ;;  %p2811_p6 = por %p2810_p4, %p2809_p1 }
  0x76   : > { %p2812_p0 = pnand %p2811_p6, %p2805_p9 }
  0x78   : > { %2815 = shalt.err (!%p2812_p0)
}
  0x79   : > { %s2816_s30 = scalar_lea.vmem %s3331_s8, 256  ;;  %s3085_s9 = smov [#allocation8]  }
  0x7a   : > { %p2817_p5 = scmp.ne.s32.totalorder %s3331_s8, %s2816_s30  ;;  %s2821_s5 = sshll.u32 %s3085_s9, 4  ;;  %s2822_s5 = int_to_ptr.vmem [resolvable:$false] %s2821_s5 }
  0x7b   : > { %s2823_s4 = scalar_lea.vmem %s2822_s5, 512  ;;  %p2824_p11 = scmp.lt.s32.totalorder %s3331_s8, %s2822_s5 }
  0x7c   : > { %p2819_p10 = pnand %p2817_p5, %p3341_p7  ;;  %p2825_p13 = scmp.lt.s32.totalorder %s2823_s4, %s2816_s30 }
  0x7e   : > { %p2820_p8 = pneg %p2819_p10  ;;  %p2826_p12 = por %p2825_p13, %p2824_p11 }
  0x80   : > { %p2827_p2 = pnand %p2826_p12, %p2820_p8 }
  0x82   : > { %2830 = shalt.err (!%p2827_p2)
}
  0x83   : > { %s3836_s27 = smov 8   ;;  %s3837_s15 = smov 128  }
  0x84   : > { %2608 = dma.hbm_to_vmem [thread:$0]  (!%p3312_p3), %s3327_s11, 256, %s3331_s8, %s3335_s16, %s3837_s15, %s3837_s15, %s3836_s27  }
  0x85   : > { %s3838_s17 = sshll.u32 %s3075_s22, 8  ;;  %s3839_s5 = sshll.u32 %s3310_s18, 4 }
  0x86   : > { %s3373_s30 = scalar_lea.hbm %s3758_s3, %s3838_s17  ;;  %s570_s4 = scalar_lea.vmem [#allocation11], %s3839_s5 }
  0x87   : > { %s577_s20 = sshll.u32 %s570_s4, 4  ;;  %s3086_s10 = smov [#allocation16]   ;;  %s3377_s20 = int_to_ptr.vmem [resolvable:$true] %s577_s20 }
  0x88   : > { %s477_s7 = sshll.u32 %s3086_s10, 4  ;;  %s2831_s26 = scalar_lea.hbm %s3767_s12, 512  ;;  %s478_s7 = int_to_ptr.vmem [resolvable:$true] %s477_s7 }
  0x89   : > { %p2832_p11 = scmp.ne.s32.totalorder %s3767_s12, %s2831_s26  ;;  %p3840_p13 = scmp.ne.s32.totalorder %s3826_s21, 0 }
  0x8a   : > { %p2838_p1 = scmp.lt.u32.totalorder %s2831_s26, %s3767_s12 }
  0x8b   : > { %p2834_p8 = pnand %p2832_p11, %p3840_p13 }
  0x8d   : > { %p2835_p9 = pneg %p2834_p8 }
  0x8f   : > { %p2840_p4 = pnand %p2838_p1, %p2835_p9 }
  0x91   : > { %2843 = shalt.err (!%p2840_p4)
}
  0x92   : > { %s2844_s17 = scalar_lea.vmem %s478_s7, 512  ;;  %p2852_p10 = scmp.lt.s32.totalorder %s478_s7, %s478_s7 }
  0x93   : > { %p2845_p6 = scmp.ne.s32.totalorder %s478_s7, %s2844_s17  ;;  %p2853_p12 = scmp.lt.s32.totalorder %s2844_s17, %s2844_s17 }
  0x95   : > { %p2847_p0 = pnand %p2845_p6, %p3840_p13  ;;  %p2854_p2 = por %p2853_p12, %p2852_p10 }
  0x97   : > { %p2848_p5 = pneg %p2847_p0 }
  0x99   : > { %p2855_p3 = pnand %p2854_p2, %p2848_p5 }
  0x9b   : > { %2858 = shalt.err (!%p2855_p3)
}
  0x9c   : > { %p3841_p11 = scmp.ne.s32.totalorder %s3824_s25, 0  ;;  %s3087_s19 = smov [#allocation17]  }
  0x9d   : > { %s490_s24 = sshll.u32 %s3087_s19, 4  ;;  %s2290_s26 = sshll.u32 %s3310_s18, 3  ;;  %s491_s24 = int_to_ptr.vmem [resolvable:$true] %s490_s24 }
  0x9e   : > { %2598 = dma.hbm_to_vmem [thread:$0]  (!%p3841_p11), %s3767_s12, 512, %s478_s7, [#allocation15], %s3837_s15, %s3837_s15, %s3836_s27  }
  0x9f   : > { %s2859_s4 = scalar_lea.hbm %s3768_s13, 512 }
  0xa0   : > { %p2860_p3 = scmp.ne.s32.totalorder %s3768_s13, %s2859_s4  ;;  %p2866_p1 = scmp.lt.u32.totalorder %s2859_s4, %s3768_s13 }
  0xa2   : > { %p2862_p8 = pnand %p2860_p3, %p3840_p13 }
  0xa4   : > { %p2863_p9 = pneg %p2862_p8 }
  0xa6   : > { %p2868_p4 = pnand %p2866_p1, %p2863_p9 }
  0xa8   : > { %2871 = shalt.err (!%p2868_p4)
}
  0xa9   : > { %s2872_s7 = scalar_lea.vmem %s491_s24, 512  ;;  %p2880_p10 = scmp.lt.s32.totalorder %s491_s24, %s491_s24 }
  0xaa   : > { %p2873_p6 = scmp.ne.s32.totalorder %s491_s24, %s2872_s7  ;;  %p2881_p12 = scmp.lt.s32.totalorder %s2872_s7, %s2872_s7 }
  0xac   : > { %p2875_p0 = pnand %p2873_p6, %p3840_p13  ;;  %p2882_p2 = por %p2881_p12, %p2880_p10 }
  0xae   : > { %p2876_p5 = pneg %p2875_p0 }
  0xb0   : > { %p2883_p7 = pnand %p2882_p2, %p2876_p5 }
  0xb2   : > { %2886 = shalt.err (!%p2883_p7)
}
  0xb3   : > { %2601 = dma.hbm_to_vmem [thread:$0]  (!%p3841_p11), %s3768_s13, 512, %s491_s24, [#allocation18], %s3837_s15, %s3837_s15, %s3836_s27  }
  0xb4   : > { %s2291_s21 = sshll.u32 %s3075_s22, 7  ;;  %s511_s25 = scalar_lea.vmem [#allocation5], %s2290_s26 }
  0xb5   : > { %s3428_s5 = scalar_lea.hbm %s3755_s0, %s2291_s21  ;;  %s519_s4 = sshll.u32 %s511_s25, 4  ;;  %s520_s4 = int_to_ptr.vmem [resolvable:$true] %s519_s4 }
  0xb6   : > { %s508_s11 = scalar_lea.sflag [#allocation6], %s3310_s18  ;;  %s2887_s1 = scalar_lea.hbm %s3428_s5, 128 }
  0xb7   : > { %p2888_p7 = scmp.ne.s32.totalorder %s3428_s5, %s2887_s1  ;;  %p3842_p13 = scmp.ne.s32.totalorder %s3835_s29, 0 }
  0xb8   : > { %s2892_s17 = scalar_lea.hbm %s3755_s0, 256  ;;  %p2893_p8 = scmp.lt.u32.totalorder %s3428_s5, %s3755_s0 }
  0xb9   : > { %p2890_p11 = pnand %p2888_p7, %p3842_p13  ;;  %p2894_p9 = scmp.lt.u32.totalorder %s2892_s17, %s2887_s1 }
  0xba   : > { %p2896_p4 = scmp.lt.u32.totalorder %s2887_s1, %s3428_s5 }
  0xbb   : > { %p2891_p3 = pneg %p2890_p11  ;;  %p2895_p1 = por %p2894_p9, %p2893_p8 }
  0xbd   : > { %p2897_p6 = por %p2896_p4, %p2895_p1 }
  0xbf   : > { %p2898_p0 = pnand %p2897_p6, %p2891_p3 }
  0xc1   : > { %2901 = shalt.err (!%p2898_p0)
}
  0xc2   : > { %s2902_s10 = scalar_lea.vmem %s520_s4, 128  ;;  %s3088_s19 = smov [#allocation5]  }
  0xc3   : > { %p2903_p5 = scmp.ne.s32.totalorder %s520_s4, %s2902_s10  ;;  %s2907_s9 = sshll.u32 %s3088_s19, 4  ;;  %s2908_s9 = int_to_ptr.vmem [resolvable:$false] %s2907_s9 }
  0xc4   : > { %s2909_s25 = scalar_lea.vmem %s2908_s9, 256  ;;  %p2910_p2 = scmp.lt.s32.totalorder %s520_s4, %s2908_s9 }
  0xc5   : > { %p2905_p10 = pnand %p2903_p5, %p3842_p13  ;;  %p2911_p7 = scmp.lt.s32.totalorder %s2909_s25, %s2902_s10 }
  0xc7   : > { %p2906_p12 = pneg %p2905_p10  ;;  %p2912_p11 = por %p2911_p7, %p2910_p2 }
  0xc9   : > { %p2913_p8 = pnand %p2912_p11, %p2906_p12 }
  0xcb   : > { %2916 = shalt.err (!%p2913_p8)
}
  0xcc   : > { %p3843_p9 = scmp.ne.s32.totalorder %s3832_s14, 0  ;;  %s3455_s8 = scalar_lea.hbm %s3757_s2, %s2291_s21 }
  0xcd   : > { %s551_s17 = scalar_lea.vmem [#allocation10], %s2290_s26  ;;  %s2917_s6 = scalar_lea.hbm %s3455_s8, 128 }
  0xce   : > { %2605 = dma.hbm_to_vmem [thread:$0]  (!%p3843_p9), %s3428_s5, 128, %s520_s4, %s508_s11  }
  0xcf   : > { %s559_s7 = sshll.u32 %s551_s17, 4  ;;  %p2918_p3 = scmp.ne.s32.totalorder %s3455_s8, %s2917_s6  ;;  %s560_s7 = int_to_ptr.vmem [resolvable:$true] %s559_s7 }
  0xd0   : > { %s2922_s11 = scalar_lea.hbm %s3757_s2, 256  ;;  %p2923_p6 = scmp.lt.u32.totalorder %s3455_s8, %s3757_s2 }
  0xd1   : > { %p2920_p1 = pnand %p2918_p3, %p3842_p13  ;;  %p2924_p0 = scmp.lt.u32.totalorder %s2922_s11, %s2917_s6 }
  0xd2   : > { %p2926_p10 = scmp.lt.u32.totalorder %s2917_s6, %s3455_s8 }
  0xd3   : > { %p2921_p4 = pneg %p2920_p1  ;;  %p2925_p5 = por %p2924_p0, %p2923_p6 }
  0xd5   : > { %p2927_p12 = por %p2926_p10, %p2925_p5 }
  0xd7   : > { %p2928_p2 = pnand %p2927_p12, %p2921_p4 }
  0xd9   : > { %2931 = shalt.err (!%p2928_p2)
}
  0xda   : > { %s2932_s18 = scalar_lea.vmem %s560_s7, 128  ;;  %s3089_s26 = smov [#allocation10]  }
  0xdb   : > { %p2933_p7 = scmp.ne.s32.totalorder %s560_s7, %s2932_s18  ;;  %s2937_s19 = sshll.u32 %s3089_s26, 4  ;;  %s2938_s19 = int_to_ptr.vmem [resolvable:$false] %s2937_s19 }
  0xdc   : > { %s2939_s9 = scalar_lea.vmem %s2938_s19, 256  ;;  %p2940_p3 = scmp.lt.s32.totalorder %s560_s7, %s2938_s19 }
  0xdd   : > { %p2935_p11 = pnand %p2933_p7, %p3842_p13  ;;  %p2941_p1 = scmp.lt.s32.totalorder %s2939_s9, %s2932_s18 }
  0xdf   : > { %p2936_p8 = pneg %p2935_p11  ;;  %p2942_p9 = por %p2941_p1, %p2940_p3 }
  0xe1   : > { %p2943_p0 = pnand %p2942_p9, %p2936_p8 }
  0xe3   : > { %2946 = shalt.err (!%p2943_p0)
}
  0xe4   : > { %p3844_p6 = scmp.ne.s32.totalorder %s3832_s14, 0  ;;  %s3845_s25 = sand.u32 1, %s3079_s23  }
  0xe5   : > { %s3479_s1 = scalar_lea.sflag [#allocation12], %s3845_s25  ;;  %s2947_s24 = scalar_lea.hbm %s3373_s30, 256 }
  0xe6   : > { %2611 = dma.hbm_to_vmem [thread:$0]  (!%p3844_p6), %s3455_s8, 128, %s560_s7, %s3335_s16  }
  0xe7   : > { %p2948_p4 = scmp.ne.s32.totalorder %s3373_s30, %s2947_s24  ;;  %s2952_s5 = scalar_lea.hbm %s3758_s3, 512 }
  0xe8   : > { %p2953_p10 = scmp.lt.u32.totalorder %s3373_s30, %s3758_s3  ;;  %p2954_p12 = scmp.lt.u32.totalorder %s2952_s5, %s2947_s24 }
  0xe9   : > { %p2950_p5 = pnand %p2948_p4, %p3842_p13  ;;  %p2956_p7 = scmp.lt.u32.totalorder %s2947_s24, %s3373_s30 }
  0xea   : > { %p2955_p2 = por %p2954_p12, %p2953_p10 }
  0xeb   : > { %p2951_p9 = pneg %p2950_p5 }
  0xec   : > { %p2957_p11 = por %p2956_p7, %p2955_p2 }
  0xee   : > { %p2958_p8 = pnand %p2957_p11, %p2951_p9 }
  0xf0   : > { %2961 = shalt.err (!%p2958_p8)
}
  0xf1   : > { %s2962_s16 = scalar_lea.vmem %s3377_s20, 256  ;;  %s3090_s8 = smov [#allocation11]  }
  0xf2   : > { %p2963_p3 = scmp.ne.s32.totalorder %s3377_s20, %s2962_s16  ;;  %s2967_s7 = sshll.u32 %s3090_s8, 4  ;;  %s2968_s7 = int_to_ptr.vmem [resolvable:$false] %s2967_s7 }
  0xf3   : > { %s2969_s10 = scalar_lea.vmem %s2968_s7, 512  ;;  %p2970_p4 = scmp.lt.s32.totalorder %s3377_s20, %s2968_s7 }
  0xf4   : > { %p2965_p1 = pnand %p2963_p3, %p3842_p13  ;;  %p2971_p5 = scmp.lt.s32.totalorder %s2969_s10, %s2962_s16 }
  0xf6   : > { %p2966_p0 = pneg %p2965_p1  ;;  %p2972_p10 = por %p2971_p5, %p2970_p4 }
  0xf8   : > { %p2973_p12 = pnand %p2972_p10, %p2966_p0 }
  0xfa   : > { %2976 = shalt.err (!%p2973_p12)
}
  0xfb   : > { %2614 = dma.hbm_to_vmem [thread:$0]  (!%p3844_p6), %s3373_s30, 256, %s3377_s20, %s3479_s1, %s3837_s15, %s3837_s15, %s3836_s27  }
  0xfc   : > { %p3846_p13 = scmp.ne.s32.totalorder %s3823_s28, 0 }
  0xfd   : > { %s3847_s29 = sld [smem:[#allocation28_spill]] (!%p3846_p13)  ;;  %s3848_s21 = sld [smem:[#allocation32_spill]] (!%p3846_p13) }
  0xfe   : > { %589 = sbr.rel (%p3846_p13) target bundleno = 2461 (0x99d), region = 80 }
 0x103   : > { %s3509_s18 = sand.u32 (!%p3846_p13), 1, %s3847_s29   ;;  %p3849_p9 = scmp.ne.s32.totalorder (!%p3846_p13), %s3848_s21, 0 }
 0x104   : > { %s3512_s26 = sshll.u32 (!%p3846_p13), %s3509_s18, 3  ;;  %s592_s14 = scalar_lea.sflag (!%p3846_p13), [#allocation6], %s3509_s18 }
 0x105   : > { %s595_s19 = scalar_lea.vmem [#allocation5], %s3512_s26 }
 0x106   : > { %3030 = dma.done.wait (%p3849_p9), %s592_s14, 128  }
 0x107   : > { %3032 = vsyncadd (%p3849_p9), %s592_s14, 4294967168  ;;  %s3850_s20 = sld [smem:[#allocation31_spill]]  ;;  %s2302_s27 = sshll.u32 %s3509_s18, 4 }
 0x108   : > { %s604_s30 = scalar_lea.vmem [#allocation8], %s2302_s27 }
 0x10d   : > { %s600_s28 = sand.u32 1, %s3850_s20  }
 0x10e   : > { %s601_s15 = scalar_lea.sflag [#allocation9], %s600_s28 }
 0x10f   : > { %3034 = dma.done.wait (%p3849_p9), %s601_s15, 384  }
 0x110   : > { %3036 = vsyncadd (%p3849_p9), %s601_s15, 4294966912  ;;  %s613_s9 = scalar_lea.vmem [#allocation10], %s3512_s26  ;;  %s619_s25 = scalar_lea.sflag [#allocation12], %s600_s28 }
 0x111   : > { %s622_s1 = scalar_lea.vmem [#allocation11], %s2302_s27 }
 0x112   : > { %3038 = dma.done.wait (%p3849_p9), %s619_s25, 256  }
 0x113   : > { %3040 = vsyncadd (%p3849_p9), %s619_s25, 4294967040  ;;  %p3851_p6 = scmp.eq.s32.totalorder %s3850_s20, 0 }
 0x115   : > { %3042 = dma.done.wait (%p3851_p6), [#allocation12], 16   ;;  %p3852_p2 = pmov %p3851_p6 }
 0x117   : > { %3044 = vsyncadd (%p3852_p2), [#allocation12], 4294967280  ;;  %p3853_p7 = pmov %p3852_p2 }
 0x118   : > { %p3854_p11 = pmov %p3852_p2 }
 0x119   : > { %3046 = dma.done.wait (%p3853_p7), [#allocation15], 1024  }
 0x11a   : > { %3048 = vsyncadd (%p3854_p11), [#allocation15], 4294966272  ;;  %p3855_p8 = pmov %p3852_p2 }
 0x11b   : > { %p3856_p3 = pmov %p3852_p2 }
 0x11c   : > { %3050 = dma.done.wait (%p3855_p8), [#allocation18], 512  }
 0x11d   : > { %3052 = vsyncadd (%p3856_p3), [#allocation18], 4294966784  ;;  %v3543_v0 = vld [vmem:[%s604_s30] sm:$0xff]  ;;  %v706_v1 = vld [vmem:[%s622_s1] sm:$0xff]  ;;  %vm710_vm0 = vcmask 261120   ;;  %v3091_v35 = vmov 0.0|0.0  }
 0x11e   : > { %v974_v2 = vld [vmem:[%s595_s19] sm:$0xff]  ;;  %v708_v3 = vadd.f32 %v706_v1, %v3543_v0  ;;  %v975_v4 = vld [vmem:[%s613_s9] sm:$0xff]  ;;  %v756_v28 = vsel %vm710_vm0, %v3543_v0, 0.0  ;;  %s3857_s6 = sld [smem:[#allocation40_spill]]  ;;  %s3858_s11 = sld [smem:[#allocation41_spill]]  ;;  %vm3092_vm1 = vmmov 0  }
 0x11f   : > { %v705_v5 = vld [vmem:[%s604_s30 + $0x8] sm:$0xff]  ;;  %v707_v6 = vld [vmem:[%s622_s1 + $0x8] sm:$0xff]  ;;  %v976_v7 = vadd.f32 %v975_v4, %v974_v2  ;;  %s3859_s7 = sld [smem:[#allocation44_spill]]  ;;  %s3860_s15 = sld [smem:[#allocation38_spill]]  ;;  %vm1098_vm2 = vcmask 64512   ;;  %vm1178_vm4 = vcmask 130048  }
 0x120   : > { %v709_v8 = vadd.f32 %v707_v6, %v705_v5  ;;  %v711_v9 = vsel %vm710_vm0, %v708_v3, 0.0  ;;  %v759_v27 = vsel %vm710_vm0, %v705_v5, 0.0  ;;  %v800_v29 = vld [vmem:[#allocation14] sm:$0xff]  ;;  %v801_v30 = vld [vmem:[#allocation14 + $0x8] sm:$0xff]  ;;  %v802_v32 = vld [vmem:[#allocation14 + $0x10] sm:$0xff]  ;;  %s3861_s25 = sld [smem:[#allocation39_spill]] }
 0x121   : > { %712 = vadd.xlane.f32.xlu0 %v711_v9  ;;  %v978_v10 = vsel %vm710_vm0, %v976_v7, 0.0  ;;  %v2506_v31 = vpack.c.bf16 %v801_v30, %v800_v29  ;;  %v803_v33 = vld [vmem:[#allocation14 + $0x18] sm:$0xff]  ;;  %s3862_s17 = sld [smem:[#allocation42_spill]]  ;;  %vm3620_vm3 = vmpackc.low %vm1098_vm2, %vm1098_vm2  ;;  %s3095_s5 = smov 112  }
 0x122   : > { %979 = vadd.xlane.f32.xlu1 %v978_v10  ;;  %v714_v11 = vsel %vm710_vm0, %v709_v8, 0.0  ;;  %v2510_v34 = vpack.c.bf16 %v803_v33, %v802_v32  ;;  %v3093_v10 = vmov 0.0   ;;  %s3096_s4 = smov 104   ;;  %s3866_s16 = sld [smem:[#allocation35_spill]] }
 0x123   : > { %2507 = vmatprep.subr.bf16.mxu0 %v2506_v31  ;;  %s3867_s29 = sld [smem:[#allocation46_spill]]  ;;  %s699_s14 = scalar_lea.vmem [#allocation19], %s3512_s26 }
 0x124   : > { %2509 = vmatpush3.bf16.msra.mxu0 %v2506_v31  ;;  %v2310_v56 = vld [vmem:[%s3857_s6] ss:$0 sm:$0xff]  ;;  %v2313_v31 = vld [vmem:[#allocation13] ss:$0 sm:$0xff]  ;;  %s3094_s6 = smov 120   ;;  %s2097_s19 = sshll.u32 %s699_s14, 4  ;;  %s3708_s19 = int_to_ptr.vmem [resolvable:$true] %s2097_s19 }
 0x125   : > { %715 = vadd.xlane.f32.xlu0 %v714_v11  ;;  %2511 = vmatprep.subr.bf16.mxu0 %v2510_v34  ;;  %v2311_v58 = vld [vmem:[%s3858_s11] ss:$0 sm:$0xff]  ;;  %v1010_v6 = vld [vmem:[%s3859_s7 + $0x10] sm:$0xff]  ;;  %s3865_s11 = sld [smem:[#allocation30_spill]]  ;;  %s3868_s27 = sld [smem:[#allocation47_spill]] }
 0x126   : > { %v1008_v63 = vld [vmem:[%s3859_s7] sm:$0xff]  ;;  %s2083_s30 = scalar_lea.sflag [#allocation7], %s3509_s18  ;;  %s2977_s9 = scalar_lea.vmem %s3708_s19, 128 }
 0x127   : > { %p2978_p1 = scmp.ne.s32.totalorder %s3708_s19, %s2977_s9  ;;  %s3097_s26 = smov [#allocation19]  }
 0x128   : > { %2513 = vmatpush3.bf16.msra.mxu0 %v2510_v34  ;;  %p3869_p0 = scmp.ne.s32.totalorder %s3866_s16, 0 }
 0x129   : > { %2522 = vmatprep.subr.bf16.mxu0 %v3091_v35 }
 0x12a   : > { %p2979_p4 = pnand %p2978_p1, %p3869_p0 }
 0x12b   : > { %s2343_s21 = sshll.u32 %s3865_s11, 7 }
 0x12c   : > { %p2980_p5 = pneg %p2979_p4 }
 0x1ae   : > { %v713_v12 = vpop.xlane.xlu0 %712 }
 0x1af   : > { %v718_v13 = vmul.f32 0.03125, %v713_v12  ;;  %v980_v14 = vpop.xlane.xlu1 %979  ;;  %v2319_v12 = vld [vmem:[%s3861_s25] ss:$0 sm:$0xff]  ;;  %s2981_s25 = sshll.u32 %s3097_s26, 4  ;;  %s2982_s25 = int_to_ptr.vmem [resolvable:$false] %s2981_s25 }
 0x1b0   : > { %v982_v15 = vmul.f32 0.03125, %v980_v14  ;;  %v887_v14 = vld [vmem:[#allocation16] sm:$0xff]  ;;  %s2983_s1 = scalar_lea.vmem %s2982_s25, 256  ;;  %p2984_p10 = scmp.lt.s32.totalorder %s3708_s19, %s2982_s25 }
 0x1b1   : > { %v720_v16 = vsub.f32 %v708_v3, %v718_v13  ;;  %p2985_p12 = scmp.lt.s32.totalorder %s2983_s1, %s2977_s9 }
 0x1b2   : > { %v3549_v17 = vsub.f32 %v976_v7, %v982_v15  ;;  %v716_v18 = vpop.xlane.xlu0 %715  ;;  %v1011_v7 = vld [vmem:[%s3859_s7 + $0x18] sm:$0xff] }
 0x1b3   : > { %v719_v19 = vmul.f32 0.03125, %v716_v18  ;;  %v722_v20 = vmul.f32 %v720_v16, %v720_v16  ;;  %v2526_v9 = vpack.c.bf16 %v1011_v7, %v1010_v6  ;;  %v888_v15 = vld [vmem:[#allocation16 + $0x8] sm:$0xff]  ;;  %v890_v18 = vld [vmem:[#allocation16 + $0x18] sm:$0xff]  ;;  %v1263_v7 = vld [vmem:[#allocation17] sm:$0xff]  ;;  %p2986_p13 = por %p2985_p12, %p2984_p10 }
 0x1b4   : > { %v984_v21 = vmul.f32 %v3549_v17, %v3549_v17 }
 0x1b5   : > { %v721_v22 = vsub.f32 %v709_v8, %v719_v19  ;;  %v724_v23 = vsel %vm710_vm0, %v722_v20, 0.0  ;;  %v2318_v8 = vld [vmem:[%s3860_s15] ss:$0 sm:$0xff]  ;;  %s3706_s15 = scalar_lea.hbm %s3868_s27, %s2343_s21  ;;  %p2987_p9 = pnand %p2986_p13, %p2980_p5 }
 0x1b6   : > { %725 = vadd.xlane.f32.xlu1 %v724_v23  ;;  %v985_v24 = vsel %vm710_vm0, %v984_v21, 0.0 }
 0x1b7   : > { %v723_v25 = vmul.f32 %v721_v22, %v721_v22 }
 0x1b9   : > { %v727_v26 = vsel %vm710_vm0, %v723_v25, 0.0 }
 0x1ba   : > { %986 = vadd.xlane.f32.xlu1 %v985_v24  ;;  %728 = vadd.xlane.f32.xlu0 %v727_v26 }
 0x1be   : > { %760 = vadd.xlane.f32.xlu1 %v759_v27  ;;  %757 = vadd.xlane.f32.xlu0 %v756_v28  ;;  %v2312_v27 = vld [vmem:[%s3862_s17] ss:$0 sm:$0xff] }
 0x243   : > { %v726_v36 = vpop.xlane.xlu1 %725 }
 0x244   : > { %v730_v37 = vmul.f32 0.03125, %v726_v36 }
 0x246   : > { %v732_v38 = vadd.f32 1e-05, %v730_v37 }
 0x247   : > { %v987_v39 = vpop.xlane.xlu1 %986  ;;  %v729_v40 = vpop.xlane.xlu0 %728 }
 0x248   : > { %2719 = vrsqrt.f32 %v732_v38  ;;  %v988_v41 = vmul.f32 0.03125, %v987_v39  ;;  %v731_v42 = vmul.f32 0.03125, %v729_v40 }
 0x24a   : > { %v733_v43 = vadd.f32 1e-05, %v731_v42  ;;  %v989_v44 = vadd.f32 1e-05, %v988_v41 }
 0x24b   : > { %v761_v45 = vpop.xlane.xlu1 %760  ;;  %v758_v46 = vpop.xlane.xlu0 %757 }
 0x24c   : > { %v763_v47 = vmul.f32 0.03125, %v761_v45  ;;  %v762_v48 = vmul.f32 0.03125, %v758_v46  ;;  %2721 = vrsqrt.f32 %v733_v43  ;;  %v1512_v43 = vld [vmem:[#allocation17 + $0x8] sm:$0xff] }
 0x24d   : > { %2723 = vrsqrt.f32 %v989_v44 }
 0x24e   : > { %v3560_v49 = vsub.f32 %v705_v5, %v763_v47  ;;  %v3563_v50 = vsub.f32 %v3543_v0, %v762_v48  ;;  %v1009_v0 = vld [vmem:[%s3859_s7 + $0x8] sm:$0xff] }
 0x24f   : > { %v2523_v3 = vpack.c.bf16 %v1009_v0, %v1008_v63 }
 0x250   : > { %v767_v51 = vmul.f32 %v3560_v49, %v3560_v49  ;;  %v766_v52 = vmul.f32 %v3563_v50, %v3563_v50 }
 0x252   : > { %v2720_v53 = vpop.eup %2719  ;;  %v771_v54 = vsel %vm710_vm0, %v767_v51, 0.0  ;;  %v768_v55 = vsel %vm710_vm0, %v766_v52, 0.0 }
 0x253   : > { %772 = vadd.xlane.f32.xlu1 %v771_v54  ;;  %769 = vadd.xlane.f32.xlu0 %v768_v55  ;;  %v736_v57 = vmul.f32 %v2720_v53, %v720_v16  ;;  %v889_v16 = vld [vmem:[#allocation16 + $0x10] sm:$0xff] }
 0x254   : > { %v2518_v19 = vpack.c.bf16 %v890_v18, %v889_v16 }
 0x255   : > { %v745_v59 = vmul.f32 %v2310_v56, %v736_v57 }
 0x256   : > { %v2722_v60 = vpop.eup %2721 }
 0x257   : > { %v754_v61 = vadd.f32 %v2311_v58, %v745_v59  ;;  %v737_v62 = vmul.f32 %v2722_v60, %v721_v22  ;;  %v2724_v1 = vpop.eup %2723 }
 0x258   : > { %v991_v4 = vmul.f32 %v2724_v1, %v3549_v17  ;;  %v2514_v17 = vpack.c.bf16 %v888_v15, %v887_v14 }
 0x259   : > { %2405 = vmatprep.mubr.msk.f32.mxu0 %vm710_vm0, %v754_v61  ;;  %v746_v2 = vmul.f32 %v2310_v56, %v737_v62 }
 0x25a   : > { %v999_v11 = vmul.f32 %v2318_v8, %v991_v4  ;;  %2515 = vmatprep.subr.bf16.mxu1 %v2514_v17 }
 0x25b   : > { %v755_v5 = vadd.f32 %v2311_v58, %v746_v2  ;;  %2517 = vmatpush3.bf16.msra.mxu1 %v2514_v17 }
 0x25c   : > { %v1007_v13 = vadd.f32 %v2319_v12, %v999_v11  ;;  %2519 = vmatprep.subr.bf16.mxu1 %v2518_v19 }
 0x25d   : > { %2406 = vmatmul.mubr.msk.f32.vlgmr.msra.gmra.mrb[0].mxu0 %vm710_vm0, %v755_v5 }
 0x25e   : > { %2524 = vmatpush3.bf16.msra.mxu0 %v2523_v3  ;;  %2427 = vmatprep.mubr.msk.f32.mxu0 %vm3092_vm1, %v3093_v10 }
 0x25f   : > { %2525 = vmatprep.subr.bf16.mxu0 %v3091_v35  ;;  %2521 = vmatpush3.bf16.msra.mxu1 %v2518_v19 }
 0x260   : > { %2528 = vmatprep.subr.bf16.mxu1 %v3091_v35 }
 0x262   : > { %2527 = vmatpush3.bf16.msra.mxu0 %v2526_v9 }
 0x263   : > { %2532 = vmatprep.subr.bf16.mxu0 %v3091_v35 }
 0x265   : > { %2428 = vmatmul.mubr.msk.f32.vlgmr.msra.gmra.mrb[2].mxu0 %vm710_vm0, %v1007_v13 }
 0x266   : > { %2441 = vmatprep.mubr.msk.f32.mxu0 %vm3092_vm1, %v3093_v10 }
 0x2e0   : > { %v773_v20 = vpop.xlane.xlu1 %772  ;;  %v770_v21 = vpop.xlane.xlu0 %769 }
 0x2e1   : > { %v775_v22 = vmul.f32 0.03125, %v773_v20  ;;  %v774_v23 = vmul.f32 0.03125, %v770_v21 }
 0x2e3   : > { %v777_v24 = vadd.f32 1e-05, %v775_v22  ;;  %v776_v25 = vadd.f32 1e-05, %v774_v23 }
 0x2e5   : > { %2725 = vrsqrt.f32 %v777_v24 }
 0x2e6   : > { %2727 = vrsqrt.f32 %v776_v25 }
 0x2ef   : > { %v2726_v26 = vpop.eup %2725 }
 0x2f0   : > { %v2728_v28 = vpop.eup %2727  ;;  %v781_v29 = vmul.f32 %v2726_v26, %v3560_v49 }
 0x2f1   : > { %v780_v30 = vmul.f32 %v2728_v28, %v3563_v50 }
 0x2f2   : > { %v790_v32 = vmul.f32 %v2312_v27, %v781_v29 }
 0x2f3   : > { %v789_v33 = vmul.f32 %v2312_v27, %v780_v30 }
 0x2f4   : > { %v799_v34 = vadd.f32 %v2313_v31, %v790_v32 }
 0x2f5   : > { %v798_v36 = vadd.f32 %v2313_v31, %v789_v33 }
 0x2f7   : > { %2416 = vmatprep.mubr.msk.f32.mxu1 %vm710_vm0, %v798_v36 }
 0x2f8   : > { %2417 = vmatmul.mubr.msk.f32.vlgmr.msra.gmra.mrb[0].mxu1 %vm710_vm0, %v799_v34 }
 0x2f9   : > { %2434 = vmatprep.mubr.msk.f32.mxu1 %vm3092_vm1, %v3093_v10 }
 0x330   : > { %v2407_v37 = vpop.f32.mrb[0].mxu0 }
 0x331   : > { %886 = vst.msk [vmem:[#allocation3 + $0x8] sm:$0xff] %vm710_vm0, %v2407_v37  ;;  %v876_v38 = vpop.f32.mrb[1].mxu0 }
 0x332   : > { %885 = vst.msk [vmem:[#allocation3] sm:$0xff] %vm710_vm0, %v876_v38 }
 0x338   : > { %v1081_v39 = vpop.f32.mrb[2].mxu0  ;;  %v1095_v40 = vld [vmem:[#allocation3 + $0x8] sm:$0xff] }
 0x339   : > { %1085 = vst.msk [vmem:[#allocation2] sm:$0xff] %vm710_vm0, %v1081_v39  ;;  %v2429_v41 = vpop.f32.mrb[3].mxu0  ;;  %v1094_v42 = vld [vmem:[#allocation3] sm:$0xff] }
 0x33a   : > { %v2689_v44 = vpack.i.bf16 %v1095_v40, %v1094_v42  ;;  %v2529_v45 = vpack.c.bf16 %v1095_v40, %v1094_v42 }
 0x33c   : > { %2690 = vrot.lane.b32.xlu1 %v2689_v44, %s3094_s6  ;;  %2531 = vmatpush3.bf16.xpose.msk.msra.mxu1 %vm3620_vm3, %v2529_v45 }
 0x33d   : > { %2444 = vmatprep.subr.mxu1 %v3093_v10 }
 0x340   : > { %2695 = vrot.lane.b32.xlu1 %v2689_v44, %s3095_s5  ;;  %v1093_v46 = vld [vmem:[#allocation2] sm:$0xff] }
 0x343   : > { %2435 = vmatmul.mubr.msk.f32.vlgmr.msra.gmra.mrb[2].mxu1 %vm1098_vm2, %v1093_v46 }
 0x344   : > { %1587 = vrot.lane.b32.xlu1 %v1093_v46, %s3095_s5  ;;  %2446 = vmatprep.mubr.msk.f32.mxu1 %vm3092_vm1, %v3093_v10 }
 0x345   : > { %2445 = vmatpush3.msra.mxu1 %v1263_v7 }
 0x346   : > { %2539 = vmatprep.subr.bf16.mxu1 %v3091_v35 }
 0x3ae   : > { %v2691_v59 = vpop.permute.xlu1 %2690 }
 0x3af   : > { %v2693_v60 = vunpack.i.h.bf16 %v2691_v59  ;;  %v2692_v61 = vunpack.i.l.bf16 %v2691_v59 }
 0x3b1   : > { %v2536_v63 = vpack.c.bf16 %v2693_v60, %v2692_v61 }
 0x3b2   : > { %v2696_v0 = vpop.permute.xlu1 %2695 }
 0x3b3   : > { %v2698_v2 = vunpack.i.h.bf16 %v2696_v0  ;;  %v2697_v3 = vunpack.i.l.bf16 %v2696_v0 }
 0x3b5   : > { %v2543_v4 = vpack.c.bf16 %v2698_v2, %v2697_v3 }
 0x3b6   : > { %v1588_v6 = vpop.permute.xlu1 %1587 }
 0x3cb   : > { %v2418_v47 = vpop.f32.mrb[0].mxu1 }
 0x3cc   : > { %973 = vst.msk [vmem:[#allocation4 + $0x8] sm:$0xff] %vm710_vm0, %v2418_v47  ;;  %v963_v48 = vpop.f32.mrb[1].mxu1 }
 0x3cd   : > { %972 = vst.msk [vmem:[#allocation4] sm:$0xff] %vm710_vm0, %v963_v48 }
 0x3d3   : > { %v1097_v49 = vld [vmem:[#allocation4 + $0x8] sm:$0xff] }
 0x3d4   : > { %v1096_v50 = vld [vmem:[#allocation4] sm:$0xff] }
 0x3d5   : > { %v2533_v51 = vpack.c.bf16 %v1097_v49, %v1096_v50  ;;  %v3635_v52 = vpack.i.bf16 %v1097_v49, %v1096_v50 }
 0x3d7   : > { %2534 = vmatpush3.bf16.msra.mxu0 %v2533_v51 }
 0x3d8   : > { %2535 = vmatprep.subr.bf16.mxu0 %v3091_v35 }
 0x416   : > { %v1174_v53 = vpop.f32.mrb[2].mxu1 }
 0x417   : > { %v2436_v54 = vpop.f32.mrb[3].mxu1  ;;  %v1179_v55 = vsel %vm1178_vm4, %v1174_v53, -inf }
 0x418   : > { %1180 = vmax.xlane.f32.xlu0 %v1179_v55 }
 0x42e   : > { %1338 = vrot.lane.b32.xlu0 %v1093_v46, %s3094_s6 }
 0x4a5   : > { %v1181_v56 = vpop.xlane.xlu0 %1180 }
 0x4a6   : > { %v1182_v57 = vsub.f32 %v1174_v53, %v1181_v56 }
 0x4a8   : > { %v1183_v58 = vmul.f32 1.442695, %v1182_v57 }
 0x4a9   : > { %v1339_v5 = vpop.permute.xlu0 %1338 }
 0x4aa   : > { %2729 = vpow2.f32 %v1183_v58  ;;  %v1759_v58 = vld [vmem:[#allocation17 + $0x10] sm:$0xff] }
 0x4b4   : > { %v2730_v62 = vpop.eup %2729 }
 0x4b5   : > { %2442 = vmatmul.mubr.msk.f32.vlgmr.msra.gmra.mrb[4].mxu0 %vm1178_vm4, %v2730_v62  ;;  %v1185_v1 = vsel %vm1178_vm4, %v2730_v62, 0.0 }
 0x4b6   : > { %2538 = vmatpush3.bf16.xpose.msk.msra.mxu0 %vm3620_vm3, %v2536_v63  ;;  %1186 = vadd.xlane.f32.xlu1 %v1185_v1 }
 0x4b7   : > { %2453 = vmatprep.mubr.msk.f32.mxu0 %vm3092_vm1, %v3093_v10  ;;  %2542 = vmatprep.subr.bf16.mxu0 %v3091_v35 }
 0x4bd   : > { %2454 = vmatmul.mubr.msk.f32.vlgmr.msra.gmra.mrb[6].mxu0 %vm1098_vm2, %v1339_v5 }
 0x4be   : > { %2545 = vmatpush3.bf16.xpose.msk.msra.mxu0 %vm3620_vm3, %v2543_v4  ;;  %2472 = vmatprep.mubr.msk.f32.mxu0 %vm3092_vm1, %v3093_v10 }
 0x4bf   : > { %2549 = vmatprep.subr.bf16.mxu0 %v3091_v35 }
 0x4c5   : > { %2473 = vmatmul.mubr.msk.f32.vlgmr.msra.gmra.mrb[8].mxu0 %vm1098_vm2, %v1588_v6 }
 0x4c6   : > { %2491 = vmatprep.mubr.msk.f32.mxu0 %vm3092_vm1, %v3093_v10 }
 0x4c7   : > { %2705 = vrot.lane.b32.xlu1 %v2689_v44, %s3096_s4 }
 0x4cb   : > { %1834 = vrot.lane.b32.xlu1 %v1093_v46, %s3096_s4 }
 0x543   : > { %v1187_v8 = vpop.xlane.xlu1 %1186 }
 0x544   : > { %2731 = vrcp.f32 %v1187_v8 }
 0x547   : > { %v2706_v9 = vpop.permute.xlu1 %2705 }
 0x548   : > { %v2708_v11 = vunpack.i.h.bf16 %v2706_v9  ;;  %v2707_v12 = vunpack.i.l.bf16 %v2706_v9  ;;  %v2321_v9 = vld [vmem:[%s3867_s29] ss:$0 sm:$0xff] }
 0x54a   : > { %v2550_v13 = vpack.c.bf16 %v2708_v11, %v2707_v12 }
 0x54b   : > { %v1835_v14 = vpop.permute.xlu1 %1834 }
 0x54c   : > { %2552 = vmatpush3.bf16.xpose.msk.msra.mxu0 %vm3620_vm3, %v2550_v13 }
 0x54e   : > { %v2732_v15 = vpop.eup %2731 }
 0x553   : > { %2492 = vmatmul.mubr.msk.f32.vlgmr.msra.gmra.mrb[10].mxu0 %vm1098_vm2, %v1835_v14 }
 0x588   : > { %v1257_v16 = vpop.f32.mrb[4].mxu0 }
 0x589   : > { %v1262_v17 = vmul.f32 %v2732_v15, %v1257_v16  ;;  %v2443_v18 = vpop.f32.mrb[5].mxu0 }
 0x58b   : > { %2447 = vmatmul.mubr.msk.f32.vlgmr.msra.gmra.mrb[4].mxu1 %vm1098_vm2, %v1262_v17 }
 0x58c   : > { %2460 = vmatprep.mubr.msk.f32.mxu1 %vm3092_vm1, %v3093_v10 }
 0x590   : > { %v1416_v19 = vpop.f32.mrb[6].mxu0 }
 0x591   : > { %v2455_v20 = vpop.f32.mrb[7].mxu0  ;;  %v1420_v21 = vsel %vm1178_vm4, %v1416_v19, -inf }
 0x592   : > { %1421 = vmax.xlane.f32.xlu0 %v1420_v21 }
 0x598   : > { %v1665_v22 = vpop.f32.mrb[8].mxu0 }
 0x599   : > { %v2474_v23 = vpop.f32.mrb[9].mxu0  ;;  %v1669_v24 = vsel %vm1178_vm4, %v1665_v22, -inf }
 0x59a   : > { %1670 = vmax.xlane.f32.xlu1 %v1669_v24 }
 0x5a8   : > { %2700 = vrot.lane.b32.xlu0 %v3635_v52, %s3094_s6 }
 0x61f   : > { %v1422_v25 = vpop.xlane.xlu0 %1421 }
 0x620   : > { %v1423_v26 = vsub.f32 %v1416_v19, %v1422_v25 }
 0x622   : > { %v1424_v27 = vmul.f32 1.442695, %v1423_v26 }
 0x623   : > { %v2701_v28 = vpop.permute.xlu0 %2700 }
 0x624   : > { %2733 = vpow2.f32 %v1424_v27  ;;  %v2703_v29 = vunpack.i.h.bf16 %v2701_v28  ;;  %v2702_v30 = vunpack.i.l.bf16 %v2701_v28 }
 0x626   : > { %v2540_v31 = vpack.c.bf16 %v2703_v29, %v2702_v30  ;;  %v1912_v32 = vpop.f32.mrb[10].mxu0 }
 0x627   : > { %v1671_v33 = vpop.xlane.xlu1 %1670  ;;  %v2493_v34 = vpop.f32.mrb[11].mxu0  ;;  %v1916_v36 = vsel %vm1178_vm4, %v1912_v32, -inf }
 0x628   : > { %v1672_v37 = vsub.f32 %v1665_v22, %v1671_v33  ;;  %2541 = vmatpush3.bf16.msra.mxu1 %v2540_v31  ;;  %1917 = vmax.xlane.f32.xlu1 %v1916_v36 }
 0x629   : > { %2463 = vmatprep.subr.mxu1 %v3093_v10 }
 0x62a   : > { %v1673_v38 = vmul.f32 1.442695, %v1672_v37 }
 0x62c   : > { %2735 = vpow2.f32 %v1673_v38 }
 0x62e   : > { %v2734_v39 = vpop.eup %2733 }
 0x62f   : > { %2461 = vmatmul.mubr.msk.f32.vlgmr.msra.gmra.mrb[6].mxu1 %vm1178_vm4, %v2734_v39  ;;  %v1426_v40 = vsel %vm1178_vm4, %v2734_v39, 0.0 }
 0x630   : > { %1427 = vadd.xlane.f32.xlu0 %v1426_v40  ;;  %2465 = vmatprep.mubr.msk.f32.mxu1 %vm3092_vm1, %v3093_v10 }
 0x631   : > { %2464 = vmatpush3.msra.mxu1 %v1512_v43 }
 0x632   : > { %2546 = vmatprep.subr.bf16.mxu1 %v3091_v35 }
 0x636   : > { %v2736_v41 = vpop.eup %2735 }
 0x637   : > { %v1675_v42 = vsel %vm1178_vm4, %v2736_v41, 0.0 }
 0x638   : > { %1676 = vadd.xlane.f32.xlu1 %v1675_v42 }
 0x646   : > { %2710 = vrot.lane.b32.xlu0 %v3635_v52, %s3095_s5 }
 0x649   : > { %2715 = vrot.lane.b32.xlu1 %v3635_v52, %s3096_s4 }
 0x6b5   : > { %v1918_v44 = vpop.xlane.xlu1 %1917 }
 0x6b6   : > { %v1919_v45 = vsub.f32 %v1912_v32, %v1918_v44 }
 0x6b8   : > { %v1920_v46 = vmul.f32 1.442695, %v1919_v45 }
 0x6ba   : > { %2737 = vpow2.f32 %v1920_v46 }
 0x6bd   : > { %v1428_v49 = vpop.xlane.xlu0 %1427 }
 0x6be   : > { %2739 = vrcp.f32 %v1428_v49 }
 0x6c1   : > { %v2711_v50 = vpop.permute.xlu0 %2710 }
 0x6c2   : > { %v2713_v51 = vunpack.i.h.bf16 %v2711_v50  ;;  %v2712_v53 = vunpack.i.l.bf16 %v2711_v50 }
 0x6c4   : > { %v2738_v47 = vpop.eup %2737  ;;  %v2547_v57 = vpack.c.bf16 %v2713_v51, %v2712_v53 }
 0x6c5   : > { %v1922_v48 = vsel %vm1178_vm4, %v2738_v47, 0.0  ;;  %v1677_v59 = vpop.xlane.xlu1 %1676 }
 0x6c6   : > { %1923 = vadd.xlane.f32.xlu0 %v1922_v48  ;;  %2741 = vrcp.f32 %v1677_v59 }
 0x6c8   : > { %v2740_v54 = vpop.eup %2739 }
 0x6c9   : > { %v2716_v60 = vpop.permute.xlu1 %2715 }
 0x6ca   : > { %v2718_v61 = vunpack.i.h.bf16 %v2716_v60  ;;  %v2717_v62 = vunpack.i.l.bf16 %v2716_v60 }
 0x6cc   : > { %v2554_v3 = vpack.c.bf16 %v2718_v61, %v2717_v62 }
 0x6d0   : > { %v2742_v63 = vpop.eup %2741 }
 0x702   : > { %v1506_v55 = vpop.f32.mrb[6].mxu1 }
 0x703   : > { %v1511_v52 = vmul.f32 %v2740_v54, %v1506_v55  ;;  %v2462_v56 = vpop.f32.mrb[7].mxu1 }
 0x705   : > { %2466 = vmatmul.mubr.msk.f32.vlgmr.msra.gmra.mrb[4].mxu1 %vm1098_vm2, %v1511_v52 }
 0x706   : > { %2548 = vmatpush3.bf16.msra.mxu1 %v2547_v57  ;;  %2479 = vmatprep.mubr.msk.f32.mxu1 %vm3092_vm1, %v3093_v10 }
 0x707   : > { %2482 = vmatprep.subr.mxu1 %v3093_v10 }
 0x709   : > { %2480 = vmatmul.mubr.msk.f32.vlgmr.msra.gmra.mrb[8].mxu1 %vm1178_vm4, %v2736_v41 }
 0x70a   : > { %2483 = vmatpush3.msra.mxu1 %v1759_v58  ;;  %2484 = vmatprep.mubr.msk.f32.mxu1 %vm3092_vm1, %v3093_v10 }
 0x70b   : > { %2553 = vmatprep.subr.bf16.mxu1 %v3091_v35  ;;  %v2006_v35 = vld [vmem:[#allocation17 + $0x18] sm:$0xff] }
 0x753   : > { %v1924_v4 = vpop.xlane.xlu0 %1923 }
 0x754   : > { %2743 = vrcp.f32 %v1924_v4 }
 0x75e   : > { %v2744_v5 = vpop.eup %2743 }
 0x7dc   : > { %v1753_v0 = vpop.f32.mrb[8].mxu1 }
 0x7dd   : > { %v1758_v1 = vmul.f32 %v2742_v63, %v1753_v0  ;;  %v2481_v2 = vpop.f32.mrb[9].mxu1 }
 0x7df   : > { %2485 = vmatmul.mubr.msk.f32.vlgmr.msra.gmra.mrb[4].mxu1 %vm1098_vm2, %v1758_v1 }
 0x7e0   : > { %2555 = vmatpush3.bf16.msra.mxu1 %v2554_v3  ;;  %2498 = vmatprep.mubr.msk.f32.mxu1 %vm3092_vm1, %v3093_v10 }
 0x7e1   : > { %2501 = vmatprep.subr.mxu1 %v3093_v10 }
 0x7e3   : > { %2499 = vmatmul.mubr.msk.f32.vlgmr.msra.gmra.mrb[10].mxu1 %vm1178_vm4, %v2738_v47 }
 0x7e4   : > { %2502 = vmatpush3.msra.mxu1 %v2006_v35  ;;  %2503 = vmatprep.mubr.msk.f32.mxu1 %vm3092_vm1, %v3093_v10 }
 0x8b6   : > { %v2000_v6 = vpop.f32.mrb[10].mxu1 }
 0x8b7   : > { %v2005_v7 = vmul.f32 %v2744_v5, %v2000_v6  ;;  %v2500_v8 = vpop.f32.mrb[11].mxu1 }
 0x8b9   : > { %2504 = vmatmul.mubr.msk.f32.vlgmr.msra.gmra.mrb[4].mxu1 %vm1098_vm2, %v2005_v7 }
 0x98c   : > { %v2076_v11 = vpop.f32.mrb[4].mxu1 }
 0x98d   : > { %v2556_v12 = vadd.f32 %v2321_v9, %v2076_v11  ;;  %v2505_v10 = vpop.f32.mrb[5].mxu1 }
 0x98f   : > { %2081 = vst [vmem:[%s699_s14] sm:$0xff] %v2556_v12 }
 0x990   : > { %2990 = shalt.err (!%p2987_p9)
}
 0x991   : > { %s2991_s18 = scalar_lea.hbm %s3706_s15, 128  ;;  %s2995_s6 = scalar_lea.hbm %s3868_s27, 256 }
 0x992   : > { %p2992_p6 = scmp.ne.s32.totalorder %s3706_s15, %s2991_s18  ;;  %p2996_p11 = scmp.lt.u32.totalorder %s3706_s15, %s3868_s27 }
 0x993   : > { %p2997_p8 = scmp.lt.u32.totalorder %s2995_s6, %s2991_s18  ;;  %p2999_p1 = scmp.lt.u32.totalorder %s2991_s18, %s3706_s15 }
 0x994   : > { %p2993_p2 = pnand %p2992_p6, %p3869_p0 }
 0x995   : > { %p2998_p3 = por %p2997_p8, %p2996_p11 }
 0x996   : > { %p2994_p7 = pneg %p2993_p2 }
 0x997   : > { %p3000_p4 = por %p2999_p1, %p2998_p3 }
 0x999   : > { %p3001_p5 = pnand %p3000_p4, %p2994_p7 }
 0x99b   : > { %3004 = shalt.err (!%p3001_p5)
}
 0x99c   : > { %2587 = dma.vmem_to_hbm [thread:$0]  (%p3869_p0), %s3708_s19, 128, %s3706_s15, %s2083_s30  }
 0x99d PF: > { %s3870_s11 = sld [smem:[#allocation27_spill]]  ;;  %s3871_s8 = sld [smem:[#allocation33_spill]] }
 0x99e   : > { %p3873_p12 = scmp.ge.s32.totalorder %s3079_s23, 2 }
 0x9a3   : > { %s2109_s10 = sand.u32 1, %s3870_s11   ;;  %p3872_p10 = scmp.ne.s32.totalorder %s3871_s8, 0 }
 0x9a4   : > { %s2110_s29 = scalar_lea.sflag [#allocation7], %s2109_s10 }
 0x9a5   : > { %p2616_p13 = pnand %p3873_p12, %p3872_p10 }
 0x9a7   : > { %3054 = dma.done.wait (!%p2616_p13), %s2110_s29, 128  }
 0x9a8   : > { %3056 = vsyncadd (!%p2616_p13), %s2110_s29, 4294967168  ;;  %s39_s23 = sadd.s32 1, %s3079_s23   ;;  %s3874_s18 = sld [smem:[#allocation28_spill]] }
 0x9a9   : > { %p36_p9 = scmp.ge.s32.totalorder %s39_s23, 4   ;;  %s3875_s19 = sld [smem:[#allocation29_spill]] }
 0x9aa   : > { %s3876_s20 = sld [smem:[#allocation36_spill]]  ;;  %s3877_s16 = sld [smem:[#allocation34_spill]] }
 0x9ab   : > { %s3878_s21 = smov %s3075_s22  ;;  %38 = sbr.rel (!%p36_p9) target bundleno = 24 (0x18), region = 182 }
 0x9b0   : > { %s3879_s22 = smov %s3877_s16 }
 0x9b2   :  { %2115 = vsyncpa [#allocation6], 1 }
 0x9b3   :  { %2117 = vsyncpa [#allocation6 + $0x1], 1 }
 0x9b4   :  { %2118 = vsyncpa [#allocation9], 1 }
 0x9b5   :  { %2120 = vsyncpa [#allocation9 + $0x1], 1 }
 0x9b6   :  { %2121 = vsyncpa [#allocation12], 1 }
 0x9b7   :  { %2123 = vsyncpa [#allocation12 + $0x1], 1 }
 0x9b8   :  { %2124 = vsyncpa [#allocation15], 1 }
 0x9b9   :  { %2125 = vsyncpa [#allocation18], 1 }
 0x9ba   :  { %2126 = vsyncpa [#allocation7], 1 }
 0x9bb   :  { %2128 = vsyncpa [#allocation7 + $0x1], 1 }

</bundles_post_ra>
